<compile_context>
chip_gen: v7x
topology: tpu7x:2x2x1
jax: 0.10.0
libtpu: 0.0.40
codegen_flags: <defaults>
</compile_context>

<pallas_src>
from functools import partial

import numpy as np
import jax
import jax.numpy as jnp
from jax.experimental import pallas as pl
from jax.experimental.pallas import tpu as pltpu


def _round_up(x, m):
    return (x + m - 1) // m * m


# ---------------------------------------------------------------------------
# Pallas kernel: fused KxK conv (stride 1) + per-channel shift (folded BN) + PReLU
# ---------------------------------------------------------------------------
def _conv_bn_prelu_kernel(x_ref, w_ref, p_ref, o_ref, *, ksize, h_out, w_out):
    bn = x_ref.shape[0]
    c = x_ref.shape[3]
    m = bn * h_out * w_out

    def tap(dy, dx):
        # shifted window of the padded image, folded into the matmul M dim
        xs = x_ref[:, dy:dy + h_out, dx:dx + w_out, :].reshape(m, c)
        return jnp.dot(xs, w_ref[dy * ksize + dx],
                       preferred_element_type=jnp.float32)

    acc = tap(0, 0)                                   # init with first tap
    for dy in range(ksize):                           # static KxK tap loop
        for dx in range(ksize):
            if dy == 0 and dx == 0:
                continue
            acc = acc + tap(dy, dx)

    shift = p_ref[0:1, :]                             # folded BN shift (+bias)
    alpha = p_ref[1:2, :]                             # PReLU slope (traced)
    y = acc + shift
    o_ref[...] = jnp.where(y > 0.0, y, alpha * y)     # PReLU (1 cmp + 1 mul + 1 sel)


@partial(jax.jit, static_argnames=("padding",))
def conv_bn_prelu(x_nchw, weight_oihw, scale, shift, alpha, *, padding):
    N, C, H, W = x_nchw.shape
    Co, Ci, K, K2 = weight_oihw.shape
    assert Ci == C and K == K2
    Hp, Wp = H + 2 * padding, W + 2 * padding
    Ho, Wo = Hp - K + 1, Wp - K + 1
    assert Ho > 0 and Wo > 0
    Co_pad = _round_up(Co, 128)                       # lane-dense output

    # layout glue: NCHW -> padded NHWC
    x_nhwc = jnp.transpose(x_nchw, (0, 2, 3, 1))
    if padding:
        x_nhwc = jnp.pad(
            x_nhwc, ((0, 0), (padding, padding), (padding, padding), (0, 0)))

    # (Co, C, K, K) -> (K*K, C, Co); fold BN scale into the tiny weight tensor,
    # then zero-pad output channels to Co_pad. Tap index = dy*K + dx.
    w = jnp.transpose(weight_oihw, (2, 3, 1, 0)).reshape(K * K, C, Co)
    w = w * scale[None, None, :]
    w = jnp.pad(w, ((0, 0), (0, 0), (0, Co_pad - Co)))

    # packed per-channel params: row 0 = shift (BN beta + folded bias/mean),
    # row 1 = PReLU alpha (broadcast, traced -> no recompiles across act modes)
    shift_p = jnp.pad(shift, (0, Co_pad - Co)).reshape(1, Co_pad)
    alpha_p = jnp.full((1, Co_pad), alpha, jnp.float32)
    params = jnp.concatenate([shift_p, alpha_p], axis=0)        # (2, Co_pad)

    # images per grid step: largest divisor of N whose double-buffered block
    # footprint stays within a few MiB (keeps pipelining + portability)
    per_img_bytes = 4 * (Hp * Wp * C + Ho * Wo * Co_pad)
    BN = N                                                       # full-batch fallback
    for cand in range(N, 0, -1):
        if N % cand:
            continue
        if 2 * cand * per_img_bytes > (8 << 20):
            continue
        if cand != N and (cand * Ho * Wo) % 8 != 0:              # (8,128) layout rule
            continue
        BN = cand
        break
    grid = (N // BN,)
    M_blk = BN * Ho * Wo

    block_bytes = (2 * BN * per_img_bytes
                   + 4 * (K * K * C * Co_pad + 2 * Co_pad))
    vmem_limit = int(min(64 << 20, max(32 << 20, 4 * block_bytes)))

    flops = 2 * N * Ho * Wo * K * K * C * Co_pad + 4 * N * Ho * Wo * Co_pad
    bytes_accessed = 4 * (x_nhwc.size + w.size + params.size + N * Ho * Wo * Co_pad)

    out = pl.pallas_call(
        partial(_conv_bn_prelu_kernel, ksize=K, h_out=Ho, w_out=Wo),
        out_shape=jax.ShapeDtypeStruct((N * Ho * Wo, Co_pad), jnp.float32),
        grid=grid,
        in_specs=[
            pl.BlockSpec((BN, Hp, Wp, C), lambda b: (b, 0, 0, 0)),
            pl.BlockSpec((K * K, C, Co_pad), lambda b: (0, 0, 0)),
            pl.BlockSpec((2, Co_pad), lambda b: (0, 0)),
        ],
        out_specs=pl.BlockSpec((M_blk, Co_pad), lambda b: (b, 0)),
        compiler_params=pltpu.CompilerParams(
            dimension_semantics=("parallel",),
            vmem_limit_bytes=vmem_limit,
        ),
        cost_estimate=pl.CostEstimate(
            flops=int(flops), transcendentals=0,
            bytes_accessed=int(bytes_accessed)),
    )(x_nhwc, w, params)

    # layout glue: strip channel pad, back to NCHW
    y = out.reshape(N, Ho, Wo, Co_pad)[..., :Co]
    return jnp.transpose(y, (0, 3, 1, 2))


# ---------------------------------------------------------------------------
# Module port (forward only)
# ---------------------------------------------------------------------------
class convBlock:
    """JAX/Pallas port of fmmnet.convBlock (forward, inference-mode BatchNorm)."""

    def __init__(self, in_channel, out_channel, kernel_size, norm=True, act=True,
                 stride=1, padding=0, bias=True, key=None):
        if stride != 1:
            # TODO(synk): strided convolution not ported (fmmNet uses stride=1 here)
            raise NotImplementedError("stride != 1 not implemented")
        self.padding = int(padding)
        self.K = int(kernel_size)
        self.Cin, self.Cout = int(in_channel), int(out_channel)
        self.norm_on, self.act_on = bool(norm), bool(act)

        if key is None:
            key = jax.random.PRNGKey(0)
        kw, kb = jax.random.split(key)
        fan_in = in_channel * kernel_size * kernel_size
        bound = 1.0 / np.sqrt(fan_in)
        # deterministic stand-in for nn.Conv2d default (kaiming-uniform) init
        self.weight = jax.random.uniform(
            kw, (out_channel, in_channel, kernel_size, kernel_size),
            jnp.float32, -bound, bound)
        self.bias = (jax.random.uniform(kb, (out_channel,), jnp.float32, -bound, bound)
                     if bias else jnp.zeros((out_channel,), jnp.float32))

        # BatchNorm2d(eps=1e-3), inference-mode running stats at init values.
        # TODO(synk): training-mode BatchNorm (batch statistics) is not computed in-kernel.
        self.bn_eps = 1e-3
        self.bn_gamma = jnp.ones((out_channel,), jnp.float32)
        self.bn_beta = jnp.zeros((out_channel,), jnp.float32)
        self.bn_mean = jnp.zeros((out_channel,), jnp.float32)
        self.bn_var = jnp.ones((out_channel,), jnp.float32)

        # nn.PReLU() default single shared alpha=0.25; act=False -> identity (alpha=1)
        self.alpha = jnp.float32(0.25) if act else jnp.float32(1.0)

    def __call__(self, x):
        if self.norm_on:
            s = self.bn_gamma / jnp.sqrt(self.bn_var + self.bn_eps)
            shift = self.bn_beta + s * (self.bias - self.bn_mean)
        else:
            s = jnp.ones((self.Cout,), jnp.float32)
            shift = self.bias
        return conv_bn_prelu(x, self.weight, s, shift, self.alpha,
                             padding=self.padding)


# ---------------------------------------------------------------------------
# pure-JAX reference (correctness oracle)
# ---------------------------------------------------------------------------
def _ref_forward(m, x):
    y = jax.lax.conv_general_dilated(
        x, m.weight, window_strides=(1, 1),
        padding=[(m.padding, m.padding)] * 2,
        dimension_numbers=("NCHW", "OIHW", "NCHW"))
    y = y + m.bias[None, :, None, None]
    if m.norm_on:
        y = (y - m.bn_mean[None, :, None, None]) / jnp.sqrt(
            m.bn_var[None, :, None, None] + m.bn_eps)
        y = m.bn_gamma[None, :, None, None] * y + m.bn_beta[None, :, None, None]
    if m.act_on:
        y = jnp.maximum(y, 0.0) + m.alpha * jnp.minimum(y, 0.0)
    return y


if __name__ == "__main__":
    x = jax.random.normal(jax.random.PRNGKey(0), (2, 4, 16, 16), jnp.float32)

    # full block: conv(3x3, pad=1) + BN + PReLU
    m1 = convBlock(4, 8, 3, norm=True, act=True, padding=1,
                   key=jax.random.PRNGKey(1))
    y1 = m1(x)
    jax.block_until_ready(y1)
    assert y1.shape == (2, 8, 16, 16), y1.shape
    r1 = _ref_forward(m1, x)
    assert bool(jnp.allclose(y1, r1, atol=1e-4, rtol=1e-4)), \
        float(jnp.max(jnp.abs(y1 - r1)))

    # conv-only variant: norm=False, act=False, no padding
    m2 = convBlock(4, 8, 3, norm=False, act=False, padding=0,
                   key=jax.random.PRNGKey(2))
    y2 = m2(x)
    jax.block_until_ready(y2)
    assert y2.shape == (2, 8, 14, 14), y2.shape
    r2 = _ref_forward(m2, x)
    assert bool(jnp.allclose(y2, r2, atol=1e-4, rtol=1e-4)), \
        float(jnp.max(jnp.abs(y2 - r2)))

    assert bool(jnp.all(jnp.isfinite(y1))) and bool(jnp.all(jnp.isfinite(y2)))
    print("KERNEL_OK")
</pallas_src>

<mosaic_0001>
module attributes {stable_mosaic.version = 11 : i64} {
  func.func @_conv_bn_prelu_kernel(%arg0: i32, %arg1: memref<2x18x18x4xf32, #tpu.memory_space<vmem>>, %arg2: memref<9x4x128xf32, #tpu.memory_space<vmem>>, %arg3: memref<2x128xf32, #tpu.memory_space<vmem>>, %arg4: memref<512x128xf32, #tpu.memory_space<vmem>>) attributes {dimension_semantics = [#tpu.dimension_semantics<parallel>], iteration_bounds = array<i64: 1>, scalar_prefetch = 0 : i64, scratch_operands = 0 : i64, tpu.core_type = #tpu.core_type<tc>, window_params = [{transform_indices = @transform_0, window_bounds = array<i64: 2, 18, 18, 4>}, {pipeline_mode = #tpu.pipeline_mode<synchronous>, transform_indices = @transform_1, window_bounds = array<i64: 9, 4, 128>}, {pipeline_mode = #tpu.pipeline_mode<synchronous>, transform_indices = @transform_2, window_bounds = array<i64: 2, 128>}, {transform_indices = @transform_3, window_bounds = array<i64: 512, 128>}]} {
    %c0 = arith.constant 0 : index
    %c0_0 = arith.constant 0 : index
    %c0_1 = arith.constant 0 : index
    %c0_2 = arith.constant 0 : index
    %0 = vector.load %arg1[%c0, %c0_0, %c0_1, %c0_2] : memref<2x18x18x4xf32, #tpu.memory_space<vmem>>, vector<2x16x16x4xf32>
    %1 = vector.shape_cast %0 : vector<2x16x16x4xf32> to vector<512x4xf32>
    %c0_3 = arith.constant 0 : index
    %c0_4 = arith.constant 0 : index
    %c0_5 = arith.constant 0 : index
    %2 = vector.load %arg2[%c0_3, %c0_4, %c0_5] : memref<9x4x128xf32, #tpu.memory_space<vmem>>, vector<1x4x128xf32>
    %3 = vector.shape_cast %2 : vector<1x4x128xf32> to vector<4x128xf32>
    %cst = arith.constant dense<0.000000e+00> : vector<512x128xf32>
    %4 = tpu.matmul %1, %3, %cst {dimension_numbers = #tpu.dot_dimension_numbers<[1], [0], [0], [1], [0, 0, 1, 1], [], []>} : vector<512x4xf32>, vector<4x128xf32>, vector<512x128xf32> -> vector<512x128xf32>
    %c0_6 = arith.constant 0 : index
    %c0_7 = arith.constant 0 : index
    %c1 = arith.constant 1 : index
    %c0_8 = arith.constant 0 : index
    %5 = vector.load %arg1[%c0_6, %c0_7, %c1, %c0_8] : memref<2x18x18x4xf32, #tpu.memory_space<vmem>>, vector<2x16x16x4xf32>
    %6 = vector.shape_cast %5 : vector<2x16x16x4xf32> to vector<512x4xf32>
    %c1_9 = arith.constant 1 : index
    %c0_10 = arith.constant 0 : index
    %c0_11 = arith.constant 0 : index
    %7 = vector.load %arg2[%c1_9, %c0_10, %c0_11] : memref<9x4x128xf32, #tpu.memory_space<vmem>>, vector<1x4x128xf32>
    %8 = vector.shape_cast %7 : vector<1x4x128xf32> to vector<4x128xf32>
    %cst_12 = arith.constant dense<0.000000e+00> : vector<512x128xf32>
    %9 = tpu.matmul %6, %8, %cst_12 {dimension_numbers = #tpu.dot_dimension_numbers<[1], [0], [0], [1], [0, 0, 1, 1], [], []>} : vector<512x4xf32>, vector<4x128xf32>, vector<512x128xf32> -> vector<512x128xf32>
    %10 = arith.addf %4, %9 : vector<512x128xf32>
    %c0_13 = arith.constant 0 : index
    %c0_14 = arith.constant 0 : index
    %c2 = arith.constant 2 : index
    %c0_15 = arith.constant 0 : index
    %11 = vector.load %arg1[%c0_13, %c0_14, %c2, %c0_15] : memref<2x18x18x4xf32, #tpu.memory_space<vmem>>, vector<2x16x16x4xf32>
    %12 = vector.shape_cast %11 : vector<2x16x16x4xf32> to vector<512x4xf32>
    %c2_16 = arith.constant 2 : index
    %c0_17 = arith.constant 0 : index
    %c0_18 = arith.constant 0 : index
    %13 = vector.load %arg2[%c2_16, %c0_17, %c0_18] : memref<9x4x128xf32, #tpu.memory_space<vmem>>, vector<1x4x128xf32>
    %14 = vector.shape_cast %13 : vector<1x4x128xf32> to vector<4x128xf32>
    %cst_19 = arith.constant dense<0.000000e+00> : vector<512x128xf32>
    %15 = tpu.matmul %12, %14, %cst_19 {dimension_numbers = #tpu.dot_dimension_numbers<[1], [0], [0], [1], [0, 0, 1, 1], [], []>} : vector<512x4xf32>, vector<4x128xf32>, vector<512x128xf32> -> vector<512x128xf32>
    %16 = arith.addf %10, %15 : vector<512x128xf32>
    %c0_20 = arith.constant 0 : index
    %c1_21 = arith.constant 1 : index
    %c0_22 = arith.constant 0 : index
    %c0_23 = arith.constant 0 : index
    %17 = vector.load %arg1[%c0_20, %c1_21, %c0_22, %c0_23] : memref<2x18x18x4xf32, #tpu.memory_space<vmem>>, vector<2x16x16x4xf32>
    %18 = vector.shape_cast %17 : vector<2x16x16x4xf32> to vector<512x4xf32>
    %c3 = arith.constant 3 : index
    %c0_24 = arith.constant 0 : index
    %c0_25 = arith.constant 0 : index
    %19 = vector.load %arg2[%c3, %c0_24, %c0_25] : memref<9x4x128xf32, #tpu.memory_space<vmem>>, vector<1x4x128xf32>
    %20 = vector.shape_cast %19 : vector<1x4x128xf32> to vector<4x128xf32>
    %cst_26 = arith.constant dense<0.000000e+00> : vector<512x128xf32>
    %21 = tpu.matmul %18, %20, %cst_26 {dimension_numbers = #tpu.dot_dimension_numbers<[1], [0], [0], [1], [0, 0, 1, 1], [], []>} : vector<512x4xf32>, vector<4x128xf32>, vector<512x128xf32> -> vector<512x128xf32>
    %22 = arith.addf %16, %21 : vector<512x128xf32>
    %c0_27 = arith.constant 0 : index
    %c1_28 = arith.constant 1 : index
    %c1_29 = arith.constant 1 : index
    %c0_30 = arith.constant 0 : index
    %23 = vector.load %arg1[%c0_27, %c1_28, %c1_29, %c0_30] : memref<2x18x18x4xf32, #tpu.memory_space<vmem>>, vector<2x16x16x4xf32>
    %24 = vector.shape_cast %23 : vector<2x16x16x4xf32> to vector<512x4xf32>
    %c4 = arith.constant 4 : index
    %c0_31 = arith.constant 0 : index
    %c0_32 = arith.constant 0 : index
    %25 = vector.load %arg2[%c4, %c0_31, %c0_32] : memref<9x4x128xf32, #tpu.memory_space<vmem>>, vector<1x4x128xf32>
    %26 = vector.shape_cast %25 : vector<1x4x128xf32> to vector<4x128xf32>
    %cst_33 = arith.constant dense<0.000000e+00> : vector<512x128xf32>
    %27 = tpu.matmul %24, %26, %cst_33 {dimension_numbers = #tpu.dot_dimension_numbers<[1], [0], [0], [1], [0, 0, 1, 1], [], []>} : vector<512x4xf32>, vector<4x128xf32>, vector<512x128xf32> -> vector<512x128xf32>
    %28 = arith.addf %22, %27 : vector<512x128xf32>
    %c0_34 = arith.constant 0 : index
    %c1_35 = arith.constant 1 : index
    %c2_36 = arith.constant 2 : index
    %c0_37 = arith.constant 0 : index
    %29 = vector.load %arg1[%c0_34, %c1_35, %c2_36, %c0_37] : memref<2x18x18x4xf32, #tpu.memory_space<vmem>>, vector<2x16x16x4xf32>
    %30 = vector.shape_cast %29 : vector<2x16x16x4xf32> to vector<512x4xf32>
    %c5 = arith.constant 5 : index
    %c0_38 = arith.constant 0 : index
    %c0_39 = arith.constant 0 : index
    %31 = vector.load %arg2[%c5, %c0_38, %c0_39] : memref<9x4x128xf32, #tpu.memory_space<vmem>>, vector<1x4x128xf32>
    %32 = vector.shape_cast %31 : vector<1x4x128xf32> to vector<4x128xf32>
    %cst_40 = arith.constant dense<0.000000e+00> : vector<512x128xf32>
    %33 = tpu.matmul %30, %32, %cst_40 {dimension_numbers = #tpu.dot_dimension_numbers<[1], [0], [0], [1], [0, 0, 1, 1], [], []>} : vector<512x4xf32>, vector<4x128xf32>, vector<512x128xf32> -> vector<512x128xf32>
    %34 = arith.addf %28, %33 : vector<512x128xf32>
    %c0_41 = arith.constant 0 : index
    %c2_42 = arith.constant 2 : index
    %c0_43 = arith.constant 0 : index
    %c0_44 = arith.constant 0 : index
    %35 = vector.load %arg1[%c0_41, %c2_42, %c0_43, %c0_44] : memref<2x18x18x4xf32, #tpu.memory_space<vmem>>, vector<2x16x16x4xf32>
    %36 = vector.shape_cast %35 : vector<2x16x16x4xf32> to vector<512x4xf32>
    %c6 = arith.constant 6 : index
    %c0_45 = arith.constant 0 : index
    %c0_46 = arith.constant 0 : index
    %37 = vector.load %arg2[%c6, %c0_45, %c0_46] : memref<9x4x128xf32, #tpu.memory_space<vmem>>, vector<1x4x128xf32>
    %38 = vector.shape_cast %37 : vector<1x4x128xf32> to vector<4x128xf32>
    %cst_47 = arith.constant dense<0.000000e+00> : vector<512x128xf32>
    %39 = tpu.matmul %36, %38, %cst_47 {dimension_numbers = #tpu.dot_dimension_numbers<[1], [0], [0], [1], [0, 0, 1, 1], [], []>} : vector<512x4xf32>, vector<4x128xf32>, vector<512x128xf32> -> vector<512x128xf32>
    %40 = arith.addf %34, %39 : vector<512x128xf32>
    %c0_48 = arith.constant 0 : index
    %c2_49 = arith.constant 2 : index
    %c1_50 = arith.constant 1 : index
    %c0_51 = arith.constant 0 : index
    %41 = vector.load %arg1[%c0_48, %c2_49, %c1_50, %c0_51] : memref<2x18x18x4xf32, #tpu.memory_space<vmem>>, vector<2x16x16x4xf32>
    %42 = vector.shape_cast %41 : vector<2x16x16x4xf32> to vector<512x4xf32>
    %c7 = arith.constant 7 : index
    %c0_52 = arith.constant 0 : index
    %c0_53 = arith.constant 0 : index
    %43 = vector.load %arg2[%c7, %c0_52, %c0_53] : memref<9x4x128xf32, #tpu.memory_space<vmem>>, vector<1x4x128xf32>
    %44 = vector.shape_cast %43 : vector<1x4x128xf32> to vector<4x128xf32>
    %cst_54 = arith.constant dense<0.000000e+00> : vector<512x128xf32>
    %45 = tpu.matmul %42, %44, %cst_54 {dimension_numbers = #tpu.dot_dimension_numbers<[1], [0], [0], [1], [0, 0, 1, 1], [], []>} : vector<512x4xf32>, vector<4x128xf32>, vector<512x128xf32> -> vector<512x128xf32>
    %46 = arith.addf %40, %45 : vector<512x128xf32>
    %c0_55 = arith.constant 0 : index
    %c2_56 = arith.constant 2 : index
    %c2_57 = arith.constant 2 : index
    %c0_58 = arith.constant 0 : index
    %47 = vector.load %arg1[%c0_55, %c2_56, %c2_57, %c0_58] : memref<2x18x18x4xf32, #tpu.memory_space<vmem>>, vector<2x16x16x4xf32>
    %48 = vector.shape_cast %47 : vector<2x16x16x4xf32> to vector<512x4xf32>
    %c8 = arith.constant 8 : index
    %c0_59 = arith.constant 0 : index
    %c0_60 = arith.constant 0 : index
    %49 = vector.load %arg2[%c8, %c0_59, %c0_60] : memref<9x4x128xf32, #tpu.memory_space<vmem>>, vector<1x4x128xf32>
    %50 = vector.shape_cast %49 : vector<1x4x128xf32> to vector<4x128xf32>
    %cst_61 = arith.constant dense<0.000000e+00> : vector<512x128xf32>
    %51 = tpu.matmul %48, %50, %cst_61 {dimension_numbers = #tpu.dot_dimension_numbers<[1], [0], [0], [1], [0, 0, 1, 1], [], []>} : vector<512x4xf32>, vector<4x128xf32>, vector<512x128xf32> -> vector<512x128xf32>
    %52 = arith.addf %46, %51 : vector<512x128xf32>
    %c0_62 = arith.constant 0 : index
    %c0_63 = arith.constant 0 : index
    %53 = vector.load %arg3[%c0_62, %c0_63] : memref<2x128xf32, #tpu.memory_space<vmem>>, vector<1x128xf32>
    %c1_64 = arith.constant 1 : index
    %c0_65 = arith.constant 0 : index
    %54 = vector.load %arg3[%c1_64, %c0_65] : memref<2x128xf32, #tpu.memory_space<vmem>>, vector<1x128xf32>
    %55 = vector.broadcast %53 : vector<1x128xf32> to vector<512x128xf32>
    %56 = arith.addf %52, %55 : vector<512x128xf32>
    %cst_66 = arith.constant 0.000000e+00 : f32
    %57 = vector.broadcast %cst_66 : f32 to vector<512x128xf32>
    %58 = arith.cmpf ogt, %56, %57 : vector<512x128xf32>
    %59 = vector.broadcast %54 : vector<1x128xf32> to vector<512x128xf32>
    %60 = arith.mulf %59, %56 : vector<512x128xf32>
    %61 = arith.select %58, %56, %60 : vector<512x128xi1>, vector<512x128xf32>
    %c0_67 = arith.constant 0 : index
    %c0_68 = arith.constant 0 : index
    %62 = vector.load %arg4[%c0_67, %c0_68] : memref<512x128xf32, #tpu.memory_space<vmem>>, vector<512x128xf32>
    tpu.vector_store %arg4[%c0_67, %c0_68], %61 {strides = array<i32>} : memref<512x128xf32, #tpu.memory_space<vmem>>, vector<512x128xf32>,
    return
  }
  func.func @transform_0(%arg0: i32) -> (i32, i32, i32, i32) {
    %c0_i32 = arith.constant 0 : i32
    %c0_i32_0 = arith.constant 0 : i32
    %c0_i32_1 = arith.constant 0 : i32
    %c0_i32_2 = arith.constant 0 : i32
    return %arg0, %c0_i32, %c0_i32_0, %c0_i32_1 : i32, i32, i32, i32
  }
  func.func @transform_1(%arg0: i32) -> (i32, i32, i32) {
    %c0_i32 = arith.constant 0 : i32
    %c0_i32_0 = arith.constant 0 : i32
    %c0_i32_1 = arith.constant 0 : i32
    %c0_i32_2 = arith.constant 0 : i32
    return %c0_i32, %c0_i32_0, %c0_i32_1 : i32, i32, i32
  }
  func.func @transform_2(%arg0: i32) -> (i32, i32) {
    %c0_i32 = arith.constant 0 : i32
    %c0_i32_0 = arith.constant 0 : i32
    %c0_i32_1 = arith.constant 0 : i32
    return %c0_i32, %c0_i32_0 : i32, i32
  }
  func.func @transform_3(%arg0: i32) -> (i32, i32) {
    %c0_i32 = arith.constant 0 : i32
    %c0_i32_0 = arith.constant 0 : i32
    return %arg0, %c0_i32 : i32, i32
  }
}

</mosaic_0001>

<bundles_post_ra>
// kernel: conv_bn_prelu.1
= control target key start
LH: loop header
LB: loop body
LE: loop exit
PB: predicated region body
PF: predicated region fallthrough
CT: control target
= control target key end

     0   :  { %vm338_vm0 = vcmask 1043456   ;;  %vm145_vm1 = vcmask 31744   ;;  %s12387_s1 = inlined_call_operand.vmem [shape: f32[9,4,128], index: 1, kind: input, shape index: {}]   ;;  %s12388_s0 = inlined_call_operand.vmem [shape: f32[2,18,18,4], index: 0, kind: input, shape index: {}]   ;;  %s12389_s2 = inlined_call_operand.vmem [shape: f32[2,128], index: 2, kind: input, shape index: {}]   ;;  %s12390_s3 = inlined_call_operand.vmem [shape: f32[512,128], index: 3, kind: output, shape index: {}]  }
   0x1   :  { %v6613_v0 = vld [vmem:[%s12387_s1 + $0x4] sm:$0xf]  ;;  %v9600_v1 = vld [vmem:[%s12387_s1 + $0x10] sm:$0xf]  ;;  %v6940_v3 = vld [vmem:[%s12388_s0 + $0x19] sm:$0xff] }
   0x2   :  { %v79_v2 = vld [vmem:[%s12388_s0 + $0x1] sm:$0xff]  ;;  %8177 = vmatprep.subr.msk.mxu1 %vm338_vm0, %v6613_v0  ;;  %8569 = vmatprep.subr.msk.mxu0 %vm338_vm0, %v9600_v1  ;;  %v80_v4 = vld [vmem:[%s12388_s0 + $0x9] sm:$0xff]  ;;  %v7134_v7 = vld [vmem:[%s12387_s1 + $0x14] sm:$0xf] }
   0x3   :  { %v78_v5 = vld [vmem:[%s12387_s1] sm:$0xf]  ;;  %8178 = vmatpush3.msk.msra.mxu1 %vm338_vm0, %v6613_v0  ;;  %8179 = vmatprep.mubr.msk.f32.mxu1 %vm145_vm1, %v79_v2  ;;  %v6942_v8 = vld [vmem:[%s12388_s0 + $0x31] sm:$0xff]  ;;  %v6944_v10 = vld [vmem:[%s12388_s0 + $0x49] sm:$0xff] }
   0x4   :  { %v6941_v6 = vld [vmem:[%s12388_s0 + $0x21] sm:$0xff]  ;;  %8570 = vmatpush3.msk.msra.mxu0 %vm338_vm0, %v9600_v1  ;;  %8571 = vmatprep.mubr.msk.f32.mxu0 %vm145_vm1, %v6940_v3  ;;  %v6943_v9 = vld [vmem:[%s12388_s0 + $0x39] sm:$0xff]  ;;  %v6945_v11 = vld [vmem:[%s12388_s0 + $0x51] sm:$0xff] }
   0x5   :  { %8180 = vmatmul.mubr.msk.f32.vlgmr.msra.gmra.mrb[0].mxu1 %vm145_vm1, %v80_v4  ;;  %8275 = vmatprep.subr.msk.mxu1 %vm338_vm0, %v78_v5  ;;  %v6946_v12 = vld [vmem:[%s12388_s0 + $0x61] sm:$0xff]  ;;  %v6947_v13 = vld [vmem:[%s12388_s0 + $0x69] sm:$0xff]  ;;  %v9665_v14 = vld [vmem:[%s12387_s1 + $0x18] sm:$0xf] }
   0x6   :  { %8572 = vmatmul.mubr.msk.f32.vlgmr.msra.gmra.mrb[0].mxu0 %vm145_vm1, %v6941_v6  ;;  %8667 = vmatprep.subr.msk.mxu0 %vm338_vm0, %v7134_v7  ;;  %v6948_v15 = vld [vmem:[%s12388_s0 + $0x79] sm:$0xff]  ;;  %v6949_v16 = vld [vmem:[%s12388_s0 + $0x81] sm:$0xff]  ;;  %v6950_v17 = vld [vmem:[%s12388_s0 + $0x91] sm:$0xff] }
   0x7   :  { %8276 = vmatpush3.msk.msra.mxu1 %vm338_vm0, %v78_v5  ;;  %8668 = vmatpush3.msk.msra.mxu0 %vm338_vm0, %v7134_v7  ;;  %v6951_v18 = vld [vmem:[%s12388_s0 + $0x99] sm:$0xff]  ;;  %v6952_v19 = vld [vmem:[%s12388_s0 + $0xa9] sm:$0xff]  ;;  %v6953_v20 = vld [vmem:[%s12388_s0 + $0xb1] sm:$0xff] }
   0x8   :  { %8182 = vmatprep.mubr.msk.f32.mxu1 %vm145_vm1, %v6940_v3  ;;  %8574 = vmatprep.mubr.msk.f32.mxu0 %vm145_vm1, %v6942_v8  ;;  %v6954_v21 = vld [vmem:[%s12388_s0 + $0xc1] sm:$0xff]  ;;  %v6955_v22 = vld [vmem:[%s12388_s0 + $0xc9] sm:$0xff]  ;;  %v6956_v23 = vld [vmem:[%s12388_s0 + $0xd9] sm:$0xff] }
   0x9   :  { %8183 = vmatmul.mubr.msk.f32.gmra.mrb[2].mxu1 %vm145_vm1, %v6941_v6  ;;  %8765 = vmatprep.subr.msk.mxu0 %vm338_vm0, %v9665_v14  ;;  %v6957_v24 = vld [vmem:[%s12388_s0 + $0xe1] sm:$0xff]  ;;  %v6958_v25 = vld [vmem:[%s12388_s0 + $0xf1] sm:$0xff]  ;;  %v6959_v27 = vld [vmem:[%s12388_s0 + $0xf9] sm:$0xff] }
   0xa   :  { %8575 = vmatmul.mubr.msk.f32.gmra.mrb[2].mxu0 %vm145_vm1, %v6943_v9  ;;  %8185 = vmatprep.mubr.msk.f32.mxu1 %vm145_vm1, %v6942_v8  ;;  %v9725_v26 = vld [vmem:[%s12387_s1 + $0x8] sm:$0xf]  ;;  %v6961_v29 = vld [vmem:[%s12388_s0 + $0x111] sm:$0xff]  ;;  %v6964_v32 = vld [vmem:[%s12388_s0 + $0x139] sm:$0xff] }
   0xb   :  { %8577 = vmatprep.mubr.msk.f32.mxu0 %vm145_vm1, %v6944_v10  ;;  %8373 = vmatprep.subr.msk.mxu1 %vm338_vm0, %v9725_v26  ;;  %v6960_v28 = vld [vmem:[%s12388_s0 + $0x109] sm:$0xff]  ;;  %v6962_v30 = vld [vmem:[%s12388_s0 + $0x121] sm:$0xff]  ;;  %v6966_v34 = vld [vmem:[%s12388_s0 + $0x151] sm:$0xff] }
   0xc   :  { %v6963_v31 = vld [vmem:[%s12388_s0 + $0x129] sm:$0xff]  ;;  %v6965_v33 = vld [vmem:[%s12388_s0 + $0x141] sm:$0xff]  ;;  %v6967_v35 = vld [vmem:[%s12388_s0 + $0x159] sm:$0xff] }
   0xd   :  { %8186 = vmatmul.mubr.msk.f32.gmra.mrb[4].mxu1 %vm145_vm1, %v6943_v9  ;;  %v6968_v36 = vld [vmem:[%s12388_s0 + $0x169] sm:$0xff]  ;;  %v6969_v37 = vld [vmem:[%s12388_s0 + $0x171] sm:$0xff]  ;;  %v6970_v38 = vld [vmem:[%s12388_s0 + $0x181] sm:$0xff] }
   0xe   :  { %8578 = vmatmul.mubr.msk.f32.gmra.mrb[4].mxu0 %vm145_vm1, %v6945_v11  ;;  %8188 = vmatprep.mubr.msk.f32.mxu1 %vm145_vm1, %v6944_v10  ;;  %v6971_v39 = vld [vmem:[%s12388_s0 + $0x189] sm:$0xff]  ;;  %v111_v40 = vld [vmem:[%s12388_s0 + $0x1b1] sm:$0xff]  ;;  %v9802_v41 = vld [vmem:[%s12388_s0 + $0x1a] sm:$0xff] }
   0xf   :  { %8580 = vmatprep.mubr.msk.f32.mxu0 %vm145_vm1, %v6946_v12  ;;  %v112_v42 = vld [vmem:[%s12388_s0 + $0x1b9] sm:$0xff]  ;;  %v9815_v43 = vld [vmem:[%s12388_s0 + $0x22] sm:$0xff]  ;;  %v114_v46 = vld [vmem:[%s12388_s0 + $0x1d1] sm:$0xff] }
  0x10   :  { %v113_v44 = vld [vmem:[%s12388_s0 + $0x1c9] sm:$0xff]  ;;  %v9823_v45 = vld [vmem:[%s12388_s0 + $0x32] sm:$0xff]  ;;  %v9835_v47 = vld [vmem:[%s12387_s1 + $0x1c] sm:$0xf] }
  0x11   :  { %8189 = vmatmul.mubr.msk.f32.gmra.mrb[6].mxu1 %vm145_vm1, %v6945_v11  ;;  %v9844_v48 = vld [vmem:[%s12388_s0 + $0x3a] sm:$0xff]  ;;  %v9852_v50 = vld [vmem:[%s12388_s0 + $0x4a] sm:$0xff]  ;;  %v9868_v52 = vld [vmem:[%s12388_s0 + $0x52] sm:$0xff] }
  0x12   :  { %8581 = vmatmul.mubr.msk.f32.gmra.mrb[6].mxu0 %vm145_vm1, %v6947_v13  ;;  %8191 = vmatprep.mubr.msk.f32.mxu1 %vm145_vm1, %v6946_v12  ;;  %v115_v49 = vld [vmem:[%s12388_s0 + $0x1e1] sm:$0xff]  ;;  %v116_v51 = vld [vmem:[%s12388_s0 + $0x1e9] sm:$0xff]  ;;  %v117_v53 = vld [vmem:[%s12388_s0 + $0x1f9] sm:$0xff] }
  0x13   :  { %8583 = vmatprep.mubr.msk.f32.mxu0 %vm145_vm1, %v6948_v15  ;;  %v9876_v54 = vld [vmem:[%s12388_s0 + $0x62] sm:$0xff]  ;;  %v9890_v56 = vld [vmem:[%s12388_s0 + $0x6a] sm:$0xff]  ;;  %v9898_v58 = vld [vmem:[%s12388_s0 + $0x7a] sm:$0xff] }
  0x14   :  { %v118_v55 = vld [vmem:[%s12388_s0 + $0x201] sm:$0xff]  ;;  %v119_v57 = vld [vmem:[%s12388_s0 + $0x211] sm:$0xff]  ;;  %v120_v59 = vld [vmem:[%s12388_s0 + $0x219] sm:$0xff] }
  0x15   :  { %8192 = vmatmul.mubr.msk.f32.gmra.mrb[8].mxu1 %vm145_vm1, %v6947_v13  ;;  %v9912_v60 = vld [vmem:[%s12388_s0 + $0x82] sm:$0xff]  ;;  %v9920_v62 = vld [vmem:[%s12388_s0 + $0x92] sm:$0xff]  ;;  %v9934_v0 = vld [vmem:[%s12388_s0 + $0x9a] sm:$0xff] }
  0x16   :  { %8584 = vmatmul.mubr.msk.f32.gmra.mrb[8].mxu0 %vm145_vm1, %v6949_v16  ;;  %8194 = vmatprep.mubr.msk.f32.mxu1 %vm145_vm1, %v6948_v15  ;;  %v121_v61 = vld [vmem:[%s12388_s0 + $0x229] sm:$0xff]  ;;  %v122_v63 = vld [vmem:[%s12388_s0 + $0x231] sm:$0xff]  ;;  %v123_v2 = vld [vmem:[%s12388_s0 + $0x241] sm:$0xff] }
  0x17   :  { %8586 = vmatprep.mubr.msk.f32.mxu0 %vm145_vm1, %v6950_v17  ;;  %v9942_v3 = vld [vmem:[%s12388_s0 + $0xaa] sm:$0xff]  ;;  %v9956_v5 = vld [vmem:[%s12388_s0 + $0xb2] sm:$0xff]  ;;  %v9964_v7 = vld [vmem:[%s12388_s0 + $0xc2] sm:$0xff] }
  0x18   :  { %v124_v4 = vld [vmem:[%s12388_s0 + $0x249] sm:$0xff]  ;;  %v125_v6 = vld [vmem:[%s12388_s0 + $0x259] sm:$0xff]  ;;  %v126_v8 = vld [vmem:[%s12388_s0 + $0x261] sm:$0xff] }
  0x19   :  { %8195 = vmatmul.mubr.msk.f32.gmra.mrb[10].mxu1 %vm145_vm1, %v6949_v16  ;;  %v9978_v9 = vld [vmem:[%s12388_s0 + $0xca] sm:$0xff]  ;;  %v9986_v11 = vld [vmem:[%s12388_s0 + $0xda] sm:$0xff]  ;;  %v10000_v13 = vld [vmem:[%s12388_s0 + $0xe2] sm:$0xff] }
  0x1a   :  { %8587 = vmatmul.mubr.msk.f32.gmra.mrb[10].mxu0 %vm145_vm1, %v6951_v18  ;;  %8197 = vmatprep.mubr.msk.f32.mxu1 %vm145_vm1, %v6950_v17  ;;  %v127_v10 = vld [vmem:[%s12388_s0 + $0x271] sm:$0xff]  ;;  %v128_v12 = vld [vmem:[%s12388_s0 + $0x279] sm:$0xff] }
  0x1b   :  { %8589 = vmatprep.mubr.msk.f32.mxu0 %vm145_vm1, %v6952_v19  ;;  %v10008_v15 = vld [vmem:[%s12388_s0 + $0xf2] sm:$0xff]  ;;  %v10022_v17 = vld [vmem:[%s12388_s0 + $0xfa] sm:$0xff] }
  0x1c   :  { %v130_v16 = vld [vmem:[%s12388_s0 + $0x291] sm:$0xff] }
  0x1d   :  { %8198 = vmatmul.mubr.msk.f32.gmra.mrb[12].mxu1 %vm145_vm1, %v6951_v18  ;;  %v131_v18 = vld [vmem:[%s12388_s0 + $0x2a1] sm:$0xff] }
  0x1e   :  { %8590 = vmatmul.mubr.msk.f32.gmra.mrb[12].mxu0 %vm145_vm1, %v6953_v20  ;;  %8200 = vmatprep.mubr.msk.f32.mxu1 %vm145_vm1, %v6952_v19  ;;  %v10030_v19 = vld [vmem:[%s12388_s0 + $0x10a] sm:$0xff] }
  0x1f   :  { %8592 = vmatprep.mubr.msk.f32.mxu0 %vm145_vm1, %v6954_v21 }
  0x21   :  { %8201 = vmatmul.mubr.msk.f32.gmra.mrb[14].mxu1 %vm145_vm1, %v6953_v20  ;;  %v132_v20 = vld [vmem:[%s12388_s0 + $0x2a9] sm:$0xff] }
  0x22   :  { %8593 = vmatmul.mubr.msk.f32.gmra.mrb[14].mxu0 %vm145_vm1, %v6955_v22  ;;  %8203 = vmatprep.mubr.msk.f32.mxu1 %vm145_vm1, %v6954_v21  ;;  %v10044_v21 = vld [vmem:[%s12388_s0 + $0x112] sm:$0xff] }
  0x23   :  { %8595 = vmatprep.mubr.msk.f32.mxu0 %vm145_vm1, %v6956_v23 }
  0x25   :  { %8204 = vmatmul.mubr.msk.f32.gmra.mrb[16].mxu1 %vm145_vm1, %v6955_v22  ;;  %v133_v22 = vld [vmem:[%s12388_s0 + $0x2b9] sm:$0xff] }
  0x26   :  { %8596 = vmatmul.mubr.msk.f32.gmra.mrb[16].mxu0 %vm145_vm1, %v6957_v24  ;;  %8206 = vmatprep.mubr.msk.f32.mxu1 %vm145_vm1, %v6956_v23  ;;  %v10052_v23 = vld [vmem:[%s12388_s0 + $0x122] sm:$0xff] }
  0x27   :  { %8598 = vmatprep.mubr.msk.f32.mxu0 %vm145_vm1, %v6958_v25 }
  0x29   :  { %8207 = vmatmul.mubr.msk.f32.gmra.mrb[18].mxu1 %vm145_vm1, %v6957_v24  ;;  %v134_v24 = vld [vmem:[%s12388_s0 + $0x2c1] sm:$0xff] }
  0x2a   :  { %8599 = vmatmul.mubr.msk.f32.gmra.mrb[18].mxu0 %vm145_vm1, %v6959_v27  ;;  %8209 = vmatprep.mubr.msk.f32.mxu1 %vm145_vm1, %v6958_v25  ;;  %v10066_v25 = vld [vmem:[%s12388_s0 + $0x12a] sm:$0xff] }
  0x2b   :  { %8601 = vmatprep.mubr.msk.f32.mxu0 %vm145_vm1, %v6960_v28 }
  0x2d   :  { %8210 = vmatmul.mubr.msk.f32.gmra.mrb[20].mxu1 %vm145_vm1, %v6959_v27  ;;  %v135_v27 = vld [vmem:[%s12388_s0 + $0x2d1] sm:$0xff] }
  0x2e   :  { %8602 = vmatmul.mubr.msk.f32.gmra.mrb[20].mxu0 %vm145_vm1, %v6961_v29  ;;  %8212 = vmatprep.mubr.msk.f32.mxu1 %vm145_vm1, %v6960_v28  ;;  %v10074_v28 = vld [vmem:[%s12388_s0 + $0x13a] sm:$0xff] }
  0x2f   :  { %8604 = vmatprep.mubr.msk.f32.mxu0 %vm145_vm1, %v6962_v30 }
  0x31   :  { %8213 = vmatmul.mubr.msk.f32.gmra.mrb[22].mxu1 %vm145_vm1, %v6961_v29  ;;  %v136_v29 = vld [vmem:[%s12388_s0 + $0x2d9] sm:$0xff] }
  0x32   :  { %8605 = vmatmul.mubr.msk.f32.gmra.mrb[22].mxu0 %vm145_vm1, %v6963_v31  ;;  %8215 = vmatprep.mubr.msk.f32.mxu1 %vm145_vm1, %v6962_v30  ;;  %v10088_v30 = vld [vmem:[%s12388_s0 + $0x142] sm:$0xff] }
  0x33   :  { %8607 = vmatprep.mubr.msk.f32.mxu0 %vm145_vm1, %v6964_v32 }
  0x35   :  { %8216 = vmatmul.mubr.msk.f32.gmra.mrb[24].mxu1 %vm145_vm1, %v6963_v31  ;;  %v137_v31 = vld [vmem:[%s12388_s0 + $0x2e9] sm:$0xff] }
  0x36   :  { %8608 = vmatmul.mubr.msk.f32.gmra.mrb[24].mxu0 %vm145_vm1, %v6965_v33  ;;  %8218 = vmatprep.mubr.msk.f32.mxu1 %vm145_vm1, %v6964_v32  ;;  %v10096_v32 = vld [vmem:[%s12388_s0 + $0x152] sm:$0xff] }
  0x37   :  { %8610 = vmatprep.mubr.msk.f32.mxu0 %vm145_vm1, %v6966_v34 }
  0x39   :  { %8219 = vmatmul.mubr.msk.f32.gmra.mrb[26].mxu1 %vm145_vm1, %v6965_v33  ;;  %v138_v33 = vld [vmem:[%s12388_s0 + $0x2f1] sm:$0xff] }
  0x3a   :  { %8611 = vmatmul.mubr.msk.f32.gmra.mrb[26].mxu0 %vm145_vm1, %v6967_v35  ;;  %8221 = vmatprep.mubr.msk.f32.mxu1 %vm145_vm1, %v6966_v34  ;;  %v10110_v34 = vld [vmem:[%s12388_s0 + $0x15a] sm:$0xff] }
  0x3b   :  { %8613 = vmatprep.mubr.msk.f32.mxu0 %vm145_vm1, %v6968_v36 }
  0x3d   :  { %8222 = vmatmul.mubr.msk.f32.gmra.mrb[28].mxu1 %vm145_vm1, %v6967_v35  ;;  %v139_v35 = vld [vmem:[%s12388_s0 + $0x301] sm:$0xff] }
  0x3e   :  { %8614 = vmatmul.mubr.msk.f32.gmra.mrb[28].mxu0 %vm145_vm1, %v6969_v37  ;;  %8224 = vmatprep.mubr.msk.f32.mxu1 %vm145_vm1, %v6968_v36  ;;  %v10118_v36 = vld [vmem:[%s12388_s0 + $0x16a] sm:$0xff] }
  0x3f   :  { %8616 = vmatprep.mubr.msk.f32.mxu0 %vm145_vm1, %v6970_v38  ;;  %v10132_v38 = vld [vmem:[%s12388_s0 + $0x172] sm:$0xff] }
  0x40   :  { %12429 = vst [vmem:[#allocation2_spill] sm:$0xff] %v10132_v38 }
  0x41   :  { %8225 = vmatmul.mubr.msk.f32.gmra.mrb[30].mxu1 %vm145_vm1, %v6969_v37  ;;  %v140_v37 = vld [vmem:[%s12388_s0 + $0x309] sm:$0xff] }
  0x42   :  { %8617 = vmatmul.mubr.msk.f32.gmra.mrb[30].mxu0 %vm145_vm1, %v6971_v39  ;;  %8227 = vmatprep.mubr.msk.f32.mxu1 %vm145_vm1, %v111_v40  ;;  %v141_v39 = vld [vmem:[%s12388_s0 + $0x319] sm:$0xff]  ;;  %v7100_v40 = vld [vmem:[%s12388_s0 + $0x182] sm:$0xff] }
  0x43   :  { %8669 = vmatprep.mubr.msk.f32.mxu0 %vm145_vm1, %v9802_v41 }
  0x45   :  { %8228 = vmatmul.mubr.msk.f32.gmra.mrb[32].mxu1 %vm145_vm1, %v112_v42  ;;  %v142_v42 = vld [vmem:[%s12388_s0 + $0x321] sm:$0xff] }
  0x46   :  { %8670 = vmatmul.mubr.msk.f32.vlgmr.msra.gmra.mrb[0].mxu0 %vm145_vm1, %v9815_v43  ;;  %8230 = vmatprep.mubr.msk.f32.mxu1 %vm145_vm1, %v113_v44  ;;  %v7101_v44 = vld [vmem:[%s12388_s0 + $0x18a] sm:$0xff] }
  0x47   :  { %8766 = vmatpush3.msk.msra.mxu0 %vm338_vm0, %v9665_v14  ;;  %8672 = vmatprep.mubr.msk.f32.mxu0 %vm145_vm1, %v9823_v45  ;;  %v129_v14 = vld [vmem:[%s12388_s0 + $0x289] sm:$0xff] }
  0x48   :  { %8863 = vmatprep.subr.msk.mxu0 %vm338_vm0, %v9835_v47 }
  0x49   :  { %8231 = vmatmul.mubr.msk.f32.gmra.mrb[34].mxu1 %vm145_vm1, %v114_v46  ;;  %v14_v46 = vld [vmem:[%s12388_s0] sm:$0xff] }
  0x4a   :  { %8673 = vmatmul.mubr.msk.f32.gmra.mrb[2].mxu0 %vm145_vm1, %v9844_v48  ;;  %8233 = vmatprep.mubr.msk.f32.mxu1 %vm145_vm1, %v115_v49  ;;  %v10157_v49 = vld [vmem:[%s12388_s0 + $0x1ca] sm:$0xff] }
  0x4b   :  { %8675 = vmatprep.mubr.msk.f32.mxu0 %vm145_vm1, %v9852_v50  ;;  %12430 = vst [vmem:[#allocation3_spill] sm:$0xff] %v10157_v49 }
  0x4d   :  { %8234 = vmatmul.mubr.msk.f32.gmra.mrb[36].mxu1 %vm145_vm1, %v116_v51  ;;  %v15_v51 = vld [vmem:[%s12388_s0 + $0x8] sm:$0xff] }
  0x4e   :  { %8676 = vmatmul.mubr.msk.f32.gmra.mrb[4].mxu0 %vm145_vm1, %v9868_v52  ;;  %8236 = vmatprep.mubr.msk.f32.mxu1 %vm145_vm1, %v117_v53  ;;  %v10170_v53 = vld [vmem:[%s12388_s0 + $0x1d2] sm:$0xff] }
  0x4f   :  { %8678 = vmatprep.mubr.msk.f32.mxu0 %vm145_vm1, %v9876_v54  ;;  %12431 = vst [vmem:[#allocation4_spill] sm:$0xff] %v10170_v53 }
  0x51   :  { %8237 = vmatmul.mubr.msk.f32.gmra.mrb[38].mxu1 %vm145_vm1, %v118_v55  ;;  %v16_v55 = vld [vmem:[%s12388_s0 + $0x18] sm:$0xff] }
  0x52   :  { %8679 = vmatmul.mubr.msk.f32.gmra.mrb[6].mxu0 %vm145_vm1, %v9890_v56  ;;  %8239 = vmatprep.mubr.msk.f32.mxu1 %vm145_vm1, %v119_v57  ;;  %v10178_v57 = vld [vmem:[%s12388_s0 + $0x1e2] sm:$0xff] }
  0x53   :  { %8681 = vmatprep.mubr.msk.f32.mxu0 %vm145_vm1, %v9898_v58  ;;  %12432 = vst [vmem:[#allocation5_spill] sm:$0xff] %v10178_v57 }
  0x55   :  { %8240 = vmatmul.mubr.msk.f32.gmra.mrb[40].mxu1 %vm145_vm1, %v120_v59  ;;  %v10184_v59 = vld [vmem:[%s12387_s1 + $0xc] sm:$0xf] }
  0x56   :  { %8682 = vmatmul.mubr.msk.f32.gmra.mrb[8].mxu0 %vm145_vm1, %v9912_v60  ;;  %8242 = vmatprep.mubr.msk.f32.mxu1 %vm145_vm1, %v121_v61  ;;  %v17_v61 = vld [vmem:[%s12388_s0 + $0x20] sm:$0xff] }
  0x57   :  { %8684 = vmatprep.mubr.msk.f32.mxu0 %vm145_vm1, %v9920_v62 }
  0x59   :  { %8243 = vmatmul.mubr.msk.f32.gmra.mrb[42].mxu1 %vm145_vm1, %v122_v63  ;;  %v10199_v63 = vld [vmem:[%s12388_s0 + $0x1ea] sm:$0xff] }
  0x5a   :  { %8685 = vmatmul.mubr.msk.f32.gmra.mrb[10].mxu0 %vm145_vm1, %v9934_v0  ;;  %8245 = vmatprep.mubr.msk.f32.mxu1 %vm145_vm1, %v123_v2  ;;  %12433 = vst [vmem:[#allocation6_spill] sm:$0xff] %v10199_v63  ;;  %v10204_v2 = vld [vmem:[%s12388_s0 + $0x30] sm:$0xff] }
  0x5b   :  { %8687 = vmatprep.mubr.msk.f32.mxu0 %vm145_vm1, %v9942_v3 }
  0x5d   :  { %8246 = vmatmul.mubr.msk.f32.gmra.mrb[44].mxu1 %vm145_vm1, %v124_v4  ;;  %v10221_v4 = vld [vmem:[%s12388_s0 + $0x38] sm:$0xff] }
  0x5e   :  { %8688 = vmatmul.mubr.msk.f32.gmra.mrb[12].mxu0 %vm145_vm1, %v9956_v5  ;;  %8248 = vmatprep.mubr.msk.f32.mxu1 %vm145_vm1, %v125_v6  ;;  %v10228_v6 = vld [vmem:[%s12388_s0 + $0x202] sm:$0xff] }
  0x5f   :  { %8690 = vmatprep.mubr.msk.f32.mxu0 %vm145_vm1, %v9964_v7  ;;  %12435 = vst [vmem:[#allocation8_spill] sm:$0xff] %v10228_v6 }
  0x61   :  { %8249 = vmatmul.mubr.msk.f32.gmra.mrb[46].mxu1 %vm145_vm1, %v126_v8  ;;  %v10233_v8 = vld [vmem:[%s12388_s0 + $0x48] sm:$0xff] }
  0x62   :  { %8691 = vmatmul.mubr.msk.f32.gmra.mrb[14].mxu0 %vm145_vm1, %v9978_v9  ;;  %8251 = vmatprep.mubr.msk.f32.mxu1 %vm145_vm1, %v127_v10  ;;  %v10238_v10 = vld [vmem:[%s12388_s0 + $0x212] sm:$0xff] }
  0x63   :  { %8693 = vmatprep.mubr.msk.f32.mxu0 %vm145_vm1, %v9986_v11  ;;  %12436 = vst [vmem:[#allocation9_spill] sm:$0xff] %v10238_v10 }
  0x65   :  { %8252 = vmatmul.mubr.msk.f32.gmra.mrb[48].mxu1 %vm145_vm1, %v128_v12  ;;  %v10249_v12 = vld [vmem:[%s12388_s0 + $0x50] sm:$0xff] }
  0x66   :  { %8694 = vmatmul.mubr.msk.f32.gmra.mrb[16].mxu0 %vm145_vm1, %v10000_v13  ;;  %8254 = vmatprep.mubr.msk.f32.mxu1 %vm145_vm1, %v129_v14  ;;  %v10256_v14 = vld [vmem:[%s12388_s0 + $0x21a] sm:$0xff] }
  0x67   :  { %8696 = vmatprep.mubr.msk.f32.mxu0 %vm145_vm1, %v10008_v15  ;;  %12437 = vst [vmem:[#allocation10_spill] sm:$0xff] %v10256_v14 }
  0x69   :  { %8255 = vmatmul.mubr.msk.f32.gmra.mrb[50].mxu1 %vm145_vm1, %v130_v16  ;;  %v10261_v16 = vld [vmem:[%s12388_s0 + $0x60] sm:$0xff] }
  0x6a   :  { %8697 = vmatmul.mubr.msk.f32.gmra.mrb[18].mxu0 %vm145_vm1, %v10022_v17  ;;  %8257 = vmatprep.mubr.msk.f32.mxu1 %vm145_vm1, %v131_v18  ;;  %v10266_v18 = vld [vmem:[%s12388_s0 + $0x22a] sm:$0xff] }
  0x6b   :  { %8699 = vmatprep.mubr.msk.f32.mxu0 %vm145_vm1, %v10030_v19  ;;  %12438 = vst [vmem:[#allocation11_spill] sm:$0xff] %v10266_v18 }
  0x6d   :  { %8258 = vmatmul.mubr.msk.f32.gmra.mrb[52].mxu1 %vm145_vm1, %v132_v20  ;;  %v10277_v20 = vld [vmem:[%s12388_s0 + $0x68] sm:$0xff] }
  0x6e   :  { %8700 = vmatmul.mubr.msk.f32.gmra.mrb[20].mxu0 %vm145_vm1, %v10044_v21  ;;  %8260 = vmatprep.mubr.msk.f32.mxu1 %vm145_vm1, %v133_v22  ;;  %v10284_v22 = vld [vmem:[%s12388_s0 + $0x232] sm:$0xff] }
  0x6f   :  { %8702 = vmatprep.mubr.msk.f32.mxu0 %vm145_vm1, %v10052_v23  ;;  %12439 = vst [vmem:[#allocation12_spill] sm:$0xff] %v10284_v22 }
  0x71   :  { %8261 = vmatmul.mubr.msk.f32.gmra.mrb[54].mxu1 %vm145_vm1, %v134_v24  ;;  %v10289_v24 = vld [vmem:[%s12388_s0 + $0x78] sm:$0xff] }
  0x72   :  { %8703 = vmatmul.mubr.msk.f32.gmra.mrb[22].mxu0 %vm145_vm1, %v10066_v25  ;;  %8263 = vmatprep.mubr.msk.f32.mxu1 %vm145_vm1, %v135_v27  ;;  %v10294_v27 = vld [vmem:[%s12388_s0 + $0x242] sm:$0xff] }
  0x73   :  { %8705 = vmatprep.mubr.msk.f32.mxu0 %vm145_vm1, %v10074_v28  ;;  %12440 = vst [vmem:[#allocation13_spill] sm:$0xff] %v10294_v27 }
  0x75   :  { %8264 = vmatmul.mubr.msk.f32.gmra.mrb[56].mxu1 %vm145_vm1, %v136_v29  ;;  %v10305_v29 = vld [vmem:[%s12388_s0 + $0x80] sm:$0xff] }
  0x76   :  { %8706 = vmatmul.mubr.msk.f32.gmra.mrb[24].mxu0 %vm145_vm1, %v10088_v30  ;;  %8266 = vmatprep.mubr.msk.f32.mxu1 %vm145_vm1, %v137_v31  ;;  %v10312_v31 = vld [vmem:[%s12388_s0 + $0x24a] sm:$0xff] }
  0x77   :  { %8708 = vmatprep.mubr.msk.f32.mxu0 %vm145_vm1, %v10096_v32  ;;  %12441 = vst [vmem:[#allocation14_spill] sm:$0xff] %v10312_v31 }
  0x79   :  { %8267 = vmatmul.mubr.msk.f32.gmra.mrb[58].mxu1 %vm145_vm1, %v138_v33  ;;  %v10317_v33 = vld [vmem:[%s12388_s0 + $0x90] sm:$0xff] }
  0x7a   :  { %8709 = vmatmul.mubr.msk.f32.gmra.mrb[26].mxu0 %vm145_vm1, %v10110_v34  ;;  %8269 = vmatprep.mubr.msk.f32.mxu1 %vm145_vm1, %v139_v35  ;;  %v10322_v35 = vld [vmem:[%s12388_s0 + $0x25a] sm:$0xff] }
  0x7b   :  { %8711 = vmatprep.mubr.msk.f32.mxu0 %vm145_vm1, %v10118_v36  ;;  %12442 = vst [vmem:[#allocation15_spill] sm:$0xff] %v10322_v35 }
  0x7d   :  { %8270 = vmatmul.mubr.msk.f32.gmra.mrb[60].mxu1 %vm145_vm1, %v140_v37  ;;  %v10333_v37 = vld [vmem:[%s12388_s0 + $0x98] sm:$0xff] }
  0x7e   :  { %8712 = vmatmul.mubr.msk.f32.gmra.mrb[28].mxu0 %vm145_vm1, %v10132_v38  ;;  %8272 = vmatprep.mubr.msk.f32.mxu1 %vm145_vm1, %v141_v39  ;;  %v10340_v39 = vld [vmem:[%s12388_s0 + $0x262] sm:$0xff]  ;;  %v46_v38 = vld [vmem:[%s12388_s0 + $0x1b0] sm:$0xff] }
  0x7f   :  { %8714 = vmatprep.mubr.msk.f32.mxu0 %vm145_vm1, %v7100_v40  ;;  %12443 = vst [vmem:[#allocation16_spill] sm:$0xff] %v10340_v39  ;;  %v10345_v40 = vld [vmem:[%s12388_s0 + $0xa8] sm:$0xff] }
  0x81   :  { %8273 = vmatmul.mubr.msk.f32.gmra.mrb[62].mxu1 %vm145_vm1, %v142_v42  ;;  %v10350_v42 = vld [vmem:[%s12388_s0 + $0x272] sm:$0xff] }
  0x82   :  { %8715 = vmatmul.mubr.msk.f32.gmra.mrb[30].mxu0 %vm145_vm1, %v7101_v44  ;;  %8277 = vmatprep.mubr.msk.f32.mxu1 %vm145_vm1, %v14_v46  ;;  %12444 = vst [vmem:[#allocation17_spill] sm:$0xff] %v10350_v42  ;;  %v10361_v44 = vld [vmem:[%s12388_s0 + $0xb0] sm:$0xff]  ;;  %v10368_v46 = vld [vmem:[%s12388_s0 + $0x27a] sm:$0xff] }
  0x83   :  { %8717 = vmatprep.mubr.msk.f32.mxu0 %vm145_vm1, %v10157_v49  ;;  %12445 = vst [vmem:[#allocation18_spill] sm:$0xff] %v10368_v46  ;;  %v7133_v49 = vld [vmem:[%s12388_s0 + $0x33a] sm:$0xff] }
  0x85   :  { %8278 = vmatmul.mubr.msk.f32.vlgmr.msra.gmra.mrb[0].mxu1 %vm145_vm1, %v15_v51  ;;  %v10373_v51 = vld [vmem:[%s12388_s0 + $0xc0] sm:$0xff] }
  0x86   :  { %8718 = vmatmul.mubr.msk.f32.gmra.mrb[32].mxu0 %vm145_vm1, %v10170_v53  ;;  %8374 = vmatpush3.msk.msra.mxu1 %vm338_vm0, %v9725_v26  ;;  %v10209_v26 = vld [vmem:[%s12388_s0 + $0x1fa] sm:$0xff]  ;;  %v7132_v53 = vld [vmem:[%s12388_s0 + $0x332] sm:$0xff] }
  0x87   :  { %8280 = vmatprep.mubr.msk.f32.mxu1 %vm145_vm1, %v16_v55  ;;  %8720 = vmatprep.mubr.msk.f32.mxu0 %vm145_vm1, %v10178_v57  ;;  %12434 = vst [vmem:[#allocation7_spill] sm:$0xff] %v10209_v26  ;;  %v10378_v55 = vld [vmem:[%s12388_s0 + $0x28a] sm:$0xff]  ;;  %v10564_v57 = vld [vmem:[%s12388_s0 + $0x322] sm:$0xff] }
  0x88   :  { %8471 = vmatprep.subr.msk.mxu1 %vm338_vm0, %v10184_v59  ;;  %12446 = vst [vmem:[#allocation19_spill] sm:$0xff] %v10378_v55  ;;  %12459 = vst [vmem:[#allocation32_spill] sm:$0xff] %v10564_v57 }
  0x89   :  { %8281 = vmatmul.mubr.msk.f32.gmra.mrb[2].mxu1 %vm145_vm1, %v17_v61  ;;  %v10389_v61 = vld [vmem:[%s12388_s0 + $0xc8] sm:$0xff] }
  0x8a   :  { %8721 = vmatmul.mubr.msk.f32.gmra.mrb[34].mxu0 %vm145_vm1, %v10199_v63  ;;  %8283 = vmatprep.mubr.msk.f32.mxu1 %vm145_vm1, %v10204_v2  ;;  %v10546_v63 = vld [vmem:[%s12388_s0 + $0x31a] sm:$0xff] }
  0x8b   :  { %8723 = vmatprep.mubr.msk.f32.mxu0 %vm145_vm1, %v10209_v26  ;;  %v10536_v26 = vld [vmem:[%s12388_s0 + $0x30a] sm:$0xff]  ;;  %12458 = vst [vmem:[#allocation31_spill] sm:$0xff] %v10546_v63 }
  0x8c   :  { %12457 = vst [vmem:[#allocation30_spill] sm:$0xff] %v10536_v26 }
  0x8d   :  { %8284 = vmatmul.mubr.msk.f32.gmra.mrb[4].mxu1 %vm145_vm1, %v10221_v4 }
  0x8e   :  { %8724 = vmatmul.mubr.msk.f32.gmra.mrb[36].mxu0 %vm145_vm1, %v10228_v6  ;;  %8286 = vmatprep.mubr.msk.f32.mxu1 %vm145_vm1, %v10233_v8  ;;  %v10518_v6 = vld [vmem:[%s12388_s0 + $0x302] sm:$0xff] }
  0x8f   :  { %8726 = vmatprep.mubr.msk.f32.mxu0 %vm145_vm1, %v10238_v10  ;;  %v10508_v10 = vld [vmem:[%s12388_s0 + $0x2f2] sm:$0xff]  ;;  %12456 = vst [vmem:[#allocation29_spill] sm:$0xff] %v10518_v6 }
  0x90   :  { %12455 = vst [vmem:[#allocation28_spill] sm:$0xff] %v10508_v10 }
  0x91   :  { %8287 = vmatmul.mubr.msk.f32.gmra.mrb[6].mxu1 %vm145_vm1, %v10249_v12 }
  0x92   :  { %8727 = vmatmul.mubr.msk.f32.gmra.mrb[38].mxu0 %vm145_vm1, %v10256_v14  ;;  %8289 = vmatprep.mubr.msk.f32.mxu1 %vm145_vm1, %v10261_v16  ;;  %v10490_v14 = vld [vmem:[%s12388_s0 + $0x2ea] sm:$0xff] }
  0x93   :  { %8729 = vmatprep.mubr.msk.f32.mxu0 %vm145_vm1, %v10266_v18  ;;  %v10480_v18 = vld [vmem:[%s12388_s0 + $0x2da] sm:$0xff]  ;;  %12454 = vst [vmem:[#allocation27_spill] sm:$0xff] %v10490_v14 }
  0x94   :  { %12453 = vst [vmem:[#allocation26_spill] sm:$0xff] %v10480_v18 }
  0x95   :  { %8290 = vmatmul.mubr.msk.f32.gmra.mrb[8].mxu1 %vm145_vm1, %v10277_v20 }
  0x96   :  { %8730 = vmatmul.mubr.msk.f32.gmra.mrb[40].mxu0 %vm145_vm1, %v10284_v22  ;;  %8292 = vmatprep.mubr.msk.f32.mxu1 %vm145_vm1, %v10289_v24  ;;  %v10462_v22 = vld [vmem:[%s12388_s0 + $0x2d2] sm:$0xff] }
  0x97   :  { %8732 = vmatprep.mubr.msk.f32.mxu0 %vm145_vm1, %v10294_v27  ;;  %v10452_v27 = vld [vmem:[%s12388_s0 + $0x2c2] sm:$0xff]  ;;  %12452 = vst [vmem:[#allocation25_spill] sm:$0xff] %v10462_v22 }
  0x98   :  { %12451 = vst [vmem:[#allocation24_spill] sm:$0xff] %v10452_v27 }
  0x99   :  { %8293 = vmatmul.mubr.msk.f32.gmra.mrb[10].mxu1 %vm145_vm1, %v10305_v29 }
  0x9a   :  { %8733 = vmatmul.mubr.msk.f32.gmra.mrb[42].mxu0 %vm145_vm1, %v10312_v31  ;;  %8295 = vmatprep.mubr.msk.f32.mxu1 %vm145_vm1, %v10317_v33  ;;  %v10434_v31 = vld [vmem:[%s12388_s0 + $0x2ba] sm:$0xff] }
  0x9b   :  { %8735 = vmatprep.mubr.msk.f32.mxu0 %vm145_vm1, %v10322_v35  ;;  %v10424_v35 = vld [vmem:[%s12388_s0 + $0x2aa] sm:$0xff]  ;;  %12450 = vst [vmem:[#allocation23_spill] sm:$0xff] %v10434_v31 }
  0x9c   :  { %12449 = vst [vmem:[#allocation22_spill] sm:$0xff] %v10424_v35 }
  0x9d   :  { %8296 = vmatmul.mubr.msk.f32.gmra.mrb[12].mxu1 %vm145_vm1, %v10333_v37 }
  0x9e   :  { %8736 = vmatmul.mubr.msk.f32.gmra.mrb[44].mxu0 %vm145_vm1, %v10340_v39  ;;  %8298 = vmatprep.mubr.msk.f32.mxu1 %vm145_vm1, %v10345_v40  ;;  %v10406_v39 = vld [vmem:[%s12388_s0 + $0x2a2] sm:$0xff] }
  0x9f   :  { %8738 = vmatprep.mubr.msk.f32.mxu0 %vm145_vm1, %v10350_v42  ;;  %v10396_v42 = vld [vmem:[%s12388_s0 + $0x292] sm:$0xff]  ;;  %12448 = vst [vmem:[#allocation21_spill] sm:$0xff] %v10406_v39 }
  0xa0   :  { %12447 = vst [vmem:[#allocation20_spill] sm:$0xff] %v10396_v42 }
  0xa1   :  { %8299 = vmatmul.mubr.msk.f32.gmra.mrb[14].mxu1 %vm145_vm1, %v10361_v44 }
  0xa2   :  { %8739 = vmatmul.mubr.msk.f32.gmra.mrb[46].mxu0 %vm145_vm1, %v10368_v46  ;;  %8301 = vmatprep.mubr.msk.f32.mxu1 %vm145_vm1, %v10373_v51  ;;  %v10401_v46 = vld [vmem:[%s12388_s0 + $0xd8] sm:$0xff] }
  0xa3   :  { %8741 = vmatprep.mubr.msk.f32.mxu0 %vm145_vm1, %v10378_v55  ;;  %v10417_v55 = vld [vmem:[%s12388_s0 + $0xe0] sm:$0xff] }
  0xa5   :  { %8302 = vmatmul.mubr.msk.f32.gmra.mrb[16].mxu1 %vm145_vm1, %v10389_v61 }
  0xa6   :  { %8742 = vmatmul.mubr.msk.f32.gmra.mrb[48].mxu0 %vm145_vm1, %v10396_v42  ;;  %8304 = vmatprep.mubr.msk.f32.mxu1 %vm145_vm1, %v10401_v46  ;;  %v10429_v42 = vld [vmem:[%s12388_s0 + $0xf0] sm:$0xff] }
  0xa7   :  { %8744 = vmatprep.mubr.msk.f32.mxu0 %vm145_vm1, %v10406_v39  ;;  %v10445_v39 = vld [vmem:[%s12388_s0 + $0xf8] sm:$0xff] }
  0xa9   :  { %8305 = vmatmul.mubr.msk.f32.gmra.mrb[18].mxu1 %vm145_vm1, %v10417_v55 }
  0xaa   :  { %8745 = vmatmul.mubr.msk.f32.gmra.mrb[50].mxu0 %vm145_vm1, %v10424_v35  ;;  %8307 = vmatprep.mubr.msk.f32.mxu1 %vm145_vm1, %v10429_v42  ;;  %v10457_v35 = vld [vmem:[%s12388_s0 + $0x108] sm:$0xff] }
  0xab   :  { %8747 = vmatprep.mubr.msk.f32.mxu0 %vm145_vm1, %v10434_v31  ;;  %v10473_v31 = vld [vmem:[%s12388_s0 + $0x110] sm:$0xff] }
  0xad   :  { %8308 = vmatmul.mubr.msk.f32.gmra.mrb[20].mxu1 %vm145_vm1, %v10445_v39 }
  0xae   :  { %8748 = vmatmul.mubr.msk.f32.gmra.mrb[52].mxu0 %vm145_vm1, %v10452_v27  ;;  %8310 = vmatprep.mubr.msk.f32.mxu1 %vm145_vm1, %v10457_v35  ;;  %v10485_v27 = vld [vmem:[%s12388_s0 + $0x120] sm:$0xff] }
  0xaf   :  { %8750 = vmatprep.mubr.msk.f32.mxu0 %vm145_vm1, %v10462_v22  ;;  %v10501_v22 = vld [vmem:[%s12388_s0 + $0x128] sm:$0xff] }
  0xb1   :  { %8311 = vmatmul.mubr.msk.f32.gmra.mrb[22].mxu1 %vm145_vm1, %v10473_v31 }
  0xb2   :  { %8751 = vmatmul.mubr.msk.f32.gmra.mrb[54].mxu0 %vm145_vm1, %v10480_v18  ;;  %8313 = vmatprep.mubr.msk.f32.mxu1 %vm145_vm1, %v10485_v27  ;;  %v10513_v18 = vld [vmem:[%s12388_s0 + $0x138] sm:$0xff] }
  0xb3   :  { %8753 = vmatprep.mubr.msk.f32.mxu0 %vm145_vm1, %v10490_v14  ;;  %v10529_v14 = vld [vmem:[%s12388_s0 + $0x140] sm:$0xff] }
  0xb5   :  { %8314 = vmatmul.mubr.msk.f32.gmra.mrb[24].mxu1 %vm145_vm1, %v10501_v22 }
  0xb6   :  { %8754 = vmatmul.mubr.msk.f32.gmra.mrb[56].mxu0 %vm145_vm1, %v10508_v10  ;;  %8316 = vmatprep.mubr.msk.f32.mxu1 %vm145_vm1, %v10513_v18  ;;  %v10541_v10 = vld [vmem:[%s12388_s0 + $0x150] sm:$0xff] }
  0xb7   :  { %8756 = vmatprep.mubr.msk.f32.mxu0 %vm145_vm1, %v10518_v6  ;;  %v10557_v6 = vld [vmem:[%s12388_s0 + $0x158] sm:$0xff] }
  0xb9   :  { %8317 = vmatmul.mubr.msk.f32.gmra.mrb[26].mxu1 %vm145_vm1, %v10529_v14 }
  0xba   :  { %8757 = vmatmul.mubr.msk.f32.gmra.mrb[58].mxu0 %vm145_vm1, %v10536_v26  ;;  %8319 = vmatprep.mubr.msk.f32.mxu1 %vm145_vm1, %v10541_v10  ;;  %v10569_v26 = vld [vmem:[%s12388_s0 + $0x168] sm:$0xff] }
  0xbb   :  { %8759 = vmatprep.mubr.msk.f32.mxu0 %vm145_vm1, %v10546_v63  ;;  %v10583_v63 = vld [vmem:[%s12388_s0 + $0x170] sm:$0xff] }
  0xbd   :  { %8320 = vmatmul.mubr.msk.f32.gmra.mrb[28].mxu1 %vm145_vm1, %v10557_v6 }
  0xbe   :  { %8760 = vmatmul.mubr.msk.f32.gmra.mrb[60].mxu0 %vm145_vm1, %v10564_v57  ;;  %8322 = vmatprep.mubr.msk.f32.mxu1 %vm145_vm1, %v10569_v26  ;;  %v47_v57 = vld [vmem:[%s12388_s0 + $0x1b8] sm:$0xff] }
  0xbf   :  { %8762 = vmatprep.mubr.msk.f32.mxu0 %vm145_vm1, %v7132_v53  ;;  %v10604_v53 = vld [vmem:[%s12388_s0 + $0x1c8] sm:$0xff] }
  0xc0   :  { %12460 = vst [vmem:[#allocation33_spill] sm:$0xff] %v10604_v53 }
  0xc1   :  { %8323 = vmatmul.mubr.msk.f32.gmra.mrb[30].mxu1 %vm145_vm1, %v10583_v63 }
  0xc2   :  { %8763 = vmatmul.mubr.msk.f32.gmra.mrb[62].mxu0 %vm145_vm1, %v7133_v49  ;;  %8325 = vmatprep.mubr.msk.f32.mxu1 %vm145_vm1, %v46_v38  ;;  %v10614_v38 = vld [vmem:[%s12388_s0 + $0x1d0] sm:$0xff]  ;;  %v10619_v49 = vld [vmem:[%s12387_s1 + $0x20] sm:$0xf] }
  0xc3   :  { %8767 = vmatprep.mubr.msk.f32.mxu0 %vm145_vm1, %v10204_v2  ;;  %12461 = vst [vmem:[#allocation34_spill] sm:$0xff] %v10614_v38  ;;  %v10648_v2 = vld [vmem:[%s12388_s0 + $0x1f8] sm:$0xff] }
  0xc5   :  { %8326 = vmatmul.mubr.msk.f32.gmra.mrb[32].mxu1 %vm145_vm1, %v47_v57  ;;  %v10628_v57 = vld [vmem:[%s12388_s0 + $0x1e0] sm:$0xff] }
  0xc6   :  { %8768 = vmatmul.mubr.msk.f32.vlgmr.msra.gmra.mrb[0].mxu0 %vm145_vm1, %v10221_v4  ;;  %8328 = vmatprep.mubr.msk.f32.mxu1 %vm145_vm1, %v10604_v53  ;;  %v10659_v4 = vld [vmem:[%s12388_s0 + $0x200] sm:$0xff] }
  0xc7   :  { %8864 = vmatpush3.msk.msra.mxu0 %vm338_vm0, %v9835_v47  ;;  %8770 = vmatprep.mubr.msk.f32.mxu0 %vm145_vm1, %v10233_v8  ;;  %v10641_v47 = vld [vmem:[%s12388_s0 + $0x1e8] sm:$0xff]  ;;  %v10666_v8 = vld [vmem:[%s12388_s0 + $0x210] sm:$0xff]  ;;  %v7231_v53 = vld [vmem:[%s12388_s0 + $0x1a0] sm:$0xff] }
  0xc8   :  { %8961 = vmatprep.subr.msk.mxu0 %vm338_vm0, %v10619_v49 }
  0xc9   :  { %8329 = vmatmul.mubr.msk.f32.gmra.mrb[34].mxu1 %vm145_vm1, %v10614_v38  ;;  %v10888_v38 = vld [vmem:[%s12388_s0 + $0x320] sm:$0xff] }
  0xca   :  { %8771 = vmatmul.mubr.msk.f32.gmra.mrb[2].mxu0 %vm145_vm1, %v10249_v12  ;;  %8331 = vmatprep.mubr.msk.f32.mxu1 %vm145_vm1, %v10628_v57  ;;  %v10677_v12 = vld [vmem:[%s12388_s0 + $0x218] sm:$0xff] }
  0xcb   :  { %8773 = vmatprep.mubr.msk.f32.mxu0 %vm145_vm1, %v10261_v16  ;;  %v10684_v16 = vld [vmem:[%s12388_s0 + $0x228] sm:$0xff] }
  0xcd   :  { %8332 = vmatmul.mubr.msk.f32.gmra.mrb[36].mxu1 %vm145_vm1, %v10641_v47 }
  0xce   :  { %8774 = vmatmul.mubr.msk.f32.gmra.mrb[4].mxu0 %vm145_vm1, %v10277_v20  ;;  %8334 = vmatprep.mubr.msk.f32.mxu1 %vm145_vm1, %v10648_v2  ;;  %v10695_v20 = vld [vmem:[%s12388_s0 + $0x230] sm:$0xff] }
  0xcf   :  { %8776 = vmatprep.mubr.msk.f32.mxu0 %vm145_vm1, %v10289_v24  ;;  %v10702_v24 = vld [vmem:[%s12388_s0 + $0x240] sm:$0xff] }
  0xd1   :  { %8335 = vmatmul.mubr.msk.f32.gmra.mrb[38].mxu1 %vm145_vm1, %v10659_v4 }
  0xd2   :  { %8777 = vmatmul.mubr.msk.f32.gmra.mrb[6].mxu0 %vm145_vm1, %v10305_v29  ;;  %8337 = vmatprep.mubr.msk.f32.mxu1 %vm145_vm1, %v10666_v8  ;;  %v10713_v29 = vld [vmem:[%s12388_s0 + $0x248] sm:$0xff] }
  0xd3   :  { %8779 = vmatprep.mubr.msk.f32.mxu0 %vm145_vm1, %v10317_v33  ;;  %v10720_v33 = vld [vmem:[%s12388_s0 + $0x258] sm:$0xff] }
  0xd5   :  { %8338 = vmatmul.mubr.msk.f32.gmra.mrb[40].mxu1 %vm145_vm1, %v10677_v12 }
  0xd6   :  { %8780 = vmatmul.mubr.msk.f32.gmra.mrb[8].mxu0 %vm145_vm1, %v10333_v37  ;;  %8340 = vmatprep.mubr.msk.f32.mxu1 %vm145_vm1, %v10684_v16  ;;  %v10731_v37 = vld [vmem:[%s12388_s0 + $0x260] sm:$0xff] }
  0xd7   :  { %8782 = vmatprep.mubr.msk.f32.mxu0 %vm145_vm1, %v10345_v40  ;;  %v10738_v40 = vld [vmem:[%s12388_s0 + $0x270] sm:$0xff] }
  0xd9   :  { %8341 = vmatmul.mubr.msk.f32.gmra.mrb[42].mxu1 %vm145_vm1, %v10695_v20 }
  0xda   :  { %8783 = vmatmul.mubr.msk.f32.gmra.mrb[10].mxu0 %vm145_vm1, %v10361_v44  ;;  %8343 = vmatprep.mubr.msk.f32.mxu1 %vm145_vm1, %v10702_v24  ;;  %v10749_v44 = vld [vmem:[%s12388_s0 + $0x278] sm:$0xff] }
  0xdb   :  { %8785 = vmatprep.mubr.msk.f32.mxu0 %vm145_vm1, %v10373_v51  ;;  %v10767_v51 = vld [vmem:[%s12388_s0 + $0x290] sm:$0xff] }
  0xdd   :  { %8344 = vmatmul.mubr.msk.f32.gmra.mrb[44].mxu1 %vm145_vm1, %v10713_v29 }
  0xde   :  { %8786 = vmatmul.mubr.msk.f32.gmra.mrb[12].mxu0 %vm145_vm1, %v10389_v61  ;;  %8346 = vmatprep.mubr.msk.f32.mxu1 %vm145_vm1, %v10720_v33  ;;  %v7230_v61 = vld [vmem:[%s12388_s0 + $0x198] sm:$0xff] }
  0xdf   :  { %8788 = vmatprep.mubr.msk.f32.mxu0 %vm145_vm1, %v10401_v46  ;;  %v10756_v46 = vld [vmem:[%s12388_s0 + $0x288] sm:$0xff] }
  0xe1   :  { %8347 = vmatmul.mubr.msk.f32.gmra.mrb[46].mxu1 %vm145_vm1, %v10731_v37 }
  0xe2   :  { %8789 = vmatmul.mubr.msk.f32.gmra.mrb[14].mxu0 %vm145_vm1, %v10417_v55  ;;  %8349 = vmatprep.mubr.msk.f32.mxu1 %vm145_vm1, %v10738_v40  ;;  %v10869_v55 = vld [vmem:[%s12388_s0 + $0x188] sm:$0xff] }
  0xe3   :  { %8791 = vmatprep.mubr.msk.f32.mxu0 %vm145_vm1, %v10429_v42  ;;  %v10774_v42 = vld [vmem:[%s12388_s0 + $0x2a0] sm:$0xff]  ;;  %12463 = vst [vmem:[#allocation36_spill] sm:$0xff] %v10869_v55 }
  0xe5   :  { %8350 = vmatmul.mubr.msk.f32.gmra.mrb[48].mxu1 %vm145_vm1, %v10749_v44 }
  0xe6   :  { %8792 = vmatmul.mubr.msk.f32.gmra.mrb[16].mxu0 %vm145_vm1, %v10445_v39  ;;  %8352 = vmatprep.mubr.msk.f32.mxu1 %vm145_vm1, %v10756_v46  ;;  %v10785_v39 = vld [vmem:[%s12388_s0 + $0x2a8] sm:$0xff] }
  0xe7   :  { %8794 = vmatprep.mubr.msk.f32.mxu0 %vm145_vm1, %v10457_v35  ;;  %v10792_v35 = vld [vmem:[%s12388_s0 + $0x2b8] sm:$0xff] }
  0xe9   :  { %8353 = vmatmul.mubr.msk.f32.gmra.mrb[50].mxu1 %vm145_vm1, %v10767_v51 }
  0xea   :  { %8795 = vmatmul.mubr.msk.f32.gmra.mrb[18].mxu0 %vm145_vm1, %v10473_v31  ;;  %8355 = vmatprep.mubr.msk.f32.mxu1 %vm145_vm1, %v10774_v42  ;;  %v10803_v31 = vld [vmem:[%s12388_s0 + $0x2c0] sm:$0xff] }
  0xeb   :  { %8797 = vmatprep.mubr.msk.f32.mxu0 %vm145_vm1, %v10485_v27  ;;  %v10810_v27 = vld [vmem:[%s12388_s0 + $0x2d0] sm:$0xff] }
  0xed   :  { %8356 = vmatmul.mubr.msk.f32.gmra.mrb[52].mxu1 %vm145_vm1, %v10785_v39 }
  0xee   :  { %8798 = vmatmul.mubr.msk.f32.gmra.mrb[20].mxu0 %vm145_vm1, %v10501_v22  ;;  %8358 = vmatprep.mubr.msk.f32.mxu1 %vm145_vm1, %v10792_v35  ;;  %v10821_v22 = vld [vmem:[%s12388_s0 + $0x2d8] sm:$0xff] }
  0xef   :  { %8800 = vmatprep.mubr.msk.f32.mxu0 %vm145_vm1, %v10513_v18  ;;  %v10828_v18 = vld [vmem:[%s12388_s0 + $0x2e8] sm:$0xff] }
  0xf1   :  { %8359 = vmatmul.mubr.msk.f32.gmra.mrb[54].mxu1 %vm145_vm1, %v10803_v31 }
  0xf2   :  { %8801 = vmatmul.mubr.msk.f32.gmra.mrb[22].mxu0 %vm145_vm1, %v10529_v14  ;;  %8361 = vmatprep.mubr.msk.f32.mxu1 %vm145_vm1, %v10810_v27  ;;  %v10839_v14 = vld [vmem:[%s12388_s0 + $0x2f0] sm:$0xff] }
  0xf3   :  { %8803 = vmatprep.mubr.msk.f32.mxu0 %vm145_vm1, %v10541_v10  ;;  %v10846_v10 = vld [vmem:[%s12388_s0 + $0x300] sm:$0xff] }
  0xf5   :  { %8362 = vmatmul.mubr.msk.f32.gmra.mrb[56].mxu1 %vm145_vm1, %v10821_v22 }
  0xf6   :  { %8804 = vmatmul.mubr.msk.f32.gmra.mrb[24].mxu0 %vm145_vm1, %v10557_v6  ;;  %8364 = vmatprep.mubr.msk.f32.mxu1 %vm145_vm1, %v10828_v18  ;;  %v10851_v6 = vld [vmem:[%s12388_s0 + $0x180] sm:$0xff] }
  0xf7   :  { %8806 = vmatprep.mubr.msk.f32.mxu0 %vm145_vm1, %v10569_v26  ;;  %12462 = vst [vmem:[#allocation35_spill] sm:$0xff] %v10851_v6  ;;  %v10862_v26 = vld [vmem:[%s12388_s0 + $0x308] sm:$0xff] }
  0xf9   :  { %8365 = vmatmul.mubr.msk.f32.gmra.mrb[58].mxu1 %vm145_vm1, %v10839_v14 }
  0xfa   :  { %8807 = vmatmul.mubr.msk.f32.gmra.mrb[26].mxu0 %vm145_vm1, %v10583_v63  ;;  %8367 = vmatprep.mubr.msk.f32.mxu1 %vm145_vm1, %v10846_v10  ;;  %v10874_v63 = vld [vmem:[%s12388_s0 + $0x318] sm:$0xff] }
  0xfb   :  { %8809 = vmatprep.mubr.msk.f32.mxu0 %vm145_vm1, %v10851_v6  ;;  %v1307_v6 = vld [vmem:[%s12388_s0 + $0x2] sm:$0xff] }
  0xfd   :  { %8368 = vmatmul.mubr.msk.f32.gmra.mrb[60].mxu1 %vm145_vm1, %v10862_v26 }
  0xfe   :  { %8810 = vmatmul.mubr.msk.f32.gmra.mrb[28].mxu0 %vm145_vm1, %v10869_v55  ;;  %8370 = vmatprep.mubr.msk.f32.mxu1 %vm145_vm1, %v10874_v63  ;;  %v1308_v55 = vld [vmem:[%s12388_s0 + $0xa] sm:$0xff] }
  0xff   :  { %8812 = vmatprep.mubr.msk.f32.mxu0 %vm145_vm1, %v7230_v61  ;;  %v7345_v61 = vld [vmem:[%s12388_s0 + $0xe1] sm:$0xff] }
 0x101   :  { %8371 = vmatmul.mubr.msk.f32.gmra.mrb[62].mxu1 %vm145_vm1, %v10888_v38 }
 0x102   :  { %8813 = vmatmul.mubr.msk.f32.gmra.mrb[30].mxu0 %vm145_vm1, %v7231_v53  ;;  %8375 = vmatprep.mubr.msk.f32.mxu1 %vm145_vm1, %v1307_v6  ;;  %v7343_v53 = vld [vmem:[%s12388_s0 + $0xc9] sm:$0xff]  ;;  %v12476_v6 = vld [vmem:[#allocation14_spill] sm:$0xff] }
 0x103   :  { %8815 = vmatprep.mubr.msk.f32.mxu0 %vm145_vm1, %v10628_v57 }
 0x105   :  { %8376 = vmatmul.mubr.msk.f32.vlgmr.msra.gmra.mrb[0].mxu1 %vm145_vm1, %v1308_v55  ;;  %v12477_v55 = vld [vmem:[#allocation15_spill] sm:$0xff] }
 0x106   :  { %8816 = vmatmul.mubr.msk.f32.gmra.mrb[32].mxu0 %vm145_vm1, %v10641_v47  ;;  %8472 = vmatpush3.msk.msra.mxu1 %vm338_vm0, %v10184_v59  ;;  %v12475_v59 = vld [vmem:[#allocation13_spill] sm:$0xff] }
 0x107   :  { %8378 = vmatprep.mubr.msk.f32.mxu1 %vm145_vm1, %v9802_v41  ;;  %8818 = vmatprep.mubr.msk.f32.mxu0 %vm145_vm1, %v10648_v2  ;;  %v11029_v41 = vld [vmem:[%s12388_s0 + $0x338] sm:$0xff] }
 0x108   :  { %9059 = vmatprep.subr.msk.mxu1 %vm338_vm0, %v9600_v1  ;;  %v11016_v1 = vld [vmem:[%s12388_s0 + $0x330] sm:$0xff] }
 0x109   :  { %8379 = vmatmul.mubr.msk.f32.gmra.mrb[2].mxu1 %vm145_vm1, %v9815_v43  ;;  %v7262_v43 = vld [vmem:[%s12388_s0 + $0x348] sm:$0xff] }
 0x10a   :  { %8819 = vmatmul.mubr.msk.f32.gmra.mrb[34].mxu0 %vm145_vm1, %v10659_v4  ;;  %8381 = vmatprep.mubr.msk.f32.mxu1 %vm145_vm1, %v9823_v45  ;;  %v7263_v45 = vld [vmem:[%s12388_s0 + $0x350] sm:$0xff] }
 0x10b   :  { %8821 = vmatprep.mubr.msk.f32.mxu0 %vm145_vm1, %v10666_v8 }
 0x10d   :  { %8382 = vmatmul.mubr.msk.f32.gmra.mrb[4].mxu1 %vm145_vm1, %v9844_v48  ;;  %v1339_v48 = vld [vmem:[%s12388_s0 + $0x1b2] sm:$0xff] }
 0x10e   :  { %8822 = vmatmul.mubr.msk.f32.gmra.mrb[36].mxu0 %vm145_vm1, %v10677_v12  ;;  %8384 = vmatprep.mubr.msk.f32.mxu1 %vm145_vm1, %v9852_v50  ;;  %v7330_v50 = vld [vmem:[%s12388_s0 + $0x31] sm:$0xff] }
 0x10f   :  { %8824 = vmatprep.mubr.msk.f32.mxu0 %vm145_vm1, %v10684_v16 }
 0x111   :  { %8385 = vmatmul.mubr.msk.f32.gmra.mrb[6].mxu1 %vm145_vm1, %v9868_v52  ;;  %v12464_v52 = vld [vmem:[#allocation2_spill] sm:$0xff] }
 0x112   :  { %8825 = vmatmul.mubr.msk.f32.gmra.mrb[38].mxu0 %vm145_vm1, %v10695_v20  ;;  %8387 = vmatprep.mubr.msk.f32.mxu1 %vm145_vm1, %v9876_v54  ;;  %v1340_v54 = vld [vmem:[%s12388_s0 + $0x1ba] sm:$0xff] }
 0x113   :  { %8827 = vmatprep.mubr.msk.f32.mxu0 %vm145_vm1, %v10702_v24 }
 0x115   :  { %8388 = vmatmul.mubr.msk.f32.gmra.mrb[8].mxu1 %vm145_vm1, %v9890_v56  ;;  %v7331_v56 = vld [vmem:[%s12388_s0 + $0x39] sm:$0xff] }
 0x116   :  { %8828 = vmatmul.mubr.msk.f32.gmra.mrb[40].mxu0 %vm145_vm1, %v10713_v29  ;;  %8390 = vmatprep.mubr.msk.f32.mxu1 %vm145_vm1, %v9898_v58  ;;  %v7332_v58 = vld [vmem:[%s12388_s0 + $0x49] sm:$0xff] }
 0x117   :  { %8830 = vmatprep.mubr.msk.f32.mxu0 %vm145_vm1, %v10720_v33 }
 0x119   :  { %8391 = vmatmul.mubr.msk.f32.gmra.mrb[10].mxu1 %vm145_vm1, %v9912_v60  ;;  %v12465_v60 = vld [vmem:[#allocation3_spill] sm:$0xff] }
 0x11a   :  { %8831 = vmatmul.mubr.msk.f32.gmra.mrb[42].mxu0 %vm145_vm1, %v10731_v37  ;;  %8393 = vmatprep.mubr.msk.f32.mxu1 %vm145_vm1, %v9920_v62  ;;  %v7333_v62 = vld [vmem:[%s12388_s0 + $0x51] sm:$0xff] }
 0x11b   :  { %8833 = vmatprep.mubr.msk.f32.mxu0 %vm145_vm1, %v10738_v40 }
 0x11d   :  { %8394 = vmatmul.mubr.msk.f32.gmra.mrb[12].mxu1 %vm145_vm1, %v9934_v0  ;;  %v7334_v0 = vld [vmem:[%s12388_s0 + $0x61] sm:$0xff] }
 0x11e   :  { %8834 = vmatmul.mubr.msk.f32.gmra.mrb[44].mxu0 %vm145_vm1, %v10749_v44  ;;  %8396 = vmatprep.mubr.msk.f32.mxu1 %vm145_vm1, %v9942_v3  ;;  %v12466_v3 = vld [vmem:[#allocation4_spill] sm:$0xff] }
 0x11f   :  { %8836 = vmatprep.mubr.msk.f32.mxu0 %vm145_vm1, %v10756_v46 }
 0x121   :  { %8397 = vmatmul.mubr.msk.f32.gmra.mrb[14].mxu1 %vm145_vm1, %v9956_v5  ;;  %v12467_v5 = vld [vmem:[#allocation5_spill] sm:$0xff] }
 0x122   :  { %8837 = vmatmul.mubr.msk.f32.gmra.mrb[46].mxu0 %vm145_vm1, %v10767_v51  ;;  %8399 = vmatprep.mubr.msk.f32.mxu1 %vm145_vm1, %v9964_v7  ;;  %v7335_v7 = vld [vmem:[%s12388_s0 + $0x69] sm:$0xff] }
 0x123   :  { %8839 = vmatprep.mubr.msk.f32.mxu0 %vm145_vm1, %v10774_v42 }
 0x125   :  { %8400 = vmatmul.mubr.msk.f32.gmra.mrb[16].mxu1 %vm145_vm1, %v9978_v9  ;;  %v7336_v9 = vld [vmem:[%s12388_s0 + $0x79] sm:$0xff] }
 0x126   :  { %8840 = vmatmul.mubr.msk.f32.gmra.mrb[48].mxu0 %vm145_vm1, %v10785_v39  ;;  %8402 = vmatprep.mubr.msk.f32.mxu1 %vm145_vm1, %v9986_v11  ;;  %v12468_v11 = vld [vmem:[#allocation6_spill] sm:$0xff] }
 0x127   :  { %8842 = vmatprep.mubr.msk.f32.mxu0 %vm145_vm1, %v10792_v35 }
 0x129   :  { %8403 = vmatmul.mubr.msk.f32.gmra.mrb[18].mxu1 %vm145_vm1, %v10000_v13  ;;  %v12469_v13 = vld [vmem:[#allocation7_spill] sm:$0xff] }
 0x12a   :  { %8843 = vmatmul.mubr.msk.f32.gmra.mrb[50].mxu0 %vm145_vm1, %v10803_v31  ;;  %8405 = vmatprep.mubr.msk.f32.mxu1 %vm145_vm1, %v10008_v15  ;;  %v7337_v15 = vld [vmem:[%s12388_s0 + $0x81] sm:$0xff] }
 0x12b   :  { %8845 = vmatprep.mubr.msk.f32.mxu0 %vm145_vm1, %v10810_v27 }
 0x12d   :  { %8406 = vmatmul.mubr.msk.f32.gmra.mrb[20].mxu1 %vm145_vm1, %v10022_v17  ;;  %v7338_v17 = vld [vmem:[%s12388_s0 + $0x91] sm:$0xff] }
 0x12e   :  { %8846 = vmatmul.mubr.msk.f32.gmra.mrb[52].mxu0 %vm145_vm1, %v10821_v22  ;;  %8408 = vmatprep.mubr.msk.f32.mxu1 %vm145_vm1, %v10030_v19  ;;  %v12470_v19 = vld [vmem:[#allocation8_spill] sm:$0xff] }
 0x12f   :  { %8848 = vmatprep.mubr.msk.f32.mxu0 %vm145_vm1, %v10828_v18 }
 0x131   :  { %8409 = vmatmul.mubr.msk.f32.gmra.mrb[22].mxu1 %vm145_vm1, %v10044_v21  ;;  %v12471_v21 = vld [vmem:[#allocation9_spill] sm:$0xff] }
 0x132   :  { %8849 = vmatmul.mubr.msk.f32.gmra.mrb[54].mxu0 %vm145_vm1, %v10839_v14  ;;  %8411 = vmatprep.mubr.msk.f32.mxu1 %vm145_vm1, %v10052_v23  ;;  %v7339_v23 = vld [vmem:[%s12388_s0 + $0x99] sm:$0xff] }
 0x133   :  { %8851 = vmatprep.mubr.msk.f32.mxu0 %vm145_vm1, %v10846_v10 }
 0x135   :  { %8412 = vmatmul.mubr.msk.f32.gmra.mrb[24].mxu1 %vm145_vm1, %v10066_v25  ;;  %v7340_v25 = vld [vmem:[%s12388_s0 + $0xa9] sm:$0xff] }
 0x136   :  { %8852 = vmatmul.mubr.msk.f32.gmra.mrb[56].mxu0 %vm145_vm1, %v10862_v26  ;;  %8414 = vmatprep.mubr.msk.f32.mxu1 %vm145_vm1, %v10074_v28  ;;  %v12472_v28 = vld [vmem:[#allocation10_spill] sm:$0xff] }
 0x137   :  { %8854 = vmatprep.mubr.msk.f32.mxu0 %vm145_vm1, %v10874_v63 }
 0x139   :  { %8415 = vmatmul.mubr.msk.f32.gmra.mrb[26].mxu1 %vm145_vm1, %v10088_v30  ;;  %v12473_v30 = vld [vmem:[#allocation11_spill] sm:$0xff] }
 0x13a   :  { %8855 = vmatmul.mubr.msk.f32.gmra.mrb[58].mxu0 %vm145_vm1, %v10888_v38  ;;  %8417 = vmatprep.mubr.msk.f32.mxu1 %vm145_vm1, %v10096_v32  ;;  %v7341_v32 = vld [vmem:[%s12388_s0 + $0xb1] sm:$0xff] }
 0x13b   :  { %8857 = vmatprep.mubr.msk.f32.mxu0 %vm145_vm1, %v11016_v1 }
 0x13d   :  { %8418 = vmatmul.mubr.msk.f32.gmra.mrb[28].mxu1 %vm145_vm1, %v10110_v34  ;;  %v7342_v34 = vld [vmem:[%s12388_s0 + $0xc1] sm:$0xff] }
 0x13e   :  { %8858 = vmatmul.mubr.msk.f32.gmra.mrb[60].mxu0 %vm145_vm1, %v11029_v41  ;;  %8420 = vmatprep.mubr.msk.f32.mxu1 %vm145_vm1, %v10118_v36  ;;  %v12474_v36 = vld [vmem:[#allocation12_spill] sm:$0xff] }
 0x13f   :  { %8860 = vmatprep.mubr.msk.f32.mxu0 %vm145_vm1, %v7262_v43  ;;  %v7346_v43 = vld [vmem:[%s12388_s0 + $0xf1] sm:$0xff] }
 0x141   :  { %8421 = vmatmul.mubr.msk.f32.gmra.mrb[30].mxu1 %vm145_vm1, %v12464_v52  ;;  %v7348_v52 = vld [vmem:[%s12388_s0 + $0x109] sm:$0xff] }
 0x142   :  { %8861 = vmatmul.mubr.msk.f32.gmra.mrb[62].mxu0 %vm145_vm1, %v7263_v45  ;;  %8423 = vmatprep.mubr.msk.f32.mxu1 %vm145_vm1, %v1339_v48  ;;  %v12478_v45 = vld [vmem:[#allocation16_spill] sm:$0xff]  ;;  %v12479_v48 = vld [vmem:[#allocation17_spill] sm:$0xff] }
 0x143   :  { %8865 = vmatprep.mubr.msk.f32.mxu0 %vm145_vm1, %v7330_v50  ;;  %v7347_v50 = vld [vmem:[%s12388_s0 + $0xf9] sm:$0xff] }
 0x145   :  { %8424 = vmatmul.mubr.msk.f32.gmra.mrb[32].mxu1 %vm145_vm1, %v1340_v54  ;;  %v12480_v54 = vld [vmem:[#allocation18_spill] sm:$0xff] }
 0x146   :  { %8866 = vmatmul.mubr.msk.f32.vlgmr.msra.gmra.mrb[0].mxu0 %vm145_vm1, %v7331_v56  ;;  %8426 = vmatprep.mubr.msk.f32.mxu1 %vm145_vm1, %v12465_v60  ;;  %v12481_v56 = vld [vmem:[#allocation19_spill] sm:$0xff] }
 0x147   :  { %8962 = vmatpush3.msk.msra.mxu0 %vm338_vm0, %v10619_v49  ;;  %8868 = vmatprep.mubr.msk.f32.mxu0 %vm145_vm1, %v7332_v58  ;;  %v7344_v49 = vld [vmem:[%s12388_s0 + $0xd9] sm:$0xff]  ;;  %v7349_v58 = vld [vmem:[%s12388_s0 + $0x111] sm:$0xff]  ;;  %v7350_v60 = vld [vmem:[%s12388_s0 + $0x121] sm:$0xff] }
 0x149   :  { %8427 = vmatmul.mubr.msk.f32.gmra.mrb[34].mxu1 %vm145_vm1, %v12466_v3  ;;  %v7351_v3 = vld [vmem:[%s12388_s0 + $0x129] sm:$0xff] }
 0x14a   :  { %8869 = vmatmul.mubr.msk.f32.gmra.mrb[2].mxu0 %vm145_vm1, %v7333_v62  ;;  %8429 = vmatprep.mubr.msk.f32.mxu1 %vm145_vm1, %v12467_v5  ;;  %v12482_v62 = vld [vmem:[#allocation20_spill] sm:$0xff]  ;;  %v7352_v5 = vld [vmem:[%s12388_s0 + $0x139] sm:$0xff] }
 0x14b   :  { %8871 = vmatprep.mubr.msk.f32.mxu0 %vm145_vm1, %v7334_v0  ;;  %v12483_v0 = vld [vmem:[#allocation21_spill] sm:$0xff] }
 0x14d   :  { %8430 = vmatmul.mubr.msk.f32.gmra.mrb[36].mxu1 %vm145_vm1, %v12468_v11  ;;  %v7353_v11 = vld [vmem:[%s12388_s0 + $0x141] sm:$0xff] }
 0x14e   :  { %8872 = vmatmul.mubr.msk.f32.gmra.mrb[4].mxu0 %vm145_vm1, %v7335_v7  ;;  %8432 = vmatprep.mubr.msk.f32.mxu1 %vm145_vm1, %v12469_v13  ;;  %v12484_v7 = vld [vmem:[#allocation22_spill] sm:$0xff]  ;;  %v7354_v13 = vld [vmem:[%s12388_s0 + $0x151] sm:$0xff] }
 0x14f   :  { %8874 = vmatprep.mubr.msk.f32.mxu0 %vm145_vm1, %v7336_v9  ;;  %v12485_v9 = vld [vmem:[#allocation23_spill] sm:$0xff] }
 0x151   :  { %8433 = vmatmul.mubr.msk.f32.gmra.mrb[38].mxu1 %vm145_vm1, %v12470_v19  ;;  %v7355_v19 = vld [vmem:[%s12388_s0 + $0x159] sm:$0xff] }
 0x152   :  { %8875 = vmatmul.mubr.msk.f32.gmra.mrb[6].mxu0 %vm145_vm1, %v7337_v15  ;;  %8435 = vmatprep.mubr.msk.f32.mxu1 %vm145_vm1, %v12471_v21  ;;  %v12486_v15 = vld [vmem:[#allocation24_spill] sm:$0xff] }
 0x153   :  { %8877 = vmatprep.mubr.msk.f32.mxu0 %vm145_vm1, %v7338_v17  ;;  %v12487_v17 = vld [vmem:[#allocation25_spill] sm:$0xff]  ;;  %v7356_v21 = vld [vmem:[%s12388_s0 + $0x169] sm:$0xff] }
 0x155   :  { %8436 = vmatmul.mubr.msk.f32.gmra.mrb[40].mxu1 %vm145_vm1, %v12472_v28  ;;  %v7357_v28 = vld [vmem:[%s12388_s0 + $0x171] sm:$0xff] }
 0x156   :  { %8878 = vmatmul.mubr.msk.f32.gmra.mrb[8].mxu0 %vm145_vm1, %v7339_v23  ;;  %8438 = vmatprep.mubr.msk.f32.mxu1 %vm145_vm1, %v12473_v30  ;;  %v12488_v23 = vld [vmem:[#allocation26_spill] sm:$0xff] }
 0x157   :  { %8880 = vmatprep.mubr.msk.f32.mxu0 %vm145_vm1, %v7340_v25  ;;  %v12489_v25 = vld [vmem:[#allocation27_spill] sm:$0xff] }
 0x158   :  { %v7358_v30 = vld [vmem:[%s12388_s0 + $0x181] sm:$0xff] }
 0x159   :  { %8439 = vmatmul.mubr.msk.f32.gmra.mrb[42].mxu1 %vm145_vm1, %v12474_v36  ;;  %v7359_v36 = vld [vmem:[%s12388_s0 + $0x189] sm:$0xff] }
 0x15a   :  { %8881 = vmatmul.mubr.msk.f32.gmra.mrb[10].mxu0 %vm145_vm1, %v7341_v32  ;;  %8441 = vmatprep.mubr.msk.f32.mxu1 %vm145_vm1, %v12475_v59  ;;  %v12490_v32 = vld [vmem:[#allocation28_spill] sm:$0xff]  ;;  %v7360_v59 = vld [vmem:[%s12388_s0 + $0x199] sm:$0xff] }
 0x15b   :  { %8883 = vmatprep.mubr.msk.f32.mxu0 %vm145_vm1, %v7342_v34  ;;  %v12491_v34 = vld [vmem:[#allocation29_spill] sm:$0xff] }
 0x15d   :  { %8442 = vmatmul.mubr.msk.f32.gmra.mrb[44].mxu1 %vm145_vm1, %v12476_v6  ;;  %v7361_v6 = vld [vmem:[%s12388_s0 + $0x1a1] sm:$0xff] }
 0x15e   :  { %8884 = vmatmul.mubr.msk.f32.gmra.mrb[12].mxu0 %vm145_vm1, %v7343_v53  ;;  %8444 = vmatprep.mubr.msk.f32.mxu1 %vm145_vm1, %v12477_v55  ;;  %v12492_v53 = vld [vmem:[#allocation30_spill] sm:$0xff]  ;;  %v6810_v55 = vld [vmem:[%s12388_s0 + $0x18] sm:$0xff] }
 0x15f   :  { %8886 = vmatprep.mubr.msk.f32.mxu0 %vm145_vm1, %v7344_v49  ;;  %v12493_v49 = vld [vmem:[#allocation31_spill] sm:$0xff] }
 0x161   :  { %8445 = vmatmul.mubr.msk.f32.gmra.mrb[46].mxu1 %vm145_vm1, %v12478_v45  ;;  %v6811_v45 = vld [vmem:[%s12388_s0 + $0x20] sm:$0xff] }
 0x162   :  { %8887 = vmatmul.mubr.msk.f32.gmra.mrb[14].mxu0 %vm145_vm1, %v7345_v61  ;;  %8447 = vmatprep.mubr.msk.f32.mxu1 %vm145_vm1, %v12479_v48  ;;  %v11248_v61 = vld [vmem:[%s12388_s0 + $0x1e1] sm:$0xff]  ;;  %v11262_v48 = vld [vmem:[%s12388_s0 + $0x1e9] sm:$0xff] }
 0x163   :  { %8889 = vmatprep.mubr.msk.f32.mxu0 %vm145_vm1, %v7346_v43  ;;  %v12494_v43 = vld [vmem:[#allocation32_spill] sm:$0xff] }
 0x165   :  { %8448 = vmatmul.mubr.msk.f32.gmra.mrb[48].mxu1 %vm145_vm1, %v12480_v54  ;;  %v9573_v54 = vld [vmem:[%s12387_s1 + $0x10] sm:$0xf] }
 0x166   :  { %8890 = vmatmul.mubr.msk.f32.gmra.mrb[16].mxu0 %vm145_vm1, %v7347_v50  ;;  %8450 = vmatprep.mubr.msk.f32.mxu1 %vm145_vm1, %v12481_v56  ;;  %v6812_v50 = vld [vmem:[%s12388_s0 + $0x30] sm:$0xff]  ;;  %v6813_v56 = vld [vmem:[%s12388_s0 + $0x38] sm:$0xff] }
 0x167   :  { %8892 = vmatprep.mubr.msk.f32.mxu0 %vm145_vm1, %v7348_v52  ;;  %v11270_v52 = vld [vmem:[%s12388_s0 + $0x1f9] sm:$0xff] }
 0x169   :  { %8451 = vmatmul.mubr.msk.f32.gmra.mrb[50].mxu1 %vm145_vm1, %v12482_v62  ;;  %v11296_v62 = vld [vmem:[%s12388_s0 + $0x211] sm:$0xff] }
 0x16a   :  { %8893 = vmatmul.mubr.msk.f32.gmra.mrb[18].mxu0 %vm145_vm1, %v7349_v58  ;;  %8453 = vmatprep.mubr.msk.f32.mxu1 %vm145_vm1, %v12483_v0  ;;  %v11288_v58 = vld [vmem:[%s12388_s0 + $0x201] sm:$0xff]  ;;  %v6815_v0 = vld [vmem:[%s12388_s0 + $0x50] sm:$0xff] }
 0x16b   :  { %8895 = vmatprep.mubr.msk.f32.mxu0 %vm145_vm1, %v7350_v60  ;;  %v6814_v60 = vld [vmem:[%s12388_s0 + $0x48] sm:$0xff] }
 0x16d   :  { %8454 = vmatmul.mubr.msk.f32.gmra.mrb[52].mxu1 %vm145_vm1, %v12484_v7  ;;  %v11318_v7 = vld [vmem:[%s12388_s0 + $0x229] sm:$0xff] }
 0x16e   :  { %8896 = vmatmul.mubr.msk.f32.gmra.mrb[20].mxu0 %vm145_vm1, %v7351_v3  ;;  %8456 = vmatprep.mubr.msk.f32.mxu1 %vm145_vm1, %v12485_v9  ;;  %v11310_v3 = vld [vmem:[%s12388_s0 + $0x219] sm:$0xff]  ;;  %v6817_v9 = vld [vmem:[%s12388_s0 + $0x68] sm:$0xff] }
 0x16f   :  { %8898 = vmatprep.mubr.msk.f32.mxu0 %vm145_vm1, %v7352_v5  ;;  %v6816_v5 = vld [vmem:[%s12388_s0 + $0x60] sm:$0xff] }
 0x171   :  { %8457 = vmatmul.mubr.msk.f32.gmra.mrb[54].mxu1 %vm145_vm1, %v12486_v15  ;;  %v11340_v15 = vld [vmem:[%s12388_s0 + $0x241] sm:$0xff] }
 0x172   :  { %8899 = vmatmul.mubr.msk.f32.gmra.mrb[22].mxu0 %vm145_vm1, %v7353_v11  ;;  %8459 = vmatprep.mubr.msk.f32.mxu1 %vm145_vm1, %v12487_v17  ;;  %v11332_v11 = vld [vmem:[%s12388_s0 + $0x231] sm:$0xff]  ;;  %v6819_v17 = vld [vmem:[%s12388_s0 + $0x80] sm:$0xff] }
 0x173   :  { %8901 = vmatprep.mubr.msk.f32.mxu0 %vm145_vm1, %v7354_v13  ;;  %v6818_v13 = vld [vmem:[%s12388_s0 + $0x78] sm:$0xff] }
 0x175   :  { %8460 = vmatmul.mubr.msk.f32.gmra.mrb[56].mxu1 %vm145_vm1, %v12488_v23  ;;  %v11362_v23 = vld [vmem:[%s12388_s0 + $0x259] sm:$0xff] }
 0x176   :  { %8902 = vmatmul.mubr.msk.f32.gmra.mrb[24].mxu0 %vm145_vm1, %v7355_v19  ;;  %8462 = vmatprep.mubr.msk.f32.mxu1 %vm145_vm1, %v12489_v25  ;;  %v11354_v19 = vld [vmem:[%s12388_s0 + $0x249] sm:$0xff]  ;;  %v6821_v25 = vld [vmem:[%s12388_s0 + $0x98] sm:$0xff] }
 0x177   :  { %8904 = vmatprep.mubr.msk.f32.mxu0 %vm145_vm1, %v7356_v21  ;;  %v6820_v21 = vld [vmem:[%s12388_s0 + $0x90] sm:$0xff] }
 0x179   :  { %8463 = vmatmul.mubr.msk.f32.gmra.mrb[58].mxu1 %vm145_vm1, %v12490_v32  ;;  %v11384_v32 = vld [vmem:[%s12388_s0 + $0x271] sm:$0xff] }
 0x17a   :  { %8905 = vmatmul.mubr.msk.f32.gmra.mrb[26].mxu0 %vm145_vm1, %v7357_v28  ;;  %8465 = vmatprep.mubr.msk.f32.mxu1 %vm145_vm1, %v12491_v34  ;;  %v11376_v28 = vld [vmem:[%s12388_s0 + $0x261] sm:$0xff]  ;;  %v6823_v34 = vld [vmem:[%s12388_s0 + $0xb0] sm:$0xff] }
 0x17b   :  { %8907 = vmatprep.mubr.msk.f32.mxu0 %vm145_vm1, %v7358_v30  ;;  %v6822_v30 = vld [vmem:[%s12388_s0 + $0xa8] sm:$0xff] }
 0x17d   :  { %8466 = vmatmul.mubr.msk.f32.gmra.mrb[60].mxu1 %vm145_vm1, %v12492_v53  ;;  %v11406_v53 = vld [vmem:[%s12388_s0 + $0x289] sm:$0xff] }
 0x17e   :  { %8908 = vmatmul.mubr.msk.f32.gmra.mrb[28].mxu0 %vm145_vm1, %v7359_v36  ;;  %8468 = vmatprep.mubr.msk.f32.mxu1 %vm145_vm1, %v12493_v49  ;;  %v11398_v36 = vld [vmem:[%s12388_s0 + $0x279] sm:$0xff]  ;;  %v6825_v49 = vld [vmem:[%s12388_s0 + $0xc8] sm:$0xff] }
 0x17f   :  { %8910 = vmatprep.mubr.msk.f32.mxu0 %vm145_vm1, %v7360_v59  ;;  %v6824_v59 = vld [vmem:[%s12388_s0 + $0xc0] sm:$0xff] }
 0x181   :  { %8469 = vmatmul.mubr.msk.f32.gmra.mrb[62].mxu1 %vm145_vm1, %v12494_v43  ;;  %v11428_v43 = vld [vmem:[%s12388_s0 + $0x2a1] sm:$0xff] }
 0x182   :  { %8911 = vmatmul.mubr.msk.f32.gmra.mrb[30].mxu0 %vm145_vm1, %v7361_v6  ;;  %8473 = vmatprep.mubr.msk.f32.mxu1 %vm145_vm1, %v6810_v55  ;;  %v11420_v6 = vld [vmem:[%s12388_s0 + $0x291] sm:$0xff] }
 0x183   :  { %8913 = vmatprep.mubr.msk.f32.mxu0 %vm145_vm1, %v11248_v61  ;;  %v6826_v55 = vld [vmem:[%s12388_s0 + $0xd8] sm:$0xff] }
 0x185   :  { %8474 = vmatmul.mubr.msk.f32.vlgmr.msra.gmra.mrb[0].mxu1 %vm145_vm1, %v6811_v45  ;;  %v6827_v45 = vld [vmem:[%s12388_s0 + $0xe0] sm:$0xff] }
 0x186   :  { %8914 = vmatmul.mubr.msk.f32.gmra.mrb[32].mxu0 %vm145_vm1, %v11262_v48  ;;  %9060 = vmatpush3.msk.msra.mxu1 %vm338_vm0, %v9573_v54  ;;  %v6828_v54 = vld [vmem:[%s12388_s0 + $0xf0] sm:$0xff] }
 0x187   :  { %8476 = vmatprep.mubr.msk.f32.mxu1 %vm145_vm1, %v6812_v50  ;;  %8916 = vmatprep.mubr.msk.f32.mxu0 %vm145_vm1, %v11270_v52  ;;  %v11442_v50 = vld [vmem:[%s12388_s0 + $0x2a9] sm:$0xff] }
 0x189   :  { %8477 = vmatmul.mubr.msk.f32.gmra.mrb[2].mxu1 %vm145_vm1, %v6813_v56  ;;  %v11450_v56 = vld [vmem:[%s12388_s0 + $0x2b9] sm:$0xff] }
 0x18a   :  { %8917 = vmatmul.mubr.msk.f32.gmra.mrb[34].mxu0 %vm145_vm1, %v11288_v58  ;;  %8479 = vmatprep.mubr.msk.f32.mxu1 %vm145_vm1, %v6814_v60  ;;  %v6829_v60 = vld [vmem:[%s12388_s0 + $0xf8] sm:$0xff] }
 0x18b   :  { %8919 = vmatprep.mubr.msk.f32.mxu0 %vm145_vm1, %v11296_v62 }
 0x18d   :  { %8480 = vmatmul.mubr.msk.f32.gmra.mrb[4].mxu1 %vm145_vm1, %v6815_v0  ;;  %v11464_v0 = vld [vmem:[%s12388_s0 + $0x2c1] sm:$0xff] }
 0x18e   :  { %8920 = vmatmul.mubr.msk.f32.gmra.mrb[36].mxu0 %vm145_vm1, %v11310_v3  ;;  %8482 = vmatprep.mubr.msk.f32.mxu1 %vm145_vm1, %v6816_v5  ;;  %v6830_v5 = vld [vmem:[%s12388_s0 + $0x108] sm:$0xff] }
 0x18f   :  { %8922 = vmatprep.mubr.msk.f32.mxu0 %vm145_vm1, %v11318_v7 }
 0x191   :  { %8483 = vmatmul.mubr.msk.f32.gmra.mrb[6].mxu1 %vm145_vm1, %v6817_v9  ;;  %v11472_v9 = vld [vmem:[%s12388_s0 + $0x2d1] sm:$0xff] }
 0x192   :  { %8923 = vmatmul.mubr.msk.f32.gmra.mrb[38].mxu0 %vm145_vm1, %v11332_v11  ;;  %8485 = vmatprep.mubr.msk.f32.mxu1 %vm145_vm1, %v6818_v13  ;;  %v6831_v13 = vld [vmem:[%s12388_s0 + $0x110] sm:$0xff] }
 0x193   :  { %8925 = vmatprep.mubr.msk.f32.mxu0 %vm145_vm1, %v11340_v15 }
 0x195   :  { %8486 = vmatmul.mubr.msk.f32.gmra.mrb[8].mxu1 %vm145_vm1, %v6819_v17  ;;  %v11486_v17 = vld [vmem:[%s12388_s0 + $0x2d9] sm:$0xff] }
 0x196   :  { %8926 = vmatmul.mubr.msk.f32.gmra.mrb[40].mxu0 %vm145_vm1, %v11354_v19  ;;  %8488 = vmatprep.mubr.msk.f32.mxu1 %vm145_vm1, %v6820_v21  ;;  %v6832_v21 = vld [vmem:[%s12388_s0 + $0x120] sm:$0xff] }
 0x197   :  { %8928 = vmatprep.mubr.msk.f32.mxu0 %vm145_vm1, %v11362_v23 }
 0x199   :  { %8489 = vmatmul.mubr.msk.f32.gmra.mrb[10].mxu1 %vm145_vm1, %v6821_v25  ;;  %v11494_v25 = vld [vmem:[%s12388_s0 + $0x2e9] sm:$0xff] }
 0x19a   :  { %8929 = vmatmul.mubr.msk.f32.gmra.mrb[42].mxu0 %vm145_vm1, %v11376_v28  ;;  %8491 = vmatprep.mubr.msk.f32.mxu1 %vm145_vm1, %v6822_v30  ;;  %v6833_v30 = vld [vmem:[%s12388_s0 + $0x128] sm:$0xff] }
 0x19b   :  { %8931 = vmatprep.mubr.msk.f32.mxu0 %vm145_vm1, %v11384_v32 }
 0x19d   :  { %8492 = vmatmul.mubr.msk.f32.gmra.mrb[12].mxu1 %vm145_vm1, %v6823_v34  ;;  %v11508_v34 = vld [vmem:[%s12388_s0 + $0x2f1] sm:$0xff] }
 0x19e   :  { %8932 = vmatmul.mubr.msk.f32.gmra.mrb[44].mxu0 %vm145_vm1, %v11398_v36  ;;  %8494 = vmatprep.mubr.msk.f32.mxu1 %vm145_vm1, %v6824_v59  ;;  %v6834_v59 = vld [vmem:[%s12388_s0 + $0x138] sm:$0xff] }
 0x19f   :  { %8934 = vmatprep.mubr.msk.f32.mxu0 %vm145_vm1, %v11406_v53 }
 0x1a1   :  { %8495 = vmatmul.mubr.msk.f32.gmra.mrb[14].mxu1 %vm145_vm1, %v6825_v49  ;;  %v11516_v49 = vld [vmem:[%s12388_s0 + $0x301] sm:$0xff] }
 0x1a2   :  { %8935 = vmatmul.mubr.msk.f32.gmra.mrb[46].mxu0 %vm145_vm1, %v11420_v6  ;;  %8497 = vmatprep.mubr.msk.f32.mxu1 %vm145_vm1, %v6826_v55  ;;  %v6835_v55 = vld [vmem:[%s12388_s0 + $0x140] sm:$0xff] }
 0x1a3   :  { %8937 = vmatprep.mubr.msk.f32.mxu0 %vm145_vm1, %v11428_v43 }
 0x1a5   :  { %8498 = vmatmul.mubr.msk.f32.gmra.mrb[16].mxu1 %vm145_vm1, %v6827_v45  ;;  %v11530_v45 = vld [vmem:[%s12388_s0 + $0x309] sm:$0xff] }
 0x1a6   :  { %8938 = vmatmul.mubr.msk.f32.gmra.mrb[48].mxu0 %vm145_vm1, %v11442_v50  ;;  %8500 = vmatprep.mubr.msk.f32.mxu1 %vm145_vm1, %v6828_v54  ;;  %v6836_v54 = vld [vmem:[%s12388_s0 + $0x150] sm:$0xff] }
 0x1a7   :  { %8940 = vmatprep.mubr.msk.f32.mxu0 %vm145_vm1, %v11450_v56 }
 0x1a9   :  { %8501 = vmatmul.mubr.msk.f32.gmra.mrb[18].mxu1 %vm145_vm1, %v6829_v60  ;;  %v11538_v60 = vld [vmem:[%s12388_s0 + $0x319] sm:$0xff] }
 0x1aa   :  { %8941 = vmatmul.mubr.msk.f32.gmra.mrb[50].mxu0 %vm145_vm1, %v11464_v0  ;;  %8503 = vmatprep.mubr.msk.f32.mxu1 %vm145_vm1, %v6830_v5  ;;  %v6837_v5 = vld [vmem:[%s12388_s0 + $0x158] sm:$0xff] }
 0x1ab   :  { %8943 = vmatprep.mubr.msk.f32.mxu0 %vm145_vm1, %v11472_v9 }
 0x1ad   :  { %8504 = vmatmul.mubr.msk.f32.gmra.mrb[20].mxu1 %vm145_vm1, %v6831_v13  ;;  %v11552_v13 = vld [vmem:[%s12388_s0 + $0x321] sm:$0xff] }
 0x1ae   :  { %8944 = vmatmul.mubr.msk.f32.gmra.mrb[52].mxu0 %vm145_vm1, %v11486_v17  ;;  %8506 = vmatprep.mubr.msk.f32.mxu1 %vm145_vm1, %v6832_v21  ;;  %12495 = vst [vmem:[#allocation2_spill] sm:$0xff] %v11552_v13  ;;  %v6838_v21 = vld [vmem:[%s12388_s0 + $0x168] sm:$0xff] }
 0x1af   :  { %8946 = vmatprep.mubr.msk.f32.mxu0 %vm145_vm1, %v11494_v25 }
 0x1b1   :  { %8507 = vmatmul.mubr.msk.f32.gmra.mrb[22].mxu1 %vm145_vm1, %v6833_v30  ;;  %v11560_v30 = vld [vmem:[%s12388_s0 + $0x331] sm:$0xff] }
 0x1b2   :  { %8947 = vmatmul.mubr.msk.f32.gmra.mrb[54].mxu0 %vm145_vm1, %v11508_v34  ;;  %8509 = vmatprep.mubr.msk.f32.mxu1 %vm145_vm1, %v6834_v59  ;;  %12496 = vst [vmem:[#allocation3_spill] sm:$0xff] %v11560_v30  ;;  %v6839_v59 = vld [vmem:[%s12388_s0 + $0x170] sm:$0xff] }
 0x1b3   :  { %8949 = vmatprep.mubr.msk.f32.mxu0 %vm145_vm1, %v11516_v49 }
 0x1b5   :  { %8510 = vmatmul.mubr.msk.f32.gmra.mrb[24].mxu1 %vm145_vm1, %v6835_v55  ;;  %v11574_v55 = vld [vmem:[%s12388_s0 + $0x339] sm:$0xff] }
 0x1b6   :  { %8950 = vmatmul.mubr.msk.f32.gmra.mrb[56].mxu0 %vm145_vm1, %v11530_v45  ;;  %8512 = vmatprep.mubr.msk.f32.mxu1 %vm145_vm1, %v6836_v54  ;;  %12497 = vst [vmem:[#allocation4_spill] sm:$0xff] %v11574_v55  ;;  %v7392_v54 = vld [vmem:[%s12388_s0 + $0x349] sm:$0xff] }
 0x1b7   :  { %8952 = vmatprep.mubr.msk.f32.mxu0 %vm145_vm1, %v11538_v60 }
 0x1b9   :  { %8513 = vmatmul.mubr.msk.f32.gmra.mrb[26].mxu1 %vm145_vm1, %v6837_v5  ;;  %v12498_v5 = vld [vmem:[#allocation35_spill] sm:$0xff] }
 0x1ba   :  { %8953 = vmatmul.mubr.msk.f32.gmra.mrb[58].mxu0 %vm145_vm1, %v11552_v13  ;;  %8515 = vmatprep.mubr.msk.f32.mxu1 %vm145_vm1, %v6838_v21  ;;  %v7393_v21 = vld [vmem:[%s12388_s0 + $0x351] sm:$0xff] }
 0x1bb   :  { %8955 = vmatprep.mubr.msk.f32.mxu0 %vm145_vm1, %v11560_v30  ;;  %v7460_v30 = vld [vmem:[%s12388_s0 + $0x32] sm:$0xff] }
 0x1bc   :  { %v12499_v13 = vld [vmem:[#allocation36_spill] sm:$0xff] }
 0x1bd   :  { %8516 = vmatmul.mubr.msk.f32.gmra.mrb[28].mxu1 %vm145_vm1, %v6839_v59  ;;  %v12500_v59 = vld [vmem:[#allocation33_spill] sm:$0xff] }
 0x1be   :  { %8956 = vmatmul.mubr.msk.f32.gmra.mrb[60].mxu0 %vm145_vm1, %v11574_v55  ;;  %8518 = vmatprep.mubr.msk.f32.mxu1 %vm145_vm1, %v12498_v5  ;;  %v7462_v5 = vld [vmem:[%s12388_s0 + $0x4a] sm:$0xff]  ;;  %v12501_v55 = vld [vmem:[#allocation34_spill] sm:$0xff] }
 0x1bf   :  { %8958 = vmatprep.mubr.msk.f32.mxu0 %vm145_vm1, %v7392_v54  ;;  %v7461_v54 = vld [vmem:[%s12388_s0 + $0x3a] sm:$0xff] }
 0x1c1   :  { %8519 = vmatmul.mubr.msk.f32.gmra.mrb[30].mxu1 %vm145_vm1, %v12499_v13  ;;  %v7463_v13 = vld [vmem:[%s12388_s0 + $0x52] sm:$0xff] }
 0x1c2   :  { %8959 = vmatmul.mubr.msk.f32.gmra.mrb[62].mxu0 %vm145_vm1, %v7393_v21  ;;  %8521 = vmatprep.mubr.msk.f32.mxu1 %vm145_vm1, %v12500_v59  ;;  %v7492_v21 = vld [vmem:[%s12388_s0 + $0x1e2] sm:$0xff]  ;;  %v7494_v59 = vld [vmem:[%s12388_s0 + $0x1fa] sm:$0xff] }
 0x1c3   :  { %8963 = vmatprep.mubr.msk.f32.mxu0 %vm145_vm1, %v7460_v30  ;;  %v7464_v30 = vld [vmem:[%s12388_s0 + $0x62] sm:$0xff] }
 0x1c5   :  { %8522 = vmatmul.mubr.msk.f32.gmra.mrb[32].mxu1 %vm145_vm1, %v12501_v55  ;;  %v7466_v55 = vld [vmem:[%s12388_s0 + $0x7a] sm:$0xff] }
 0x1c6   :  { %8964 = vmatmul.mubr.msk.f32.vlgmr.msra.gmra.mrb[0].mxu0 %vm145_vm1, %v7461_v54  ;;  %8524 = vmatprep.mubr.msk.f32.mxu1 %vm145_vm1, %v10628_v57  ;;  %v7465_v57 = vld [vmem:[%s12388_s0 + $0x6a] sm:$0xff]  ;;  %v7496_v54 = vld [vmem:[%s12388_s0 + $0x212] sm:$0xff] }
 0x1c7   :  { %8966 = vmatprep.mubr.msk.f32.mxu0 %vm145_vm1, %v7462_v5  ;;  %v7498_v5 = vld [vmem:[%s12388_s0 + $0x22a] sm:$0xff] }
 0x1c9   :  { %8525 = vmatmul.mubr.msk.f32.gmra.mrb[34].mxu1 %vm145_vm1, %v10641_v47  ;;  %v7467_v47 = vld [vmem:[%s12388_s0 + $0x82] sm:$0xff] }
 0x1ca   :  { %8967 = vmatmul.mubr.msk.f32.gmra.mrb[2].mxu0 %vm145_vm1, %v7463_v13  ;;  %8527 = vmatprep.mubr.msk.f32.mxu1 %vm145_vm1, %v10648_v2  ;;  %v7468_v2 = vld [vmem:[%s12388_s0 + $0x92] sm:$0xff]  ;;  %v12502_v13 = vld [vmem:[#allocation2_spill] sm:$0xff] }
 0x1cb   :  { %8969 = vmatprep.mubr.msk.f32.mxu0 %vm145_vm1, %v7464_v30  ;;  %v12504_v30 = vld [vmem:[#allocation4_spill] sm:$0xff] }
 0x1cd   :  { %8528 = vmatmul.mubr.msk.f32.gmra.mrb[36].mxu1 %vm145_vm1, %v10659_v4  ;;  %v7469_v4 = vld [vmem:[%s12388_s0 + $0x9a] sm:$0xff] }
 0x1ce   :  { %8970 = vmatmul.mubr.msk.f32.gmra.mrb[4].mxu0 %vm145_vm1, %v7465_v57  ;;  %8530 = vmatprep.mubr.msk.f32.mxu1 %vm145_vm1, %v10666_v8  ;;  %v7470_v8 = vld [vmem:[%s12388_s0 + $0xaa] sm:$0xff] }
 0x1cf   :  { %8972 = vmatprep.mubr.msk.f32.mxu0 %vm145_vm1, %v7466_v55 }
 0x1d1   :  { %8531 = vmatmul.mubr.msk.f32.gmra.mrb[38].mxu1 %vm145_vm1, %v10677_v12  ;;  %v7471_v12 = vld [vmem:[%s12388_s0 + $0xb2] sm:$0xff] }
 0x1d2   :  { %8973 = vmatmul.mubr.msk.f32.gmra.mrb[6].mxu0 %vm145_vm1, %v7467_v47  ;;  %8533 = vmatprep.mubr.msk.f32.mxu1 %vm145_vm1, %v10684_v16  ;;  %v7472_v16 = vld [vmem:[%s12388_s0 + $0xc2] sm:$0xff] }
 0x1d3   :  { %8975 = vmatprep.mubr.msk.f32.mxu0 %vm145_vm1, %v7468_v2 }
 0x1d5   :  { %8534 = vmatmul.mubr.msk.f32.gmra.mrb[40].mxu1 %vm145_vm1, %v10695_v20  ;;  %v7473_v20 = vld [vmem:[%s12388_s0 + $0xca] sm:$0xff] }
 0x1d6   :  { %8976 = vmatmul.mubr.msk.f32.gmra.mrb[8].mxu0 %vm145_vm1, %v7469_v4  ;;  %8536 = vmatprep.mubr.msk.f32.mxu1 %vm145_vm1, %v10702_v24  ;;  %v7474_v24 = vld [vmem:[%s12388_s0 + $0xda] sm:$0xff] }
 0x1d7   :  { %8978 = vmatprep.mubr.msk.f32.mxu0 %vm145_vm1, %v7470_v8 }
 0x1d9   :  { %8537 = vmatmul.mubr.msk.f32.gmra.mrb[42].mxu1 %vm145_vm1, %v10713_v29  ;;  %v7475_v29 = vld [vmem:[%s12388_s0 + $0xe2] sm:$0xff] }
 0x1da   :  { %8979 = vmatmul.mubr.msk.f32.gmra.mrb[10].mxu0 %vm145_vm1, %v7471_v12  ;;  %8539 = vmatprep.mubr.msk.f32.mxu1 %vm145_vm1, %v10720_v33  ;;  %v7476_v33 = vld [vmem:[%s12388_s0 + $0xf2] sm:$0xff] }
 0x1db   :  { %8981 = vmatprep.mubr.msk.f32.mxu0 %vm145_vm1, %v7472_v16 }
 0x1dd   :  { %8540 = vmatmul.mubr.msk.f32.gmra.mrb[44].mxu1 %vm145_vm1, %v10731_v37  ;;  %v7477_v37 = vld [vmem:[%s12388_s0 + $0xfa] sm:$0xff] }
 0x1de   :  { %8982 = vmatmul.mubr.msk.f32.gmra.mrb[12].mxu0 %vm145_vm1, %v7473_v20  ;;  %8542 = vmatprep.mubr.msk.f32.mxu1 %vm145_vm1, %v10738_v40  ;;  %v7478_v40 = vld [vmem:[%s12388_s0 + $0x10a] sm:$0xff] }
 0x1df   :  { %8984 = vmatprep.mubr.msk.f32.mxu0 %vm145_vm1, %v7474_v24 }
 0x1e1   :  { %8543 = vmatmul.mubr.msk.f32.gmra.mrb[46].mxu1 %vm145_vm1, %v10749_v44  ;;  %v7479_v44 = vld [vmem:[%s12388_s0 + $0x112] sm:$0xff] }
 0x1e2   :  { %8985 = vmatmul.mubr.msk.f32.gmra.mrb[14].mxu0 %vm145_vm1, %v7475_v29  ;;  %8545 = vmatprep.mubr.msk.f32.mxu1 %vm145_vm1, %v10756_v46  ;;  %v7480_v46 = vld [vmem:[%s12388_s0 + $0x122] sm:$0xff] }
 0x1e3   :  { %8987 = vmatprep.mubr.msk.f32.mxu0 %vm145_vm1, %v7476_v33 }
 0x1e5   :  { %8546 = vmatmul.mubr.msk.f32.gmra.mrb[48].mxu1 %vm145_vm1, %v10767_v51  ;;  %v7481_v51 = vld [vmem:[%s12388_s0 + $0x12a] sm:$0xff] }
 0x1e6   :  { %8988 = vmatmul.mubr.msk.f32.gmra.mrb[16].mxu0 %vm145_vm1, %v7477_v37  ;;  %8548 = vmatprep.mubr.msk.f32.mxu1 %vm145_vm1, %v10774_v42  ;;  %v7482_v42 = vld [vmem:[%s12388_s0 + $0x13a] sm:$0xff] }
 0x1e7   :  { %8990 = vmatprep.mubr.msk.f32.mxu0 %vm145_vm1, %v7478_v40 }
 0x1e9   :  { %8549 = vmatmul.mubr.msk.f32.gmra.mrb[50].mxu1 %vm145_vm1, %v10785_v39  ;;  %v7483_v39 = vld [vmem:[%s12388_s0 + $0x142] sm:$0xff] }
 0x1ea   :  { %8991 = vmatmul.mubr.msk.f32.gmra.mrb[18].mxu0 %vm145_vm1, %v7479_v44  ;;  %8551 = vmatprep.mubr.msk.f32.mxu1 %vm145_vm1, %v10792_v35  ;;  %v7484_v35 = vld [vmem:[%s12388_s0 + $0x152] sm:$0xff] }
 0x1eb   :  { %8993 = vmatprep.mubr.msk.f32.mxu0 %vm145_vm1, %v7480_v46 }
 0x1ed   :  { %8552 = vmatmul.mubr.msk.f32.gmra.mrb[52].mxu1 %vm145_vm1, %v10803_v31  ;;  %v7485_v31 = vld [vmem:[%s12388_s0 + $0x15a] sm:$0xff] }
 0x1ee   :  { %8994 = vmatmul.mubr.msk.f32.gmra.mrb[20].mxu0 %vm145_vm1, %v7481_v51  ;;  %8554 = vmatprep.mubr.msk.f32.mxu1 %vm145_vm1, %v10810_v27  ;;  %v7486_v27 = vld [vmem:[%s12388_s0 + $0x16a] sm:$0xff] }
 0x1ef   :  { %8996 = vmatprep.mubr.msk.f32.mxu0 %vm145_vm1, %v7482_v42 }
 0x1f1   :  { %8555 = vmatmul.mubr.msk.f32.gmra.mrb[54].mxu1 %vm145_vm1, %v10821_v22  ;;  %v7487_v22 = vld [vmem:[%s12388_s0 + $0x172] sm:$0xff] }
 0x1f2   :  { %8997 = vmatmul.mubr.msk.f32.gmra.mrb[22].mxu0 %vm145_vm1, %v7483_v39  ;;  %8557 = vmatprep.mubr.msk.f32.mxu1 %vm145_vm1, %v10828_v18  ;;  %v7488_v18 = vld [vmem:[%s12388_s0 + $0x182] sm:$0xff] }
 0x1f3   :  { %8999 = vmatprep.mubr.msk.f32.mxu0 %vm145_vm1, %v7484_v35 }
 0x1f5   :  { %8558 = vmatmul.mubr.msk.f32.gmra.mrb[56].mxu1 %vm145_vm1, %v10839_v14  ;;  %v7489_v14 = vld [vmem:[%s12388_s0 + $0x18a] sm:$0xff] }
 0x1f6   :  { %9000 = vmatmul.mubr.msk.f32.gmra.mrb[24].mxu0 %vm145_vm1, %v7485_v31  ;;  %8560 = vmatprep.mubr.msk.f32.mxu1 %vm145_vm1, %v10846_v10  ;;  %v7490_v10 = vld [vmem:[%s12388_s0 + $0x19a] sm:$0xff] }
 0x1f7   :  { %9002 = vmatprep.mubr.msk.f32.mxu0 %vm145_vm1, %v7486_v27 }
 0x1f9   :  { %8561 = vmatmul.mubr.msk.f32.gmra.mrb[58].mxu1 %vm145_vm1, %v10862_v26  ;;  %v7491_v26 = vld [vmem:[%s12388_s0 + $0x1a2] sm:$0xff] }
 0x1fa   :  { %9003 = vmatmul.mubr.msk.f32.gmra.mrb[26].mxu0 %vm145_vm1, %v7487_v22  ;;  %8563 = vmatprep.mubr.msk.f32.mxu1 %vm145_vm1, %v10874_v63  ;;  %v6972_v63 = vld [vmem:[%s12388_s0 + $0x1c9] sm:$0xff] }
 0x1fb   :  { %9005 = vmatprep.mubr.msk.f32.mxu0 %vm145_vm1, %v7488_v18 }
 0x1fd   :  { %8564 = vmatmul.mubr.msk.f32.gmra.mrb[60].mxu1 %vm145_vm1, %v10888_v38  ;;  %v6973_v38 = vld [vmem:[%s12388_s0 + $0x1d1] sm:$0xff] }
 0x1fe   :  { %9006 = vmatmul.mubr.msk.f32.gmra.mrb[28].mxu0 %vm145_vm1, %v7489_v14  ;;  %8566 = vmatprep.mubr.msk.f32.mxu1 %vm145_vm1, %v11016_v1  ;;  %v7493_v1 = vld [vmem:[%s12388_s0 + $0x1ea] sm:$0xff] }
 0x1ff   :  { %9008 = vmatprep.mubr.msk.f32.mxu0 %vm145_vm1, %v7490_v10 }
 0x201   :  { %8567 = vmatmul.mubr.msk.f32.gmra.mrb[62].mxu1 %vm145_vm1, %v11029_v41  ;;  %v7495_v41 = vld [vmem:[%s12388_s0 + $0x202] sm:$0xff] }
 0x202   :  { %9009 = vmatmul.mubr.msk.f32.gmra.mrb[30].mxu0 %vm145_vm1, %v7491_v26  ;;  %8619 = vmatprep.mubr.msk.f32.mxu1 %vm145_vm1, %v6972_v63 }
 0x203   :  { %9011 = vmatprep.mubr.msk.f32.mxu0 %vm145_vm1, %v7492_v21 }
 0x205   :  { %8620 = vmatmul.mubr.msk.f32.vlgmr.msra.gmra.mrb[32].mxu1 %vm145_vm1, %v6973_v38 }
 0x206   :  { %9012 = vmatmul.mubr.msk.f32.gmra.mrb[32].mxu0 %vm145_vm1, %v7493_v1  ;;  %8622 = vmatprep.mubr.msk.f32.mxu1 %vm145_vm1, %v11248_v61  ;;  %v7497_v61 = vld [vmem:[%s12388_s0 + $0x21a] sm:$0xff] }
 0x207   :  { %9014 = vmatprep.mubr.msk.f32.mxu0 %vm145_vm1, %v7494_v59 }
 0x209   :  { %8623 = vmatmul.mubr.msk.f32.gmra.mrb[34].mxu1 %vm145_vm1, %v11262_v48  ;;  %v7499_v48 = vld [vmem:[%s12388_s0 + $0x232] sm:$0xff] }
 0x20a   :  { %9015 = vmatmul.mubr.msk.f32.gmra.mrb[34].mxu0 %vm145_vm1, %v7495_v41  ;;  %8625 = vmatprep.mubr.msk.f32.mxu1 %vm145_vm1, %v11270_v52  ;;  %v7500_v52 = vld [vmem:[%s12388_s0 + $0x242] sm:$0xff] }
 0x20b   :  { %9017 = vmatprep.mubr.msk.f32.mxu0 %vm145_vm1, %v7496_v54  ;;  %v12034_v54 = vld [vmem:[%s12389_s2] ss:$0 sm:$0xff] }
 0x20d   :  { %8626 = vmatmul.mubr.msk.f32.gmra.mrb[36].mxu1 %vm145_vm1, %v11288_v58  ;;  %v7501_v58 = vld [vmem:[%s12388_s0 + $0x24a] sm:$0xff] }
 0x20e   :  { %9018 = vmatmul.mubr.msk.f32.gmra.mrb[36].mxu0 %vm145_vm1, %v7497_v61  ;;  %8628 = vmatprep.mubr.msk.f32.mxu1 %vm145_vm1, %v11296_v62  ;;  %v7502_v62 = vld [vmem:[%s12388_s0 + $0x25a] sm:$0xff] }
 0x20f   :  { %9020 = vmatprep.mubr.msk.f32.mxu0 %vm145_vm1, %v7498_v5 }
 0x211   :  { %8629 = vmatmul.mubr.msk.f32.gmra.mrb[38].mxu1 %vm145_vm1, %v11310_v3  ;;  %v7503_v3 = vld [vmem:[%s12388_s0 + $0x262] sm:$0xff] }
 0x212   :  { %9021 = vmatmul.mubr.msk.f32.gmra.mrb[38].mxu0 %vm145_vm1, %v7499_v48  ;;  %8631 = vmatprep.mubr.msk.f32.mxu1 %vm145_vm1, %v11318_v7  ;;  %v7504_v7 = vld [vmem:[%s12388_s0 + $0x272] sm:$0xff]  ;;  %v12039_v48 = vld [vmem:[%s12389_s2 + $0x1] ss:$0 sm:$0xff] }
 0x213   :  { %9023 = vmatprep.mubr.msk.f32.mxu0 %vm145_vm1, %v7500_v52 }
 0x215   :  { %8632 = vmatmul.mubr.msk.f32.gmra.mrb[40].mxu1 %vm145_vm1, %v11332_v11  ;;  %v7505_v11 = vld [vmem:[%s12388_s0 + $0x27a] sm:$0xff] }
 0x216   :  { %9024 = vmatmul.mubr.msk.f32.gmra.mrb[40].mxu0 %vm145_vm1, %v7501_v58  ;;  %8634 = vmatprep.mubr.msk.f32.mxu1 %vm145_vm1, %v11340_v15  ;;  %v7506_v15 = vld [vmem:[%s12388_s0 + $0x28a] sm:$0xff] }
 0x217   :  { %9026 = vmatprep.mubr.msk.f32.mxu0 %vm145_vm1, %v7502_v62 }
 0x219   :  { %8635 = vmatmul.mubr.msk.f32.gmra.mrb[42].mxu1 %vm145_vm1, %v11354_v19  ;;  %v7507_v19 = vld [vmem:[%s12388_s0 + $0x292] sm:$0xff] }
 0x21a   :  { %9027 = vmatmul.mubr.msk.f32.gmra.mrb[42].mxu0 %vm145_vm1, %v7503_v3  ;;  %8637 = vmatprep.mubr.msk.f32.mxu1 %vm145_vm1, %v11362_v23  ;;  %v7508_v23 = vld [vmem:[%s12388_s0 + $0x2a2] sm:$0xff] }
 0x21b   :  { %9029 = vmatprep.mubr.msk.f32.mxu0 %vm145_vm1, %v7504_v7 }
 0x21d   :  { %8638 = vmatmul.mubr.msk.f32.gmra.mrb[44].mxu1 %vm145_vm1, %v11376_v28  ;;  %v7509_v28 = vld [vmem:[%s12388_s0 + $0x2aa] sm:$0xff] }
 0x21e   :  { %9030 = vmatmul.mubr.msk.f32.gmra.mrb[44].mxu0 %vm145_vm1, %v7505_v11  ;;  %8640 = vmatprep.mubr.msk.f32.mxu1 %vm145_vm1, %v11384_v32  ;;  %v7510_v32 = vld [vmem:[%s12388_s0 + $0x2ba] sm:$0xff] }
 0x21f   :  { %9032 = vmatprep.mubr.msk.f32.mxu0 %vm145_vm1, %v7506_v15 }
 0x221   :  { %8641 = vmatmul.mubr.msk.f32.gmra.mrb[46].mxu1 %vm145_vm1, %v11398_v36  ;;  %v7511_v36 = vld [vmem:[%s12388_s0 + $0x2c2] sm:$0xff] }
 0x222   :  { %9033 = vmatmul.mubr.msk.f32.gmra.mrb[46].mxu0 %vm145_vm1, %v7507_v19  ;;  %8643 = vmatprep.mubr.msk.f32.mxu1 %vm145_vm1, %v11406_v53  ;;  %v7512_v53 = vld [vmem:[%s12388_s0 + $0x2d2] sm:$0xff] }
 0x223   :  { %9035 = vmatprep.mubr.msk.f32.mxu0 %vm145_vm1, %v7508_v23 }
 0x225   :  { %8644 = vmatmul.mubr.msk.f32.gmra.mrb[48].mxu1 %vm145_vm1, %v11420_v6  ;;  %v7513_v6 = vld [vmem:[%s12388_s0 + $0x2da] sm:$0xff] }
 0x226   :  { %9036 = vmatmul.mubr.msk.f32.gmra.mrb[48].mxu0 %vm145_vm1, %v7509_v28  ;;  %8646 = vmatprep.mubr.msk.f32.mxu1 %vm145_vm1, %v11428_v43  ;;  %v7514_v43 = vld [vmem:[%s12388_s0 + $0x2ea] sm:$0xff] }
 0x227   :  { %9038 = vmatprep.mubr.msk.f32.mxu0 %vm145_vm1, %v7510_v32 }
 0x229   :  { %8647 = vmatmul.mubr.msk.f32.gmra.mrb[50].mxu1 %vm145_vm1, %v11442_v50  ;;  %v7515_v50 = vld [vmem:[%s12388_s0 + $0x2f2] sm:$0xff] }
 0x22a   :  { %9039 = vmatmul.mubr.msk.f32.gmra.mrb[50].mxu0 %vm145_vm1, %v7511_v36  ;;  %8649 = vmatprep.mubr.msk.f32.mxu1 %vm145_vm1, %v11450_v56  ;;  %v7516_v56 = vld [vmem:[%s12388_s0 + $0x302] sm:$0xff] }
 0x22b   :  { %9041 = vmatprep.mubr.msk.f32.mxu0 %vm145_vm1, %v7512_v53 }
 0x22d   :  { %8650 = vmatmul.mubr.msk.f32.gmra.mrb[52].mxu1 %vm145_vm1, %v11464_v0  ;;  %v7517_v0 = vld [vmem:[%s12388_s0 + $0x30a] sm:$0xff] }
 0x22e   :  { %9042 = vmatmul.mubr.msk.f32.gmra.mrb[52].mxu0 %vm145_vm1, %v7513_v6  ;;  %8652 = vmatprep.mubr.msk.f32.mxu1 %vm145_vm1, %v11472_v9  ;;  %v7518_v9 = vld [vmem:[%s12388_s0 + $0x31a] sm:$0xff] }
 0x22f   :  { %9044 = vmatprep.mubr.msk.f32.mxu0 %vm145_vm1, %v7514_v43 }
 0x231   :  { %8653 = vmatmul.mubr.msk.f32.gmra.mrb[54].mxu1 %vm145_vm1, %v11486_v17  ;;  %v7519_v17 = vld [vmem:[%s12388_s0 + $0x322] sm:$0xff] }
 0x232   :  { %9045 = vmatmul.mubr.msk.f32.gmra.mrb[54].mxu0 %vm145_vm1, %v7515_v50  ;;  %8655 = vmatprep.mubr.msk.f32.mxu1 %vm145_vm1, %v11494_v25  ;;  %v7520_v25 = vld [vmem:[%s12388_s0 + $0x332] sm:$0xff] }
 0x233   :  { %9047 = vmatprep.mubr.msk.f32.mxu0 %vm145_vm1, %v7516_v56 }
 0x235   :  { %8656 = vmatmul.mubr.msk.f32.gmra.mrb[56].mxu1 %vm145_vm1, %v11508_v34  ;;  %v7521_v34 = vld [vmem:[%s12388_s0 + $0x33a] sm:$0xff] }
 0x236   :  { %9048 = vmatmul.mubr.msk.f32.gmra.mrb[56].mxu0 %vm145_vm1, %v7517_v0  ;;  %8658 = vmatprep.mubr.msk.f32.mxu1 %vm145_vm1, %v11516_v49  ;;  %v7522_v49 = vld [vmem:[%s12388_s0 + $0x34a] sm:$0xff] }
 0x237   :  { %9050 = vmatprep.mubr.msk.f32.mxu0 %vm145_vm1, %v7518_v9 }
 0x239   :  { %8659 = vmatmul.mubr.msk.f32.gmra.mrb[58].mxu1 %vm145_vm1, %v11530_v45  ;;  %v12503_v45 = vld [vmem:[#allocation3_spill] sm:$0xff] }
 0x23a   :  { %9051 = vmatmul.mubr.msk.f32.gmra.mrb[58].mxu0 %vm145_vm1, %v7519_v17  ;;  %8661 = vmatprep.mubr.msk.f32.mxu1 %vm145_vm1, %v11538_v60  ;;  %v7523_v60 = vld [vmem:[%s12388_s0 + $0x352] sm:$0xff] }
 0x23b   :  { %9053 = vmatprep.mubr.msk.f32.mxu0 %vm145_vm1, %v7520_v25 }
 0x23d   :  { %8662 = vmatmul.mubr.msk.f32.gmra.mrb[60].mxu1 %vm145_vm1, %v12502_v13 }
 0x23e   :  { %9054 = vmatmul.mubr.msk.f32.gmra.mrb[60].mxu0 %vm145_vm1, %v7521_v34  ;;  %8664 = vmatprep.mubr.msk.f32.mxu1 %vm145_vm1, %v12503_v45 }
 0x23f   :  { %9056 = vmatprep.mubr.msk.f32.mxu0 %vm145_vm1, %v7522_v49 }
 0x241   :  { %8665 = vmatmul.mubr.msk.f32.gmra.mrb[62].mxu1 %vm145_vm1, %v12504_v30 }
 0x242   :  { %9057 = vmatmul.mubr.msk.f32.gmra.mrb[62].mxu0 %vm145_vm1, %v7523_v60 }
 0x258   :  { %v8475_v57 = vpop.f32.mrb[0].mxu1 }
 0x259   :  { %v2345_v55 = vpop.f32.mrb[1].mxu1 }
 0x25c   :  { %v8478_v47 = vpop.f32.mrb[2].mxu1 }
 0x25d   :  { %v2355_v2 = vpop.f32.mrb[3].mxu1 }
 0x260   :  { %v8481_v4 = vpop.f32.mrb[4].mxu1 }
 0x261   :  { %v2365_v8 = vpop.f32.mrb[5].mxu1 }
 0x264   :  { %v11979_v12 = vpop.f32.mrb[6].mxu1 }
 0x265   :  { %v11981_v16 = vpop.f32.mrb[7].mxu1 }
 0x268   :  { %v11983_v20 = vpop.f32.mrb[8].mxu1 }
 0x269   :  { %v11985_v24 = vpop.f32.mrb[9].mxu1 }
 0x26c   :  { %v11987_v29 = vpop.f32.mrb[10].mxu1 }
 0x26d   :  { %v11989_v33 = vpop.f32.mrb[11].mxu1 }
 0x270   :  { %v11991_v37 = vpop.f32.mrb[12].mxu1 }
 0x271   :  { %v11993_v40 = vpop.f32.mrb[13].mxu1 }
 0x274   :  { %v11995_v44 = vpop.f32.mrb[14].mxu1 }
 0x275   :  { %v11997_v46 = vpop.f32.mrb[15].mxu1 }
 0x278   :  { %v11999_v51 = vpop.f32.mrb[16].mxu1 }
 0x279   :  { %v12001_v42 = vpop.f32.mrb[17].mxu1 }
 0x27c   :  { %v12003_v39 = vpop.f32.mrb[18].mxu1 }
 0x27d   :  { %v12005_v35 = vpop.f32.mrb[19].mxu1 }
 0x280   :  { %v12007_v31 = vpop.f32.mrb[20].mxu1 }
 0x281   :  { %v12009_v27 = vpop.f32.mrb[21].mxu1 }
 0x284   :  { %v12011_v22 = vpop.f32.mrb[22].mxu1 }
 0x285   :  { %v12013_v18 = vpop.f32.mrb[23].mxu1 }
 0x288   :  { %v12015_v14 = vpop.f32.mrb[24].mxu1 }
 0x289   :  { %v12017_v10 = vpop.f32.mrb[25].mxu1 }
 0x28c   :  { %v12019_v26 = vpop.f32.mrb[26].mxu1 }
 0x28d   :  { %v12021_v63 = vpop.f32.mrb[27].mxu1 }
 0x290   :  { %v12023_v21 = vpop.f32.mrb[28].mxu1 }
 0x291   :  { %v12025_v38 = vpop.f32.mrb[29].mxu1 }
 0x294   :  { %v12027_v1 = vpop.f32.mrb[30].mxu1 }
 0x295   :  { %v12029_v59 = vpop.f32.mrb[31].mxu1 }
 0x299   :  { %v8965_v41 = vpop.f32.mrb[0].mxu0 }
 0x29a   :  { %v9061_v61 = vadd.f32 %v8965_v41, %v8475_v57  ;;  %v5896_v5 = vpop.f32.mrb[1].mxu0 }
 0x29b   :  { %v9062_v52 = vadd.f32 %v5896_v5, %v2345_v55 }
 0x29c   :  { %v6286_v58 = vadd.f32 %v9061_v61, %v12034_v54 }
 0x29d   :  { %v6285_v62 = vadd.f32 %v9062_v52, %v12034_v54  ;;  %v8968_v3 = vpop.f32.mrb[2].mxu0 }
 0x29e   :  { %vm6350_vm2 = vcmp.gt.f32.partialorder %v6286_v58, 0.0  ;;  %v6418_v7 = vmul.f32 %v12039_v48, %v6286_v58  ;;  %v9063_v11 = vadd.f32 %v8968_v3, %v8478_v47  ;;  %v5906_v15 = vpop.f32.mrb[3].mxu0 }
 0x29f   :  { %vm6349_vm3 = vcmp.gt.f32.partialorder %v6285_v62, 0.0  ;;  %v6417_v19 = vmul.f32 %v12039_v48, %v6285_v62  ;;  %v9064_v23 = vadd.f32 %v5906_v15, %v2355_v2 }
 0x2a0   :  { %v6482_v28 = vsel %vm6350_vm2, %v6286_v58, %v6418_v7  ;;  %v6288_v32 = vadd.f32 %v9063_v11, %v12034_v54 }
 0x2a1   :  { %6546 = vst [vmem:[%s12390_s3 + $0x8] sm:$0xff] %v6482_v28  ;;  %v6481_v36 = vsel %vm6349_vm3, %v6285_v62, %v6417_v19  ;;  %v6287_v53 = vadd.f32 %v9064_v23, %v12034_v54  ;;  %v8971_v6 = vpop.f32.mrb[4].mxu0 }
 0x2a2   :  { %6545 = vst [vmem:[%s12390_s3] sm:$0xff] %v6481_v36  ;;  %vm6352_vm4 = vcmp.gt.f32.partialorder %v6288_v32, 0.0  ;;  %v6420_v43 = vmul.f32 %v12039_v48, %v6288_v32  ;;  %v9065_v50 = vadd.f32 %v8971_v6, %v8481_v4  ;;  %v5916_v56 = vpop.f32.mrb[5].mxu0 }
 0x2a3   :  { %vm6351_vm5 = vcmp.gt.f32.partialorder %v6287_v53, 0.0  ;;  %v6419_v0 = vmul.f32 %v12039_v48, %v6287_v53  ;;  %v9066_v9 = vadd.f32 %v5916_v56, %v2365_v8 }
 0x2a4   :  { %v6484_v17 = vsel %vm6352_vm4, %v6288_v32, %v6420_v43  ;;  %v6290_v25 = vadd.f32 %v9065_v50, %v12034_v54 }
 0x2a5   :  { %6548 = vst [vmem:[%s12390_s3 + $0x18] sm:$0xff] %v6484_v17  ;;  %v6483_v34 = vsel %vm6351_vm5, %v6287_v53, %v6419_v0  ;;  %v6289_v49 = vadd.f32 %v9066_v9, %v12034_v54  ;;  %v8974_v13 = vpop.f32.mrb[6].mxu0 }
 0x2a6   :  { %6547 = vst [vmem:[%s12390_s3 + $0x10] sm:$0xff] %v6483_v34  ;;  %vm6354_vm6 = vcmp.gt.f32.partialorder %v6290_v25, 0.0  ;;  %v6422_v45 = vmul.f32 %v12039_v48, %v6290_v25  ;;  %v9067_v60 = vadd.f32 %v8974_v13, %v11979_v12  ;;  %v5926_v30 = vpop.f32.mrb[7].mxu0 }
 0x2a7   :  { %vm6353_vm7 = vcmp.gt.f32.partialorder %v6289_v49, 0.0  ;;  %v6421_v57 = vmul.f32 %v12039_v48, %v6289_v49  ;;  %v9068_v55 = vadd.f32 %v5926_v30, %v11981_v16 }
 0x2a8   :  { %v6486_v47 = vsel %vm6354_vm6, %v6290_v25, %v6422_v45  ;;  %v6292_v2 = vadd.f32 %v9067_v60, %v12034_v54 }
 0x2a9   :  { %6550 = vst [vmem:[%s12390_s3 + $0x28] sm:$0xff] %v6486_v47  ;;  %v6485_v4 = vsel %vm6353_vm7, %v6289_v49, %v6421_v57  ;;  %v6291_v8 = vadd.f32 %v9068_v55, %v12034_v54  ;;  %v8977_v41 = vpop.f32.mrb[8].mxu0 }
 0x2aa   :  { %6549 = vst [vmem:[%s12390_s3 + $0x20] sm:$0xff] %v6485_v4  ;;  %vm6356_vm8 = vcmp.gt.f32.partialorder %v6292_v2, 0.0  ;;  %v6424_v12 = vmul.f32 %v12039_v48, %v6292_v2  ;;  %v9069_v16 = vadd.f32 %v8977_v41, %v11983_v20  ;;  %v5936_v61 = vpop.f32.mrb[9].mxu0 }
 0x2ab   :  { %vm6355_vm9 = vcmp.gt.f32.partialorder %v6291_v8, 0.0  ;;  %v6423_v5 = vmul.f32 %v12039_v48, %v6291_v8  ;;  %v9070_v52 = vadd.f32 %v5936_v61, %v11985_v24 }
 0x2ac   :  { %v6488_v58 = vsel %vm6356_vm8, %v6292_v2, %v6424_v12  ;;  %v6294_v62 = vadd.f32 %v9069_v16, %v12034_v54 }
 0x2ad   :  { %6552 = vst [vmem:[%s12390_s3 + $0x38] sm:$0xff] %v6488_v58  ;;  %v6487_v3 = vsel %vm6355_vm9, %v6291_v8, %v6423_v5  ;;  %v6293_v7 = vadd.f32 %v9070_v52, %v12034_v54  ;;  %v8980_v11 = vpop.f32.mrb[10].mxu0 }
 0x2ae   :  { %6551 = vst [vmem:[%s12390_s3 + $0x30] sm:$0xff] %v6487_v3  ;;  %vm6358_vm10 = vcmp.gt.f32.partialorder %v6294_v62, 0.0  ;;  %v6426_v20 = vmul.f32 %v12039_v48, %v6294_v62  ;;  %v9071_v24 = vadd.f32 %v8980_v11, %v11987_v29  ;;  %v5946_v15 = vpop.f32.mrb[11].mxu0 }
 0x2af   :  { %vm6357_vm11 = vcmp.gt.f32.partialorder %v6293_v7, 0.0  ;;  %v6425_v19 = vmul.f32 %v12039_v48, %v6293_v7  ;;  %v9072_v23 = vadd.f32 %v5946_v15, %v11989_v33 }
 0x2b0   :  { %v6490_v28 = vsel %vm6358_vm10, %v6294_v62, %v6426_v20  ;;  %v6296_v32 = vadd.f32 %v9071_v24, %v12034_v54 }
 0x2b1   :  { %6554 = vst [vmem:[%s12390_s3 + $0x48] sm:$0xff] %v6490_v28  ;;  %v6489_v36 = vsel %vm6357_vm11, %v6293_v7, %v6425_v19  ;;  %v6295_v53 = vadd.f32 %v9072_v23, %v12034_v54  ;;  %v8983_v6 = vpop.f32.mrb[12].mxu0 }
 0x2b2   :  { %6553 = vst [vmem:[%s12390_s3 + $0x40] sm:$0xff] %v6489_v36  ;;  %vm6360_vm12 = vcmp.gt.f32.partialorder %v6296_v32, 0.0  ;;  %v6428_v29 = vmul.f32 %v12039_v48, %v6296_v32  ;;  %v9073_v33 = vadd.f32 %v8983_v6, %v11991_v37  ;;  %v5956_v43 = vpop.f32.mrb[13].mxu0 }
 0x2b3   :  { %vm6359_vm13 = vcmp.gt.f32.partialorder %v6295_v53, 0.0  ;;  %v6427_v50 = vmul.f32 %v12039_v48, %v6295_v53  ;;  %v9074_v56 = vadd.f32 %v5956_v43, %v11993_v40 }
 0x2b4   :  { %v6492_v0 = vsel %vm6360_vm12, %v6296_v32, %v6428_v29  ;;  %v6298_v9 = vadd.f32 %v9073_v33, %v12034_v54 }
 0x2b5   :  { %6556 = vst [vmem:[%s12390_s3 + $0x58] sm:$0xff] %v6492_v0  ;;  %v6491_v17 = vsel %vm6359_vm13, %v6295_v53, %v6427_v50  ;;  %v6297_v25 = vadd.f32 %v9074_v56, %v12034_v54  ;;  %v8986_v34 = vpop.f32.mrb[14].mxu0 }
 0x2b6   :  { %6555 = vst [vmem:[%s12390_s3 + $0x50] sm:$0xff] %v6491_v17  ;;  %vm6362_vm14 = vcmp.gt.f32.partialorder %v6298_v9, 0.0  ;;  %v6430_v37 = vmul.f32 %v12039_v48, %v6298_v9  ;;  %v9075_v40 = vadd.f32 %v8986_v34, %v11995_v44  ;;  %v5966_v49 = vpop.f32.mrb[15].mxu0 }
 0x2b7   :  { %vm6361_vm15 = vcmp.gt.f32.partialorder %v6297_v25, 0.0  ;;  %v6429_v13 = vmul.f32 %v12039_v48, %v6297_v25  ;;  %v9076_v45 = vadd.f32 %v5966_v49, %v11997_v46 }
 0x2b8   :  { %v6494_v60 = vsel %vm6362_vm14, %v6298_v9, %v6430_v37  ;;  %v6300_v30 = vadd.f32 %v9075_v40, %v12034_v54 }
 0x2b9   :  { %6558 = vst [vmem:[%s12390_s3 + $0x68] sm:$0xff] %v6494_v60  ;;  %v6493_v57 = vsel %vm6361_vm15, %v6297_v25, %v6429_v13  ;;  %v6299_v55 = vadd.f32 %v9076_v45, %v12034_v54  ;;  %v8989_v47 = vpop.f32.mrb[16].mxu0 }
 0x2ba   :  { %6557 = vst [vmem:[%s12390_s3 + $0x60] sm:$0xff] %v6493_v57  ;;  %vm6364_vm0 = vcmp.gt.f32.partialorder %v6300_v30, 0.0  ;;  %v6432_v44 = vmul.f32 %v12039_v48, %v6300_v30  ;;  %v9077_v46 = vadd.f32 %v8989_v47, %v11999_v51  ;;  %v5976_v2 = vpop.f32.mrb[17].mxu0 }
 0x2bb   :  { %vm6363_vm1 = vcmp.gt.f32.partialorder %v6299_v55, 0.0  ;;  %v6431_v4 = vmul.f32 %v12039_v48, %v6299_v55  ;;  %v9078_v8 = vadd.f32 %v5976_v2, %v12001_v42 }
 0x2bc   :  { %v6496_v41 = vsel %vm6364_vm0, %v6300_v30, %v6432_v44  ;;  %v6302_v12 = vadd.f32 %v9077_v46, %v12034_v54 }
 0x2bd   :  { %6560 = vst [vmem:[%s12390_s3 + $0x78] sm:$0xff] %v6496_v41  ;;  %v6495_v16 = vsel %vm6363_vm1, %v6299_v55, %v6431_v4  ;;  %v6301_v61 = vadd.f32 %v9078_v8, %v12034_v54  ;;  %v8992_v5 = vpop.f32.mrb[18].mxu0 }
 0x2be   :  { %6559 = vst [vmem:[%s12390_s3 + $0x70] sm:$0xff] %v6495_v16  ;;  %vm6366_vm2 = vcmp.gt.f32.partialorder %v6302_v12, 0.0  ;;  %v6434_v51 = vmul.f32 %v12039_v48, %v6302_v12  ;;  %v9079_v42 = vadd.f32 %v8992_v5, %v12003_v39  ;;  %v5986_v52 = vpop.f32.mrb[19].mxu0 }
 0x2bf   :  { %vm6365_vm3 = vcmp.gt.f32.partialorder %v6301_v61, 0.0  ;;  %v6433_v58 = vmul.f32 %v12039_v48, %v6301_v61  ;;  %v9080_v62 = vadd.f32 %v5986_v52, %v12005_v35 }
 0x2c0   :  { %v6498_v3 = vsel %vm6366_vm2, %v6302_v12, %v6434_v51  ;;  %v6304_v7 = vadd.f32 %v9079_v42, %v12034_v54 }
 0x2c1   :  { %6562 = vst [vmem:[%s12390_s3 + $0x88] sm:$0xff] %v6498_v3  ;;  %v6497_v11 = vsel %vm6365_vm3, %v6301_v61, %v6433_v58  ;;  %v6303_v20 = vadd.f32 %v9080_v62, %v12034_v54  ;;  %v8995_v24 = vpop.f32.mrb[20].mxu0 }
 0x2c2   :  { %6561 = vst [vmem:[%s12390_s3 + $0x80] sm:$0xff] %v6497_v11  ;;  %vm6368_vm4 = vcmp.gt.f32.partialorder %v6304_v7, 0.0  ;;  %v6436_v39 = vmul.f32 %v12039_v48, %v6304_v7  ;;  %v9081_v35 = vadd.f32 %v8995_v24, %v12007_v31  ;;  %v5996_v15 = vpop.f32.mrb[21].mxu0 }
 0x2c3   :  { %vm6367_vm5 = vcmp.gt.f32.partialorder %v6303_v20, 0.0  ;;  %v6435_v19 = vmul.f32 %v12039_v48, %v6303_v20  ;;  %v9082_v23 = vadd.f32 %v5996_v15, %v12009_v27 }
 0x2c4   :  { %v6500_v28 = vsel %vm6368_vm4, %v6304_v7, %v6436_v39  ;;  %v6306_v32 = vadd.f32 %v9081_v35, %v12034_v54 }
 0x2c5   :  { %6564 = vst [vmem:[%s12390_s3 + $0x98] sm:$0xff] %v6500_v28  ;;  %v6499_v36 = vsel %vm6367_vm5, %v6303_v20, %v6435_v19  ;;  %v6305_v53 = vadd.f32 %v9082_v23, %v12034_v54  ;;  %v8998_v6 = vpop.f32.mrb[22].mxu0 }
 0x2c6   :  { %6563 = vst [vmem:[%s12390_s3 + $0x90] sm:$0xff] %v6499_v36  ;;  %vm6370_vm6 = vcmp.gt.f32.partialorder %v6306_v32, 0.0  ;;  %v6438_v31 = vmul.f32 %v12039_v48, %v6306_v32  ;;  %v9083_v27 = vadd.f32 %v8998_v6, %v12011_v22  ;;  %v6006_v29 = vpop.f32.mrb[23].mxu0 }
 0x2c7   :  { %vm6369_vm7 = vcmp.gt.f32.partialorder %v6305_v53, 0.0  ;;  %v6437_v33 = vmul.f32 %v12039_v48, %v6305_v53  ;;  %v9084_v43 = vadd.f32 %v6006_v29, %v12013_v18 }
 0x2c8   :  { %v6502_v50 = vsel %vm6370_vm6, %v6306_v32, %v6438_v31  ;;  %v6308_v56 = vadd.f32 %v9083_v27, %v12034_v54 }
 0x2c9   :  { %6566 = vst [vmem:[%s12390_s3 + $0xa8] sm:$0xff] %v6502_v50  ;;  %v6501_v0 = vsel %vm6369_vm7, %v6305_v53, %v6437_v33  ;;  %v6307_v9 = vadd.f32 %v9084_v43, %v12034_v54  ;;  %v9001_v17 = vpop.f32.mrb[24].mxu0 }
 0x2ca   :  { %6565 = vst [vmem:[%s12390_s3 + $0xa0] sm:$0xff] %v6501_v0  ;;  %vm6372_vm8 = vcmp.gt.f32.partialorder %v6308_v56, 0.0  ;;  %v6440_v22 = vmul.f32 %v12039_v48, %v6308_v56  ;;  %v9085_v18 = vadd.f32 %v9001_v17, %v12015_v14  ;;  %v6016_v25 = vpop.f32.mrb[25].mxu0 }
 0x2cb   :  { %vm6371_vm9 = vcmp.gt.f32.partialorder %v6307_v9, 0.0  ;;  %v6439_v34 = vmul.f32 %v12039_v48, %v6307_v9  ;;  %v9086_v37 = vadd.f32 %v6016_v25, %v12017_v10 }
 0x2cc   :  { %v6504_v40 = vsel %vm6372_vm8, %v6308_v56, %v6440_v22  ;;  %v6310_v49 = vadd.f32 %v9085_v18, %v12034_v54 }
 0x2cd   :  { %6568 = vst [vmem:[%s12390_s3 + $0xb8] sm:$0xff] %v6504_v40  ;;  %v6503_v13 = vsel %vm6371_vm9, %v6307_v9, %v6439_v34  ;;  %v6309_v45 = vadd.f32 %v9086_v37, %v12034_v54  ;;  %v9004_v60 = vpop.f32.mrb[26].mxu0 }
 0x2ce   :  { %6567 = vst [vmem:[%s12390_s3 + $0xb0] sm:$0xff] %v6503_v13  ;;  %vm6374_vm10 = vcmp.gt.f32.partialorder %v6310_v49, 0.0  ;;  %v6442_v14 = vmul.f32 %v12039_v48, %v6310_v49  ;;  %v9087_v10 = vadd.f32 %v9004_v60, %v12019_v26  ;;  %v6026_v30 = vpop.f32.mrb[27].mxu0 }
 0x2cf   :  { %vm6373_vm11 = vcmp.gt.f32.partialorder %v6309_v45, 0.0  ;;  %v6441_v57 = vmul.f32 %v12039_v48, %v6309_v45  ;;  %v9088_v55 = vadd.f32 %v6026_v30, %v12021_v63 }
 0x2d0   :  { %v6506_v47 = vsel %vm6374_vm10, %v6310_v49, %v6442_v14  ;;  %v6312_v44 = vadd.f32 %v9087_v10, %v12034_v54 }
 0x2d1   :  { %6570 = vst [vmem:[%s12390_s3 + $0xc8] sm:$0xff] %v6506_v47  ;;  %v6505_v46 = vsel %vm6373_vm11, %v6309_v45, %v6441_v57  ;;  %v6311_v2 = vadd.f32 %v9088_v55, %v12034_v54  ;;  %v9007_v4 = vpop.f32.mrb[28].mxu0 }
 0x2d2   :  { %6569 = vst [vmem:[%s12390_s3 + $0xc0] sm:$0xff] %v6505_v46  ;;  %vm6376_vm12 = vcmp.gt.f32.partialorder %v6312_v44, 0.0  ;;  %v6444_v26 = vmul.f32 %v12039_v48, %v6312_v44  ;;  %v9089_v63 = vadd.f32 %v9007_v4, %v12023_v21  ;;  %v6036_v8 = vpop.f32.mrb[29].mxu0 }
 0x2d3   :  { %vm6375_vm13 = vcmp.gt.f32.partialorder %v6311_v2, 0.0  ;;  %v6443_v41 = vmul.f32 %v12039_v48, %v6311_v2  ;;  %v9090_v12 = vadd.f32 %v6036_v8, %v12025_v38 }
 0x2d4   :  { %v6508_v16 = vsel %vm6376_vm12, %v6312_v44, %v6444_v26  ;;  %v6314_v61 = vadd.f32 %v9089_v63, %v12034_v54 }
 0x2d5   :  { %6572 = vst [vmem:[%s12390_s3 + $0xd8] sm:$0xff] %v6508_v16  ;;  %v6507_v5 = vsel %vm6375_vm13, %v6311_v2, %v6443_v41  ;;  %v6313_v51 = vadd.f32 %v9090_v12, %v12034_v54  ;;  %v9010_v42 = vpop.f32.mrb[30].mxu0 }
 0x2d6   :  { %6571 = vst [vmem:[%s12390_s3 + $0xd0] sm:$0xff] %v6507_v5  ;;  %vm6378_vm14 = vcmp.gt.f32.partialorder %v6314_v61, 0.0  ;;  %v6446_v21 = vmul.f32 %v12039_v48, %v6314_v61  ;;  %v9091_v38 = vadd.f32 %v9010_v42, %v12027_v1  ;;  %v6046_v52 = vpop.f32.mrb[31].mxu0 }
 0x2d7   :  { %vm6377_vm15 = vcmp.gt.f32.partialorder %v6313_v51, 0.0  ;;  %v6445_v58 = vmul.f32 %v12039_v48, %v6313_v51  ;;  %v9092_v62 = vadd.f32 %v6046_v52, %v12029_v59 }
 0x2d8   :  { %v6510_v3 = vsel %vm6378_vm14, %v6314_v61, %v6446_v21  ;;  %v6316_v7 = vadd.f32 %v9091_v38, %v12034_v54  ;;  %v8621_v11 = vpop.f32.mrb[32].mxu1 }
 0x2d9   :  { %6574 = vst [vmem:[%s12390_s3 + $0xe8] sm:$0xff] %v6510_v3  ;;  %v6509_v20 = vsel %vm6377_vm15, %v6313_v51, %v6445_v58  ;;  %v6315_v24 = vadd.f32 %v9092_v62, %v12034_v54  ;;  %v9013_v39 = vpop.f32.mrb[32].mxu0  ;;  %v3215_v35 = vpop.f32.mrb[33].mxu1 }
 0x2da   :  { %6573 = vst [vmem:[%s12390_s3 + $0xe0] sm:$0xff] %v6509_v20  ;;  %vm6380_vm0 = vcmp.gt.f32.partialorder %v6316_v7, 0.0  ;;  %v6448_v1 = vmul.f32 %v12039_v48, %v6316_v7  ;;  %v9093_v59 = vadd.f32 %v9013_v39, %v8621_v11  ;;  %v6056_v15 = vpop.f32.mrb[33].mxu0 }
 0x2db   :  { %vm6379_vm1 = vcmp.gt.f32.partialorder %v6315_v24, 0.0  ;;  %v6447_v19 = vmul.f32 %v12039_v48, %v6315_v24  ;;  %v9094_v23 = vadd.f32 %v6056_v15, %v3215_v35 }
 0x2dc   :  { %v6512_v28 = vsel %vm6380_vm0, %v6316_v7, %v6448_v1  ;;  %v6318_v32 = vadd.f32 %v9093_v59, %v12034_v54  ;;  %v8624_v36 = vpop.f32.mrb[34].mxu1 }
 0x2dd   :  { %6576 = vst [vmem:[%s12390_s3 + $0xf8] sm:$0xff] %v6512_v28  ;;  %v6511_v53 = vsel %vm6379_vm1, %v6315_v24, %v6447_v19  ;;  %v6317_v6 = vadd.f32 %v9094_v23, %v12034_v54  ;;  %v9016_v31 = vpop.f32.mrb[34].mxu0  ;;  %v3225_v27 = vpop.f32.mrb[35].mxu1 }
 0x2de   :  { %6575 = vst [vmem:[%s12390_s3 + $0xf0] sm:$0xff] %v6511_v53  ;;  %vm6382_vm2 = vcmp.gt.f32.partialorder %v6318_v32, 0.0  ;;  %v6450_v29 = vmul.f32 %v12039_v48, %v6318_v32  ;;  %v9095_v33 = vadd.f32 %v9016_v31, %v8624_v36  ;;  %v6066_v43 = vpop.f32.mrb[35].mxu0 }
 0x2df   :  { %vm6381_vm3 = vcmp.gt.f32.partialorder %v6317_v6, 0.0  ;;  %v6449_v50 = vmul.f32 %v12039_v48, %v6317_v6  ;;  %v9096_v56 = vadd.f32 %v6066_v43, %v3225_v27 }
 0x2e0   :  { %v6514_v0 = vsel %vm6382_vm2, %v6318_v32, %v6450_v29  ;;  %v6320_v9 = vadd.f32 %v9095_v33, %v12034_v54  ;;  %v8627_v17 = vpop.f32.mrb[36].mxu1 }
 0x2e1   :  { %6578 = vst [vmem:[%s12390_s3 + $0x108] sm:$0xff] %v6514_v0  ;;  %v6513_v22 = vsel %vm6381_vm3, %v6317_v6, %v6449_v50  ;;  %v6319_v18 = vadd.f32 %v9096_v56, %v12034_v54  ;;  %v9019_v25 = vpop.f32.mrb[36].mxu0  ;;  %v3235_v34 = vpop.f32.mrb[37].mxu1 }
 0x2e2   :  { %6577 = vst [vmem:[%s12390_s3 + $0x100] sm:$0xff] %v6513_v22  ;;  %vm6384_vm4 = vcmp.gt.f32.partialorder %v6320_v9, 0.0  ;;  %v6452_v37 = vmul.f32 %v12039_v48, %v6320_v9  ;;  %v9097_v40 = vadd.f32 %v9019_v25, %v8627_v17  ;;  %v6076_v49 = vpop.f32.mrb[37].mxu0 }
 0x2e3   :  { %vm6383_vm5 = vcmp.gt.f32.partialorder %v6319_v18, 0.0  ;;  %v6451_v13 = vmul.f32 %v12039_v48, %v6319_v18  ;;  %v9098_v45 = vadd.f32 %v6076_v49, %v3235_v34 }
 0x2e4   :  { %v6516_v60 = vsel %vm6384_vm4, %v6320_v9, %v6452_v37  ;;  %v6322_v14 = vadd.f32 %v9097_v40, %v12034_v54  ;;  %v8630_v10 = vpop.f32.mrb[38].mxu1 }
 0x2e5   :  { %6580 = vst [vmem:[%s12390_s3 + $0x118] sm:$0xff] %v6516_v60  ;;  %v6515_v30 = vsel %vm6383_vm5, %v6319_v18, %v6451_v13  ;;  %v6321_v57 = vadd.f32 %v9098_v45, %v12034_v54  ;;  %v9022_v55 = vpop.f32.mrb[38].mxu0  ;;  %v3245_v47 = vpop.f32.mrb[39].mxu1 }
 0x2e6   :  { %6579 = vst [vmem:[%s12390_s3 + $0x110] sm:$0xff] %v6515_v30  ;;  %vm6386_vm6 = vcmp.gt.f32.partialorder %v6322_v14, 0.0  ;;  %v6454_v44 = vmul.f32 %v12039_v48, %v6322_v14  ;;  %v9099_v46 = vadd.f32 %v9022_v55, %v8630_v10  ;;  %v6086_v2 = vpop.f32.mrb[39].mxu0 }
 0x2e7   :  { %vm6385_vm7 = vcmp.gt.f32.partialorder %v6321_v57, 0.0  ;;  %v6453_v4 = vmul.f32 %v12039_v48, %v6321_v57  ;;  %v9100_v26 = vadd.f32 %v6086_v2, %v3245_v47 }
 0x2e8   :  { %v6518_v63 = vsel %vm6386_vm6, %v6322_v14, %v6454_v44  ;;  %v6324_v8 = vadd.f32 %v9099_v46, %v12034_v54  ;;  %v8633_v41 = vpop.f32.mrb[40].mxu1 }
 0x2e9   :  { %6582 = vst [vmem:[%s12390_s3 + $0x128] sm:$0xff] %v6518_v63  ;;  %v6517_v12 = vsel %vm6385_vm7, %v6321_v57, %v6453_v4  ;;  %v6323_v16 = vadd.f32 %v9100_v26, %v12034_v54  ;;  %v9025_v61 = vpop.f32.mrb[40].mxu0  ;;  %v3255_v5 = vpop.f32.mrb[41].mxu1 }
 0x2ea   :  { %6581 = vst [vmem:[%s12390_s3 + $0x120] sm:$0xff] %v6517_v12  ;;  %vm6388_vm8 = vcmp.gt.f32.partialorder %v6324_v8, 0.0  ;;  %v6456_v51 = vmul.f32 %v12039_v48, %v6324_v8  ;;  %v9101_v42 = vadd.f32 %v9025_v61, %v8633_v41  ;;  %v6096_v21 = vpop.f32.mrb[41].mxu0 }
 0x2eb   :  { %vm6387_vm9 = vcmp.gt.f32.partialorder %v6323_v16, 0.0  ;;  %v6455_v38 = vmul.f32 %v12039_v48, %v6323_v16  ;;  %v9102_v52 = vadd.f32 %v6096_v21, %v3255_v5 }
 0x2ec   :  { %v6520_v58 = vsel %vm6388_vm8, %v6324_v8, %v6456_v51  ;;  %v6326_v62 = vadd.f32 %v9101_v42, %v12034_v54  ;;  %v8636_v3 = vpop.f32.mrb[42].mxu1 }
 0x2ed   :  { %6584 = vst [vmem:[%s12390_s3 + $0x138] sm:$0xff] %v6520_v58  ;;  %v6519_v7 = vsel %vm6387_vm9, %v6323_v16, %v6455_v38  ;;  %v6325_v11 = vadd.f32 %v9102_v52, %v12034_v54  ;;  %v9028_v20 = vpop.f32.mrb[42].mxu0  ;;  %v3265_v24 = vpop.f32.mrb[43].mxu1 }
 0x2ee   :  { %6583 = vst [vmem:[%s12390_s3 + $0x130] sm:$0xff] %v6519_v7  ;;  %vm6390_vm10 = vcmp.gt.f32.partialorder %v6326_v62, 0.0  ;;  %v6458_v39 = vmul.f32 %v12039_v48, %v6326_v62  ;;  %v9103_v35 = vadd.f32 %v9028_v20, %v8636_v3  ;;  %v6106_v1 = vpop.f32.mrb[43].mxu0 }
 0x2ef   :  { %vm6389_vm11 = vcmp.gt.f32.partialorder %v6325_v11, 0.0  ;;  %v6457_v59 = vmul.f32 %v12039_v48, %v6325_v11  ;;  %v9104_v15 = vadd.f32 %v6106_v1, %v3265_v24 }
 0x2f0   :  { %v6522_v19 = vsel %vm6390_vm10, %v6326_v62, %v6458_v39  ;;  %v6328_v23 = vadd.f32 %v9103_v35, %v12034_v54  ;;  %v8639_v28 = vpop.f32.mrb[44].mxu1 }
 0x2f1   :  { %6586 = vst [vmem:[%s12390_s3 + $0x148] sm:$0xff] %v6522_v19  ;;  %v6521_v32 = vsel %vm6389_vm11, %v6325_v11, %v6457_v59  ;;  %v6327_v36 = vadd.f32 %v9104_v15, %v12034_v54  ;;  %v9031_v53 = vpop.f32.mrb[44].mxu0  ;;  %v3275_v6 = vpop.f32.mrb[45].mxu1 }
 0x2f2   :  { %6585 = vst [vmem:[%s12390_s3 + $0x140] sm:$0xff] %v6521_v32  ;;  %vm6392_vm12 = vcmp.gt.f32.partialorder %v6328_v23, 0.0  ;;  %v6460_v31 = vmul.f32 %v12039_v48, %v6328_v23  ;;  %v9105_v27 = vadd.f32 %v9031_v53, %v8639_v28  ;;  %v6116_v29 = vpop.f32.mrb[45].mxu0 }
 0x2f3   :  { %vm6391_vm13 = vcmp.gt.f32.partialorder %v6327_v36, 0.0  ;;  %v6459_v33 = vmul.f32 %v12039_v48, %v6327_v36  ;;  %v9106_v43 = vadd.f32 %v6116_v29, %v3275_v6 }
 0x2f4   :  { %v6524_v50 = vsel %vm6392_vm12, %v6328_v23, %v6460_v31  ;;  %v6330_v56 = vadd.f32 %v9105_v27, %v12034_v54  ;;  %v8642_v0 = vpop.f32.mrb[46].mxu1 }
 0x2f5   :  { %6588 = vst [vmem:[%s12390_s3 + $0x158] sm:$0xff] %v6524_v50  ;;  %v6523_v9 = vsel %vm6391_vm13, %v6327_v36, %v6459_v33  ;;  %v6329_v17 = vadd.f32 %v9106_v43, %v12034_v54  ;;  %v9034_v22 = vpop.f32.mrb[46].mxu0  ;;  %v3285_v18 = vpop.f32.mrb[47].mxu1 }
 0x2f6   :  { %6587 = vst [vmem:[%s12390_s3 + $0x150] sm:$0xff] %v6523_v9  ;;  %vm6394_vm14 = vcmp.gt.f32.partialorder %v6330_v56, 0.0  ;;  %v6462_v25 = vmul.f32 %v12039_v48, %v6330_v56  ;;  %v9107_v34 = vadd.f32 %v9034_v22, %v8642_v0  ;;  %v6126_v37 = vpop.f32.mrb[47].mxu0 }
 0x2f7   :  { %vm6393_vm15 = vcmp.gt.f32.partialorder %v6329_v17, 0.0  ;;  %v6461_v40 = vmul.f32 %v12039_v48, %v6329_v17  ;;  %v9108_v49 = vadd.f32 %v6126_v37, %v3285_v18 }
 0x2f8   :  { %v6526_v13 = vsel %vm6394_vm14, %v6330_v56, %v6462_v25  ;;  %v6332_v45 = vadd.f32 %v9107_v34, %v12034_v54  ;;  %v8645_v60 = vpop.f32.mrb[48].mxu1 }
 0x2f9   :  { %6590 = vst [vmem:[%s12390_s3 + $0x168] sm:$0xff] %v6526_v13  ;;  %v6525_v14 = vsel %vm6393_vm15, %v6329_v17, %v6461_v40  ;;  %v6331_v10 = vadd.f32 %v9108_v49, %v12034_v54  ;;  %v9037_v30 = vpop.f32.mrb[48].mxu0  ;;  %v3295_v57 = vpop.f32.mrb[49].mxu1 }
 0x2fa   :  { %6589 = vst [vmem:[%s12390_s3 + $0x160] sm:$0xff] %v6525_v14  ;;  %vm6396_vm0 = vcmp.gt.f32.partialorder %v6332_v45, 0.0  ;;  %v6464_v55 = vmul.f32 %v12039_v48, %v6332_v45  ;;  %v9109_v47 = vadd.f32 %v9037_v30, %v8645_v60  ;;  %v6136_v44 = vpop.f32.mrb[49].mxu0 }
 0x2fb   :  { %vm6395_vm1 = vcmp.gt.f32.partialorder %v6331_v10, 0.0  ;;  %v6463_v46 = vmul.f32 %v12039_v48, %v6331_v10  ;;  %v9110_v2 = vadd.f32 %v6136_v44, %v3295_v57 }
 0x2fc   :  { %v6528_v4 = vsel %vm6396_vm0, %v6332_v45, %v6464_v55  ;;  %v6334_v26 = vadd.f32 %v9109_v47, %v12034_v54  ;;  %v8648_v63 = vpop.f32.mrb[50].mxu1 }
 0x2fd   :  { %6592 = vst [vmem:[%s12390_s3 + $0x178] sm:$0xff] %v6528_v4  ;;  %v6527_v8 = vsel %vm6395_vm1, %v6331_v10, %v6463_v46  ;;  %v6333_v41 = vadd.f32 %v9110_v2, %v12034_v54  ;;  %v9040_v12 = vpop.f32.mrb[50].mxu0  ;;  %v3305_v16 = vpop.f32.mrb[51].mxu1 }
 0x2fe   :  { %6591 = vst [vmem:[%s12390_s3 + $0x170] sm:$0xff] %v6527_v8  ;;  %vm6398_vm2 = vcmp.gt.f32.partialorder %v6334_v26, 0.0  ;;  %v6466_v61 = vmul.f32 %v12039_v48, %v6334_v26  ;;  %v9111_v5 = vadd.f32 %v9040_v12, %v8648_v63  ;;  %v6146_v51 = vpop.f32.mrb[51].mxu0 }
 0x2ff   :  { %vm6397_vm3 = vcmp.gt.f32.partialorder %v6333_v41, 0.0  ;;  %v6465_v42 = vmul.f32 %v12039_v48, %v6333_v41  ;;  %v9112_v21 = vadd.f32 %v6146_v51, %v3305_v16 }
 0x300   :  { %v6530_v38 = vsel %vm6398_vm2, %v6334_v26, %v6466_v61  ;;  %v6336_v52 = vadd.f32 %v9111_v5, %v12034_v54  ;;  %v8651_v58 = vpop.f32.mrb[52].mxu1 }
 0x301   :  { %6594 = vst [vmem:[%s12390_s3 + $0x188] sm:$0xff] %v6530_v38  ;;  %v6529_v62 = vsel %vm6397_vm3, %v6333_v41, %v6465_v42  ;;  %v6335_v3 = vadd.f32 %v9112_v21, %v12034_v54  ;;  %v9043_v7 = vpop.f32.mrb[52].mxu0  ;;  %v3315_v11 = vpop.f32.mrb[53].mxu1 }
 0x302   :  { %6593 = vst [vmem:[%s12390_s3 + $0x180] sm:$0xff] %v6529_v62  ;;  %vm6400_vm4 = vcmp.gt.f32.partialorder %v6336_v52, 0.0  ;;  %v6468_v20 = vmul.f32 %v12039_v48, %v6336_v52  ;;  %v9113_v24 = vadd.f32 %v9043_v7, %v8651_v58  ;;  %v6156_v39 = vpop.f32.mrb[53].mxu0 }
 0x303   :  { %vm6399_vm5 = vcmp.gt.f32.partialorder %v6335_v3, 0.0  ;;  %v6467_v35 = vmul.f32 %v12039_v48, %v6335_v3  ;;  %v9114_v1 = vadd.f32 %v6156_v39, %v3315_v11 }
 0x304   :  { %v6532_v59 = vsel %vm6400_vm4, %v6336_v52, %v6468_v20  ;;  %v6338_v15 = vadd.f32 %v9113_v24, %v12034_v54  ;;  %v8654_v19 = vpop.f32.mrb[54].mxu1 }
 0x305   :  { %6596 = vst [vmem:[%s12390_s3 + $0x198] sm:$0xff] %v6532_v59  ;;  %v6531_v23 = vsel %vm6399_vm5, %v6335_v3, %v6467_v35  ;;  %v6337_v28 = vadd.f32 %v9114_v1, %v12034_v54  ;;  %v9046_v32 = vpop.f32.mrb[54].mxu0  ;;  %v3325_v36 = vpop.f32.mrb[55].mxu1 }
 0x306   :  { %6595 = vst [vmem:[%s12390_s3 + $0x190] sm:$0xff] %v6531_v23  ;;  %vm6402_vm6 = vcmp.gt.f32.partialorder %v6338_v15, 0.0  ;;  %v6470_v53 = vmul.f32 %v12039_v48, %v6338_v15  ;;  %v9115_v6 = vadd.f32 %v9046_v32, %v8654_v19  ;;  %v6166_v31 = vpop.f32.mrb[55].mxu0 }
 0x307   :  { %vm6401_vm7 = vcmp.gt.f32.partialorder %v6337_v28, 0.0  ;;  %v6469_v27 = vmul.f32 %v12039_v48, %v6337_v28  ;;  %v9116_v29 = vadd.f32 %v6166_v31, %v3325_v36 }
 0x308   :  { %v6534_v33 = vsel %vm6402_vm6, %v6338_v15, %v6470_v53  ;;  %v6340_v43 = vadd.f32 %v9115_v6, %v12034_v54  ;;  %v8657_v50 = vpop.f32.mrb[56].mxu1 }
 0x309   :  { %6598 = vst [vmem:[%s12390_s3 + $0x1a8] sm:$0xff] %v6534_v33  ;;  %v6533_v56 = vsel %vm6401_vm7, %v6337_v28, %v6469_v27  ;;  %v6339_v0 = vadd.f32 %v9116_v29, %v12034_v54  ;;  %v9049_v9 = vpop.f32.mrb[56].mxu0  ;;  %v3335_v17 = vpop.f32.mrb[57].mxu1 }
 0x30a   :  { %6597 = vst [vmem:[%s12390_s3 + $0x1a0] sm:$0xff] %v6533_v56  ;;  %vm6404_vm8 = vcmp.gt.f32.partialorder %v6340_v43, 0.0  ;;  %v6472_v22 = vmul.f32 %v12039_v48, %v6340_v43  ;;  %v9117_v18 = vadd.f32 %v9049_v9, %v8657_v50  ;;  %v6176_v25 = vpop.f32.mrb[57].mxu0 }
 0x30b   :  { %vm6403_vm9 = vcmp.gt.f32.partialorder %v6339_v0, 0.0  ;;  %v6471_v34 = vmul.f32 %v12039_v48, %v6339_v0  ;;  %v9118_v37 = vadd.f32 %v6176_v25, %v3335_v17 }
 0x30c   :  { %v6536_v40 = vsel %vm6404_vm8, %v6340_v43, %v6472_v22  ;;  %v6342_v49 = vadd.f32 %v9117_v18, %v12034_v54  ;;  %v8660_v13 = vpop.f32.mrb[58].mxu1 }
 0x30d   :  { %6600 = vst [vmem:[%s12390_s3 + $0x1b8] sm:$0xff] %v6536_v40  ;;  %v6535_v45 = vsel %vm6403_vm9, %v6339_v0, %v6471_v34  ;;  %v6341_v60 = vadd.f32 %v9118_v37, %v12034_v54  ;;  %v9052_v14 = vpop.f32.mrb[58].mxu0  ;;  %v3345_v10 = vpop.f32.mrb[59].mxu1 }
 0x30e   :  { %6599 = vst [vmem:[%s12390_s3 + $0x1b0] sm:$0xff] %v6535_v45  ;;  %vm6406_vm10 = vcmp.gt.f32.partialorder %v6342_v49, 0.0  ;;  %v6474_v30 = vmul.f32 %v12039_v48, %v6342_v49  ;;  %v9119_v57 = vadd.f32 %v9052_v14, %v8660_v13  ;;  %v6186_v55 = vpop.f32.mrb[59].mxu0 }
 0x30f   :  { %vm6405_vm11 = vcmp.gt.f32.partialorder %v6341_v60, 0.0  ;;  %v6473_v47 = vmul.f32 %v12039_v48, %v6341_v60  ;;  %v9120_v44 = vadd.f32 %v6186_v55, %v3345_v10 }
 0x310   :  { %v6538_v46 = vsel %vm6406_vm10, %v6342_v49, %v6474_v30  ;;  %v6344_v2 = vadd.f32 %v9119_v57, %v12034_v54  ;;  %v8663_v4 = vpop.f32.mrb[60].mxu1 }
 0x311   :  { %6602 = vst [vmem:[%s12390_s3 + $0x1c8] sm:$0xff] %v6538_v46  ;;  %v6537_v26 = vsel %vm6405_vm11, %v6341_v60, %v6473_v47  ;;  %v6343_v63 = vadd.f32 %v9120_v44, %v12034_v54  ;;  %v9055_v8 = vpop.f32.mrb[60].mxu0  ;;  %v3355_v41 = vpop.f32.mrb[61].mxu1 }
 0x312   :  { %6601 = vst [vmem:[%s12390_s3 + $0x1c0] sm:$0xff] %v6537_v26  ;;  %vm6408_vm12 = vcmp.gt.f32.partialorder %v6344_v2, 0.0  ;;  %v6476_v12 = vmul.f32 %v12039_v48, %v6344_v2  ;;  %v9121_v16 = vadd.f32 %v9055_v8, %v8663_v4  ;;  %v6196_v61 = vpop.f32.mrb[61].mxu0 }
 0x313   :  { %vm6407_vm13 = vcmp.gt.f32.partialorder %v6343_v63, 0.0  ;;  %v6475_v5 = vmul.f32 %v12039_v48, %v6343_v63  ;;  %v9122_v51 = vadd.f32 %v6196_v61, %v3355_v41 }
 0x314   :  { %v6540_v42 = vsel %vm6408_vm12, %v6344_v2, %v6476_v12  ;;  %v6346_v21 = vadd.f32 %v9121_v16, %v12034_v54  ;;  %v8666_v38 = vpop.f32.mrb[62].mxu1 }
 0x315   :  { %6604 = vst [vmem:[%s12390_s3 + $0x1d8] sm:$0xff] %v6540_v42  ;;  %v6539_v52 = vsel %vm6407_vm13, %v6343_v63, %v6475_v5  ;;  %v6345_v58 = vadd.f32 %v9122_v51, %v12034_v54  ;;  %v9058_v62 = vpop.f32.mrb[62].mxu0  ;;  %v3365_v3 = vpop.f32.mrb[63].mxu1 }
 0x316   :  { %6603 = vst [vmem:[%s12390_s3 + $0x1d0] sm:$0xff] %v6539_v52  ;;  %vm6410_vm14 = vcmp.gt.f32.partialorder %v6346_v21, 0.0  ;;  %v6478_v7 = vmul.f32 %v12039_v48, %v6346_v21  ;;  %v9123_v11 = vadd.f32 %v9058_v62, %v8666_v38  ;;  %v6206_v20 = vpop.f32.mrb[63].mxu0 }
 0x317   :  { %vm6409_vm15 = vcmp.gt.f32.partialorder %v6345_v58, 0.0  ;;  %v6477_v24 = vmul.f32 %v12039_v48, %v6345_v58  ;;  %v9124_v39 = vadd.f32 %v6206_v20, %v3365_v3 }
 0x318   :  { %v6542_v35 = vsel %vm6410_vm14, %v6346_v21, %v6478_v7  ;;  %v6348_v1 = vadd.f32 %v9123_v11, %v12034_v54 }
 0x319   :  { %6606 = vst [vmem:[%s12390_s3 + $0x1e8] sm:$0xff] %v6542_v35  ;;  %v6541_v59 = vsel %vm6409_vm15, %v6345_v58, %v6477_v24  ;;  %v6347_v15 = vadd.f32 %v9124_v39, %v12034_v54 }
 0x31a   :  { %6605 = vst [vmem:[%s12390_s3 + $0x1e0] sm:$0xff] %v6541_v59  ;;  %vm6412_vm0 = vcmp.gt.f32.partialorder %v6348_v1, 0.0  ;;  %v6480_v19 = vmul.f32 %v12039_v48, %v6348_v1 }
 0x31b   :  { %vm6411_vm1 = vcmp.gt.f32.partialorder %v6347_v15, 0.0  ;;  %v6479_v23 = vmul.f32 %v12039_v48, %v6347_v15 }
 0x31c   :  { %v6544_v28 = vsel %vm6412_vm0, %v6348_v1, %v6480_v19 }
 0x31d   :  { %6608 = vst [vmem:[%s12390_s3 + $0x1f8] sm:$0xff] %v6544_v28  ;;  %v6543_v32 = vsel %vm6411_vm1, %v6347_v15, %v6479_v23 }
 0x31e   :  { %6607 = vst [vmem:[%s12390_s3 + $0x1f0] sm:$0xff] %v6543_v32 }

</bundles_post_ra>
